<compile_context>
chip_gen: v7x
topology: tpu7x:2x2x1
jax: 0.10.0
libtpu: 0.0.40
codegen_flags: <defaults>
</compile_context>

<pallas_src>
import functools

import numpy as np
import jax
import jax.numpy as jnp
from jax.experimental import pallas as pl
from jax.experimental.pallas import tpu as pltpu


# ----------------------------- Pallas kernels --------------------------------

def _matmul_bias_act_kernel(x_ref, w_ref, b_ref, o_ref, *, relu):
    acc = jnp.dot(x_ref[...], w_ref[...], preferred_element_type=jnp.float32)
    acc = acc + b_ref[...]
    if relu:
        acc = jnp.maximum(acc, 0.0)
    o_ref[...] = acc.astype(o_ref.dtype)


def fused_matmul(x, w, b2d, relu, out_dtype=jnp.bfloat16, tile_m=512):
    """maybe_relu(x @ w + b) on the MXU.

    x: (M, K) bf16, w: (K, N) bf16 (BN already folded), b2d: (1, N) f32.
    Grid tiles M only; K and N are full-dim blocks (small for every layer of
    this model: K <= 1152, N <= 256), so no padding or output slicing is needed
    and per-operand VMEM stays at a few hundred KiB.
    """
    M, K = x.shape
    Kw, N = w.shape
    assert K == Kw
    tm = M if M <= tile_m else tile_m          # tile_m is a multiple of 8
    grid = (pl.cdiv(M, tm),)
    return pl.pallas_call(
        functools.partial(_matmul_bias_act_kernel, relu=relu),
        out_shape=jax.ShapeDtypeStruct((M, N), out_dtype),
        grid=grid,
        in_specs=[
            pl.BlockSpec((tm, K), lambda i: (i, 0)),
            pl.BlockSpec((K, N), lambda i: (0, 0)),
            pl.BlockSpec((1, N), lambda i: (0, 0)),
        ],
        out_specs=pl.BlockSpec((tm, N), lambda i: (i, 0)),
        compiler_params=pltpu.CompilerParams(
            dimension_semantics=("parallel",),
            vmem_limit_bytes=32 * 1024 * 1024),
    )(x, w, b2d)


def _fc_fused_kernel(x_ref, w1_ref, b1_ref, w2_ref, b2_ref, w3_ref, b3_ref, o_ref):
    h = jnp.dot(x_ref[...], w1_ref[...], preferred_element_type=jnp.float32) + b1_ref[...]
    h = jnp.maximum(h, 0.0)                                   # F.relu(fc1(x))
    h = jnp.dot(h.astype(jnp.bfloat16), w2_ref[...],
                preferred_element_type=jnp.float32) + b2_ref[...]
    h = jnp.maximum(h, 0.0)                                   # F.relu(fc2(x))
    # F.dropout(p, training=False) == identity (eval semantics).
    y = jnp.dot(h.astype(jnp.bfloat16), w3_ref[...],
                preferred_element_type=jnp.float32) + b3_ref[...]   # fc3(x)
    o_ref[...] = y.astype(o_ref.dtype)


def fused_fc3(x, w1, b1, w2, b2, w3, b3, tile_m=512):
    """ReLU(fc1) -> ReLU(fc2) -> (dropout=id) -> fc3, fused in one kernel.

    All three weight matrices fit trivially in VMEM, so the tiny (M, hidden)
    intermediates never touch HBM.
    """
    M, K1 = x.shape
    H1, H2, E = w1.shape[1], w2.shape[1], w3.shape[1]
    tm = M if M <= tile_m else tile_m
    grid = (pl.cdiv(M, tm),)
    return pl.pallas_call(
        _fc_fused_kernel,
        out_shape=jax.ShapeDtypeStruct((M, E), jnp.float32),
        grid=grid,
        in_specs=[
            pl.BlockSpec((tm, K1), lambda i: (i, 0)),
            pl.BlockSpec((K1, H1), lambda i: (0, 0)),
            pl.BlockSpec((1, H1), lambda i: (0, 0)),
            pl.BlockSpec((H1, H2), lambda i: (0, 0)),
            pl.BlockSpec((1, H2), lambda i: (0, 0)),
            pl.BlockSpec((H2, E), lambda i: (0, 0)),
            pl.BlockSpec((1, E), lambda i: (0, 0)),
        ],
        out_specs=pl.BlockSpec((tm, E), lambda i: (i, 0)),
        compiler_params=pltpu.CompilerParams(
            dimension_semantics=("parallel",),
            vmem_limit_bytes=32 * 1024 * 1024),
    )(x, w1, b1, w2, b2, w3, b3)


# -------------------------- pure-JAX reference path --------------------------

def _ref_matmul(x, w, b2d, relu, out_dtype=jnp.bfloat16):
    y = jnp.dot(x.astype(jnp.bfloat16), w, preferred_element_type=jnp.float32) + b2d
    if relu:
        y = jnp.maximum(y, 0.0)
    return y.astype(out_dtype)


# ------------------------------- glue (JAX) -----------------------------------

def im2col(x, kh, kw, sh, sw):
    """x: (N, H, W, C) -> ((N*OH*OW, kh*kw*C), OH, OW), stride s, padding 0."""
    N, H, W, C = x.shape
    OH = (H - kh) // sh + 1
    OW = (W - kw) // sw + 1
    cols = []
    for i in range(kh):
        for j in range(kw):
            cols.append(x[:, i:i + sh * OH:sh, j:j + sw * OW:sw, :])
    cols = jnp.stack(cols, axis=3)                 # (N, OH, OW, kh*kw, C)
    return cols.reshape(N * OH * OW, kh * kw * C), OH, OW


def prepare_params(params):
    """Fold BatchNorm(eval) into the conv weights/bias and cast weights to bf16.

    Done ONCE, outside the per-forward / per-frame path.
    """
    prepped = {}
    for li in range(1, 5):
        w, b, gamma, beta, mean, var = params[f"conv{li}"]   # w: (kh*kw*Cin, Cout)
        scale = gamma / jnp.sqrt(var + 1e-5)
        w_eff = (w * scale[None, :]).astype(jnp.bfloat16)
        b_eff = ((b - mean) * scale + beta).astype(jnp.float32).reshape(1, -1)
        prepped[f"conv{li}"] = (w_eff, b_eff)
    for li in range(1, 4):
        w, b = params[f"fc{li}"]
        prepped[f"fc{li}"] = (w.astype(jnp.bfloat16),
                              b.astype(jnp.float32).reshape(1, -1))
    return prepped


_CONV_CFG = (((5, 5), (2, 2)), ((3, 3), (2, 2)), ((3, 3), (2, 2)), ((3, 3), (2, 2)))


def encoder_cnn_forward(prepped, x_3d, use_pallas=True):
    """x_3d: (B, T, 3, H, W) float32 -> (B, T, CNN_embed_dim) float32."""
    B, T, C, H, W = x_3d.shape
    mm = fused_matmul if use_pallas else _ref_matmul

    # Fold T into the batch: one conv/fc chain for all frames.
    x = x_3d.reshape(B * T, C, H, W)
    x = jnp.transpose(x, (0, 2, 3, 1)).astype(jnp.bfloat16)   # NCHW -> NHWC, bf16

    for li, (k, s) in enumerate(_CONV_CFG, start=1):
        w, b = prepped[f"conv{li}"]
        cols, OH, OW = im2col(x, k[0], k[1], s[0], s[1])
        y = mm(cols, w, b, True)                              # conv+BN+ReLU
        x = y.reshape(B * T, OH, OW, w.shape[1])

    # x.view(x.size(0), -1) in PyTorch is NCHW-ordered.
    x = jnp.transpose(x, (0, 3, 1, 2)).reshape(B * T, -1)

    w1, b1 = prepped["fc1"]
    w2, b2 = prepped["fc2"]
    w3, b3 = prepped["fc3"]
    if use_pallas:
        x = fused_fc3(x, w1, b1, w2, b2, w3, b3)
    else:
        h = _ref_matmul(x, w1, b1, True)
        h = _ref_matmul(h, w2, b2, True)
        x = _ref_matmul(h, w3, b3, False, out_dtype=jnp.float32)

    # torch.stack(dim=0).transpose_(0,1) == (B, T, E) here.
    return x.reshape(B, T, -1)


# ------------------------------ parameters ------------------------------------

def conv2D_output_size(img_size, padding, kernel_size, stride):
    return (
        int(np.floor((img_size[0] + 2 * padding[0] - (kernel_size[0] - 1) - 1) / stride[0] + 1)),
        int(np.floor((img_size[1] + 2 * padding[1] - (kernel_size[1] - 1) - 1) / stride[1] + 1)),
    )


def init_params(key, img_x, img_y, fc_hidden1, fc_hidden2, embed_dim):
    ch = (3, 32, 64, 128, 256)
    ks = ((5, 5), (3, 3), (3, 3), (3, 3))
    out_hw = (img_x, img_y)
    params = {}
    for li in range(4):
        cin, cout = ch[li], ch[li + 1]
        kh, kw = ks[li]
        k1, k2, k3, k4, k5, k6 = jax.random.split(jax.random.fold_in(key, li), 6)
        fan_in = cin * kh * kw
        w = jax.random.normal(k1, (kh * kw * cin, cout), jnp.float32) / np.sqrt(fan_in)
        b = 0.05 * jax.random.normal(k2, (cout,), jnp.float32)
        gamma = 1.0 + 0.1 * jax.random.normal(k3, (cout,), jnp.float32)
        beta = 0.05 * jax.random.normal(k4, (cout,), jnp.float32)
        mean = 0.05 * jax.random.normal(k5, (cout,), jnp.float32)
        var = jnp.abs(1.0 + 0.1 * jax.random.normal(k6, (cout,), jnp.float32))
        params[f"conv{li + 1}"] = (w, b, gamma, beta, mean, var)
        out_hw = conv2D_output_size(out_hw, (0, 0), ks[li], (2, 2))

    flat = ch[4] * out_hw[0] * out_hw[1]
    dims = [(flat, fc_hidden1), (fc_hidden1, fc_hidden2), (fc_hidden2, embed_dim)]
    for li, (din, dout) in enumerate(dims):
        k1, k2 = jax.random.split(jax.random.fold_in(key, 100 + li))
        w = jax.random.normal(k1, (din, dout), jnp.float32) / np.sqrt(din)
        b = 0.05 * jax.random.normal(k2, (dout,), jnp.float32)
        params[f"fc{li + 1}"] = (w, b)
    return params, out_hw


# --------------------------------- main ----------------------------------------

if __name__ == "__main__":
    # Small shapes consistent with the module: kernels (5,3,3,3), strides 2,
    # no padding -> img 46x46 shrinks 46 -> 21 -> 10 -> 4 -> 1.
    B, T, C, IMG_X, IMG_Y = 2, 3, 3, 46, 46
    FC_H1, FC_H2, EMBED = 32, 32, 16

    key = jax.random.PRNGKey(0)
    kx, kp = jax.random.split(key)
    x_3d = jax.random.normal(kx, (B, T, C, IMG_X, IMG_Y), jnp.float32)

    params, conv4_hw = init_params(kp, IMG_X, IMG_Y, FC_H1, FC_H2, EMBED)
    prepped = prepare_params(params)   # BN folding + bf16 casts hoisted here

    fwd = jax.jit(functools.partial(encoder_cnn_forward, use_pallas=True))
    out = jax.block_until_ready(fwd(prepped, x_3d))
    assert out.shape == (B, T, EMBED), out.shape

    # Pure-JAX reference (same bf16/f32 math, XLA matmuls) for a sanity check.
    ref_fwd = jax.jit(functools.partial(encoder_cnn_forward, use_pallas=False))
    ref = jax.block_until_ready(ref_fwd(prepped, x_3d))
    np.testing.assert_allclose(np.asarray(out), np.asarray(ref), rtol=2e-2, atol=2e-2)

    print("KERNEL_OK")
</pallas_src>

<mosaic_0001>
module attributes {stable_mosaic.version = 11 : i64} {
  func.func @_matmul_bias_act_kernel(%arg0: i32, %arg1: memref<512x75xbf16, #tpu.memory_space<vmem>>, %arg2: memref<75x32xbf16, #tpu.memory_space<vmem>>, %arg3: memref<1x32xf32, #tpu.memory_space<vmem>>, %arg4: memref<512x32xbf16, #tpu.memory_space<vmem>>) attributes {dimension_semantics = [#tpu.dimension_semantics<parallel>], iteration_bounds = array<i64: 6>, scalar_prefetch = 0 : i64, scratch_operands = 0 : i64, tpu.core_type = #tpu.core_type<tc>, window_params = [{transform_indices = @transform_0, window_bounds = array<i64: 512, 75>}, {pipeline_mode = #tpu.pipeline_mode<synchronous>, transform_indices = @transform_1, window_bounds = array<i64: 75, 32>}, {pipeline_mode = #tpu.pipeline_mode<synchronous>, transform_indices = @transform_2, window_bounds = array<i64: 1, 32>}, {transform_indices = @transform_3, window_bounds = array<i64: 512, 32>}]} {
    %c0 = arith.constant 0 : index
    %c0_0 = arith.constant 0 : index
    %0 = vector.load %arg1[%c0, %c0_0] : memref<512x75xbf16, #tpu.memory_space<vmem>>, vector<512x75xbf16>
    %c0_1 = arith.constant 0 : index
    %c0_2 = arith.constant 0 : index
    %1 = vector.load %arg2[%c0_1, %c0_2] : memref<75x32xbf16, #tpu.memory_space<vmem>>, vector<75x32xbf16>
    %cst = arith.constant dense<0.000000e+00> : vector<512x32xf32>
    %2 = tpu.matmul %0, %1, %cst {dimension_numbers = #tpu.dot_dimension_numbers<[1], [0], [0], [1], [0, 0, 1, 1], [], []>} : vector<512x75xbf16>, vector<75x32xbf16>, vector<512x32xf32> -> vector<512x32xf32>
    %c0_3 = arith.constant 0 : index
    %c0_4 = arith.constant 0 : index
    %3 = vector.load %arg3[%c0_3, %c0_4] : memref<1x32xf32, #tpu.memory_space<vmem>>, vector<1x32xf32>
    %4 = vector.broadcast %3 : vector<1x32xf32> to vector<512x32xf32>
    %5 = arith.addf %2, %4 : vector<512x32xf32>
    %cst_5 = arith.constant 0.000000e+00 : f32
    %6 = vector.broadcast %cst_5 : f32 to vector<512x32xf32>
    %7 = arith.maximumf %5, %6 : vector<512x32xf32>
    %8 = arith.truncf %7 : vector<512x32xf32> to vector<512x32xbf16>
    %c0_6 = arith.constant 0 : index
    %c0_7 = arith.constant 0 : index
    %9 = vector.load %arg4[%c0_6, %c0_7] : memref<512x32xbf16, #tpu.memory_space<vmem>>, vector<512x32xbf16>
    tpu.vector_store %arg4[%c0_6, %c0_7], %8 {strides = array<i32>} : memref<512x32xbf16, #tpu.memory_space<vmem>>, vector<512x32xbf16>,
    return
  }
  func.func @transform_0(%arg0: i32) -> (i32, i32) {
    %c0_i32 = arith.constant 0 : i32
    %c0_i32_0 = arith.constant 0 : i32
    return %arg0, %c0_i32 : i32, i32
  }
  func.func @transform_1(%arg0: i32) -> (i32, i32) {
    %c0_i32 = arith.constant 0 : i32
    %c0_i32_0 = arith.constant 0 : i32
    %c0_i32_1 = arith.constant 0 : i32
    return %c0_i32, %c0_i32_0 : i32, i32
  }
  func.func @transform_2(%arg0: i32) -> (i32, i32) {
    %c0_i32 = arith.constant 0 : i32
    %c0_i32_0 = arith.constant 0 : i32
    %c0_i32_1 = arith.constant 0 : i32
    return %c0_i32, %c0_i32_0 : i32, i32
  }
  func.func @transform_3(%arg0: i32) -> (i32, i32) {
    %c0_i32 = arith.constant 0 : i32
    %c0_i32_0 = arith.constant 0 : i32
    return %arg0, %c0_i32 : i32, i32
  }
}

module attributes {stable_mosaic.version = 11 : i64} {
  func.func @_matmul_bias_act_kernel(%arg0: i32, %arg1: memref<512x288xbf16, #tpu.memory_space<vmem>>, %arg2: memref<288x64xbf16, #tpu.memory_space<vmem>>, %arg3: memref<1x64xf32, #tpu.memory_space<vmem>>, %arg4: memref<512x64xbf16, #tpu.memory_space<vmem>>) attributes {dimension_semantics = [#tpu.dimension_semantics<parallel>], iteration_bounds = array<i64: 2>, scalar_prefetch = 0 : i64, scratch_operands = 0 : i64, tpu.core_type = #tpu.core_type<tc>, window_params = [{transform_indices = @transform_0, window_bounds = array<i64: 512, 288>}, {pipeline_mode = #tpu.pipeline_mode<synchronous>, transform_indices = @transform_1, window_bounds = array<i64: 288, 64>}, {pipeline_mode = #tpu.pipeline_mode<synchronous>, transform_indices = @transform_2, window_bounds = array<i64: 1, 64>}, {transform_indices = @transform_3, window_bounds = array<i64: 512, 64>}]} {
    %c0 = arith.constant 0 : index
    %c0_0 = arith.constant 0 : index
    %0 = vector.load %arg1[%c0, %c0_0] : memref<512x288xbf16, #tpu.memory_space<vmem>>, vector<512x288xbf16>
    %c0_1 = arith.constant 0 : index
    %c0_2 = arith.constant 0 : index
    %1 = vector.load %arg2[%c0_1, %c0_2] : memref<288x64xbf16, #tpu.memory_space<vmem>>, vector<288x64xbf16>
    %cst = arith.constant dense<0.000000e+00> : vector<512x64xf32>
    %2 = tpu.matmul %0, %1, %cst {dimension_numbers = #tpu.dot_dimension_numbers<[1], [0], [0], [1], [0, 0, 1, 1], [], []>} : vector<512x288xbf16>, vector<288x64xbf16>, vector<512x64xf32> -> vector<512x64xf32>
    %c0_3 = arith.constant 0 : index
    %c0_4 = arith.constant 0 : index
    %3 = vector.load %arg3[%c0_3, %c0_4] : memref<1x64xf32, #tpu.memory_space<vmem>>, vector<1x64xf32>
    %4 = vector.broadcast %3 : vector<1x64xf32> to vector<512x64xf32>
    %5 = arith.addf %2, %4 : vector<512x64xf32>
    %cst_5 = arith.constant 0.000000e+00 : f32
    %6 = vector.broadcast %cst_5 : f32 to vector<512x64xf32>
    %7 = arith.maximumf %5, %6 : vector<512x64xf32>
    %8 = arith.truncf %7 : vector<512x64xf32> to vector<512x64xbf16>
    %c0_6 = arith.constant 0 : index
    %c0_7 = arith.constant 0 : index
    %9 = vector.load %arg4[%c0_6, %c0_7] : memref<512x64xbf16, #tpu.memory_space<vmem>>, vector<512x64xbf16>
    tpu.vector_store %arg4[%c0_6, %c0_7], %8 {strides = array<i32>} : memref<512x64xbf16, #tpu.memory_space<vmem>>, vector<512x64xbf16>,
    return
  }
  func.func @transform_0(%arg0: i32) -> (i32, i32) {
    %c0_i32 = arith.constant 0 : i32
    %c0_i32_0 = arith.constant 0 : i32
    return %arg0, %c0_i32 : i32, i32
  }
  func.func @transform_1(%arg0: i32) -> (i32, i32) {
    %c0_i32 = arith.constant 0 : i32
    %c0_i32_0 = arith.constant 0 : i32
    %c0_i32_1 = arith.constant 0 : i32
    return %c0_i32, %c0_i32_0 : i32, i32
  }
  func.func @transform_2(%arg0: i32) -> (i32, i32) {
    %c0_i32 = arith.constant 0 : i32
    %c0_i32_0 = arith.constant 0 : i32
    %c0_i32_1 = arith.constant 0 : i32
    return %c0_i32, %c0_i32_0 : i32, i32
  }
  func.func @transform_3(%arg0: i32) -> (i32, i32) {
    %c0_i32 = arith.constant 0 : i32
    %c0_i32_0 = arith.constant 0 : i32
    return %arg0, %c0_i32 : i32, i32
  }
}

module attributes {stable_mosaic.version = 11 : i64} {
  func.func @_matmul_bias_act_kernel(%arg0: i32, %arg1: memref<96x576xbf16, #tpu.memory_space<vmem>>, %arg2: memref<576x128xbf16, #tpu.memory_space<vmem>>, %arg3: memref<1x128xf32, #tpu.memory_space<vmem>>, %arg4: memref<96x128xbf16, #tpu.memory_space<vmem>>) attributes {dimension_semantics = [#tpu.dimension_semantics<parallel>], iteration_bounds = array<i64: 1>, scalar_prefetch = 0 : i64, scratch_operands = 0 : i64, tpu.core_type = #tpu.core_type<tc>, window_params = [{transform_indices = @transform_0, window_bounds = array<i64: 96, 576>}, {pipeline_mode = #tpu.pipeline_mode<synchronous>, transform_indices = @transform_1, window_bounds = array<i64: 576, 128>}, {pipeline_mode = #tpu.pipeline_mode<synchronous>, transform_indices = @transform_2, window_bounds = array<i64: 1, 128>}, {transform_indices = @transform_3, window_bounds = array<i64: 96, 128>}]} {
    %c0 = arith.constant 0 : index
    %c0_0 = arith.constant 0 : index
    %0 = vector.load %arg1[%c0, %c0_0] : memref<96x576xbf16, #tpu.memory_space<vmem>>, vector<96x576xbf16>
    %c0_1 = arith.constant 0 : index
    %c0_2 = arith.constant 0 : index
    %1 = vector.load %arg2[%c0_1, %c0_2] : memref<576x128xbf16, #tpu.memory_space<vmem>>, vector<576x128xbf16>
    %cst = arith.constant dense<0.000000e+00> : vector<96x128xf32>
    %2 = tpu.matmul %0, %1, %cst {dimension_numbers = #tpu.dot_dimension_numbers<[1], [0], [0], [1], [0, 0, 1, 1], [], []>} : vector<96x576xbf16>, vector<576x128xbf16>, vector<96x128xf32> -> vector<96x128xf32>
    %c0_3 = arith.constant 0 : index
    %c0_4 = arith.constant 0 : index
    %3 = vector.load %arg3[%c0_3, %c0_4] : memref<1x128xf32, #tpu.memory_space<vmem>>, vector<1x128xf32>
    %4 = vector.broadcast %3 : vector<1x128xf32> to vector<96x128xf32>
    %5 = arith.addf %2, %4 : vector<96x128xf32>
    %cst_5 = arith.constant 0.000000e+00 : f32
    %6 = vector.broadcast %cst_5 : f32 to vector<96x128xf32>
    %7 = arith.maximumf %5, %6 : vector<96x128xf32>
    %8 = arith.truncf %7 : vector<96x128xf32> to vector<96x128xbf16>
    %c0_6 = arith.constant 0 : index
    %c0_7 = arith.constant 0 : index
    %9 = vector.load %arg4[%c0_6, %c0_7] : memref<96x128xbf16, #tpu.memory_space<vmem>>, vector<96x128xbf16>
    tpu.vector_store %arg4[%c0_6, %c0_7], %8 {strides = array<i32>} : memref<96x128xbf16, #tpu.memory_space<vmem>>, vector<96x128xbf16>,
    return
  }
  func.func @transform_0(%arg0: i32) -> (i32, i32) {
    %c0_i32 = arith.constant 0 : i32
    %c0_i32_0 = arith.constant 0 : i32
    return %arg0, %c0_i32 : i32, i32
  }
  func.func @transform_1(%arg0: i32) -> (i32, i32) {
    %c0_i32 = arith.constant 0 : i32
    %c0_i32_0 = arith.constant 0 : i32
    %c0_i32_1 = arith.constant 0 : i32
    return %c0_i32, %c0_i32_0 : i32, i32
  }
  func.func @transform_2(%arg0: i32) -> (i32, i32) {
    %c0_i32 = arith.constant 0 : i32
    %c0_i32_0 = arith.constant 0 : i32
    %c0_i32_1 = arith.constant 0 : i32
    return %c0_i32, %c0_i32_0 : i32, i32
  }
  func.func @transform_3(%arg0: i32) -> (i32, i32) {
    %c0_i32 = arith.constant 0 : i32
    %c0_i32_0 = arith.constant 0 : i32
    return %arg0, %c0_i32 : i32, i32
  }
}

module attributes {stable_mosaic.version = 11 : i64} {
  func.func @_matmul_bias_act_kernel(%arg0: i32, %arg1: memref<6x1152xbf16, #tpu.memory_space<vmem>>, %arg2: memref<1152x256xbf16, #tpu.memory_space<vmem>>, %arg3: memref<1x256xf32, #tpu.memory_space<vmem>>, %arg4: memref<6x256xbf16, #tpu.memory_space<vmem>>) attributes {dimension_semantics = [#tpu.dimension_semantics<parallel>], iteration_bounds = array<i64: 1>, scalar_prefetch = 0 : i64, scratch_operands = 0 : i64, tpu.core_type = #tpu.core_type<tc>, window_params = [{transform_indices = @transform_0, window_bounds = array<i64: 6, 1152>}, {pipeline_mode = #tpu.pipeline_mode<synchronous>, transform_indices = @transform_1, window_bounds = array<i64: 1152, 256>}, {pipeline_mode = #tpu.pipeline_mode<synchronous>, transform_indices = @transform_2, window_bounds = array<i64: 1, 256>}, {transform_indices = @transform_3, window_bounds = array<i64: 6, 256>}]} {
    %c0 = arith.constant 0 : index
    %c0_0 = arith.constant 0 : index
    %0 = vector.load %arg1[%c0, %c0_0] : memref<6x1152xbf16, #tpu.memory_space<vmem>>, vector<6x1152xbf16>
    %c0_1 = arith.constant 0 : index
    %c0_2 = arith.constant 0 : index
    %1 = vector.load %arg2[%c0_1, %c0_2] : memref<1152x256xbf16, #tpu.memory_space<vmem>>, vector<1152x256xbf16>
    %cst = arith.constant dense<0.000000e+00> : vector<6x256xf32>
    %2 = tpu.matmul %0, %1, %cst {dimension_numbers = #tpu.dot_dimension_numbers<[1], [0], [0], [1], [0, 0, 1, 1], [], []>} : vector<6x1152xbf16>, vector<1152x256xbf16>, vector<6x256xf32> -> vector<6x256xf32>
    %c0_3 = arith.constant 0 : index
    %c0_4 = arith.constant 0 : index
    %3 = vector.load %arg3[%c0_3, %c0_4] : memref<1x256xf32, #tpu.memory_space<vmem>>, vector<1x256xf32>
    %4 = vector.broadcast %3 : vector<1x256xf32> to vector<6x256xf32>
    %5 = arith.addf %2, %4 : vector<6x256xf32>
    %cst_5 = arith.constant 0.000000e+00 : f32
    %6 = vector.broadcast %cst_5 : f32 to vector<6x256xf32>
    %7 = arith.maximumf %5, %6 : vector<6x256xf32>
    %8 = arith.truncf %7 : vector<6x256xf32> to vector<6x256xbf16>
    %c0_6 = arith.constant 0 : index
    %c0_7 = arith.constant 0 : index
    %9 = vector.load %arg4[%c0_6, %c0_7] : memref<6x256xbf16, #tpu.memory_space<vmem>>, vector<6x256xbf16>
    tpu.vector_store %arg4[%c0_6, %c0_7], %8 {strides = array<i32>} : memref<6x256xbf16, #tpu.memory_space<vmem>>, vector<6x256xbf16>,
    return
  }
  func.func @transform_0(%arg0: i32) -> (i32, i32) {
    %c0_i32 = arith.constant 0 : i32
    %c0_i32_0 = arith.constant 0 : i32
    return %arg0, %c0_i32 : i32, i32
  }
  func.func @transform_1(%arg0: i32) -> (i32, i32) {
    %c0_i32 = arith.constant 0 : i32
    %c0_i32_0 = arith.constant 0 : i32
    %c0_i32_1 = arith.constant 0 : i32
    return %c0_i32, %c0_i32_0 : i32, i32
  }
  func.func @transform_2(%arg0: i32) -> (i32, i32) {
    %c0_i32 = arith.constant 0 : i32
    %c0_i32_0 = arith.constant 0 : i32
    %c0_i32_1 = arith.constant 0 : i32
    return %c0_i32, %c0_i32_0 : i32, i32
  }
  func.func @transform_3(%arg0: i32) -> (i32, i32) {
    %c0_i32 = arith.constant 0 : i32
    %c0_i32_0 = arith.constant 0 : i32
    return %arg0, %c0_i32 : i32, i32
  }
}

module attributes {stable_mosaic.version = 11 : i64} {
  func.func @_fc_fused_kernel(%arg0: i32, %arg1: memref<6x256xbf16, #tpu.memory_space<vmem>>, %arg2: memref<256x32xbf16, #tpu.memory_space<vmem>>, %arg3: memref<1x32xf32, #tpu.memory_space<vmem>>, %arg4: memref<32x32xbf16, #tpu.memory_space<vmem>>, %arg5: memref<1x32xf32, #tpu.memory_space<vmem>>, %arg6: memref<32x16xbf16, #tpu.memory_space<vmem>>, %arg7: memref<1x16xf32, #tpu.memory_space<vmem>>, %arg8: memref<6x16xf32, #tpu.memory_space<vmem>>) attributes {dimension_semantics = [#tpu.dimension_semantics<parallel>], iteration_bounds = array<i64: 1>, scalar_prefetch = 0 : i64, scratch_operands = 0 : i64, tpu.core_type = #tpu.core_type<tc>, window_params = [{transform_indices = @transform_0, window_bounds = array<i64: 6, 256>}, {pipeline_mode = #tpu.pipeline_mode<synchronous>, transform_indices = @transform_1, window_bounds = array<i64: 256, 32>}, {pipeline_mode = #tpu.pipeline_mode<synchronous>, transform_indices = @transform_2, window_bounds = array<i64: 1, 32>}, {pipeline_mode = #tpu.pipeline_mode<synchronous>, transform_indices = @transform_3, window_bounds = array<i64: 32, 32>}, {pipeline_mode = #tpu.pipeline_mode<synchronous>, transform_indices = @transform_4, window_bounds = array<i64: 1, 32>}, {pipeline_mode = #tpu.pipeline_mode<synchronous>, transform_indices = @transform_5, window_bounds = array<i64: 32, 16>}, {pipeline_mode = #tpu.pipeline_mode<synchronous>, transform_indices = @transform_6, window_bounds = array<i64: 1, 16>}, {transform_indices = @transform_7, window_bounds = array<i64: 6, 16>}]} {
    %c0 = arith.constant 0 : index
    %c0_0 = arith.constant 0 : index
    %0 = vector.load %arg1[%c0, %c0_0] : memref<6x256xbf16, #tpu.memory_space<vmem>>, vector<6x256xbf16>
    %c0_1 = arith.constant 0 : index
    %c0_2 = arith.constant 0 : index
    %1 = vector.load %arg2[%c0_1, %c0_2] : memref<256x32xbf16, #tpu.memory_space<vmem>>, vector<256x32xbf16>
    %cst = arith.constant dense<0.000000e+00> : vector<6x32xf32>
    %2 = tpu.matmul %0, %1, %cst {dimension_numbers = #tpu.dot_dimension_numbers<[1], [0], [0], [1], [0, 0, 1, 1], [], []>} : vector<6x256xbf16>, vector<256x32xbf16>, vector<6x32xf32> -> vector<6x32xf32>
    %c0_3 = arith.constant 0 : index
    %c0_4 = arith.constant 0 : index
    %3 = vector.load %arg3[%c0_3, %c0_4] : memref<1x32xf32, #tpu.memory_space<vmem>>, vector<1x32xf32>
    %4 = vector.broadcast %3 : vector<1x32xf32> to vector<6x32xf32>
    %5 = arith.addf %2, %4 : vector<6x32xf32>
    %cst_5 = arith.constant 0.000000e+00 : f32
    %6 = vector.broadcast %cst_5 : f32 to vector<6x32xf32>
    %7 = arith.maximumf %5, %6 : vector<6x32xf32>
    %8 = arith.truncf %7 : vector<6x32xf32> to vector<6x32xbf16>
    %c0_6 = arith.constant 0 : index
    %c0_7 = arith.constant 0 : index
    %9 = vector.load %arg4[%c0_6, %c0_7] : memref<32x32xbf16, #tpu.memory_space<vmem>>, vector<32x32xbf16>
    %cst_8 = arith.constant dense<0.000000e+00> : vector<6x32xf32>
    %10 = tpu.matmul %8, %9, %cst_8 {dimension_numbers = #tpu.dot_dimension_numbers<[1], [0], [0], [1], [0, 0, 1, 1], [], []>} : vector<6x32xbf16>, vector<32x32xbf16>, vector<6x32xf32> -> vector<6x32xf32>
    %c0_9 = arith.constant 0 : index
    %c0_10 = arith.constant 0 : index
    %11 = vector.load %arg5[%c0_9, %c0_10] : memref<1x32xf32, #tpu.memory_space<vmem>>, vector<1x32xf32>
    %12 = vector.broadcast %11 : vector<1x32xf32> to vector<6x32xf32>
    %13 = arith.addf %10, %12 : vector<6x32xf32>
    %cst_11 = arith.constant 0.000000e+00 : f32
    %14 = vector.broadcast %cst_11 : f32 to vector<6x32xf32>
    %15 = arith.maximumf %13, %14 : vector<6x32xf32>
    %16 = arith.truncf %15 : vector<6x32xf32> to vector<6x32xbf16>
    %c0_12 = arith.constant 0 : index
    %c0_13 = arith.constant 0 : index
    %17 = vector.load %arg6[%c0_12, %c0_13] : memref<32x16xbf16, #tpu.memory_space<vmem>>, vector<32x16xbf16>
    %cst_14 = arith.constant dense<0.000000e+00> : vector<6x16xf32>
    %18 = tpu.matmul %16, %17, %cst_14 {dimension_numbers = #tpu.dot_dimension_numbers<[1], [0], [0], [1], [0, 0, 1, 1], [], []>} : vector<6x32xbf16>, vector<32x16xbf16>, vector<6x16xf32> -> vector<6x16xf32>
    %c0_15 = arith.constant 0 : index
    %c0_16 = arith.constant 0 : index
    %19 = vector.load %arg7[%c0_15, %c0_16] : memref<1x16xf32, #tpu.memory_space<vmem>>, vector<1x16xf32>
    %20 = vector.broadcast %19 : vector<1x16xf32> to vector<6x16xf32>
    %21 = arith.addf %18, %20 : vector<6x16xf32>
    %c0_17 = arith.constant 0 : index
    %c0_18 = arith.constant 0 : index
    %22 = vector.load %arg8[%c0_17, %c0_18] : memref<6x16xf32, #tpu.memory_space<vmem>>, vector<6x16xf32>
    tpu.vector_store %arg8[%c0_17, %c0_18], %21 {strides = array<i32>} : memref<6x16xf32, #tpu.memory_space<vmem>>, vector<6x16xf32>,
    return
  }
  func.func @transform_0(%arg0: i32) -> (i32, i32) {
    %c0_i32 = arith.constant 0 : i32
    %c0_i32_0 = arith.constant 0 : i32
    return %arg0, %c0_i32 : i32, i32
  }
  func.func @transform_1(%arg0: i32) -> (i32, i32) {
    %c0_i32 = arith.constant 0 : i32
    %c0_i32_0 = arith.constant 0 : i32
    %c0_i32_1 = arith.constant 0 : i32
    return %c0_i32, %c0_i32_0 : i32, i32
  }
  func.func @transform_2(%arg0: i32) -> (i32, i32) {
    %c0_i32 = arith.constant 0 : i32
    %c0_i32_0 = arith.constant 0 : i32
    %c0_i32_1 = arith.constant 0 : i32
    return %c0_i32, %c0_i32_0 : i32, i32
  }
  func.func @transform_3(%arg0: i32) -> (i32, i32) {
    %c0_i32 = arith.constant 0 : i32
    %c0_i32_0 = arith.constant 0 : i32
    %c0_i32_1 = arith.constant 0 : i32
    return %c0_i32, %c0_i32_0 : i32, i32
  }
  func.func @transform_4(%arg0: i32) -> (i32, i32) {
    %c0_i32 = arith.constant 0 : i32
    %c0_i32_0 = arith.constant 0 : i32
    %c0_i32_1 = arith.constant 0 : i32
    return %c0_i32, %c0_i32_0 : i32, i32
  }
  func.func @transform_5(%arg0: i32) -> (i32, i32) {
    %c0_i32 = arith.constant 0 : i32
    %c0_i32_0 = arith.constant 0 : i32
    %c0_i32_1 = arith.constant 0 : i32
    return %c0_i32, %c0_i32_0 : i32, i32
  }
  func.func @transform_6(%arg0: i32) -> (i32, i32) {
    %c0_i32 = arith.constant 0 : i32
    %c0_i32_0 = arith.constant 0 : i32
    %c0_i32_1 = arith.constant 0 : i32
    return %c0_i32, %c0_i32_0 : i32, i32
  }
  func.func @transform_7(%arg0: i32) -> (i32, i32) {
    %c0_i32 = arith.constant 0 : i32
    %c0_i32_0 = arith.constant 0 : i32
    return %arg0, %c0_i32 : i32, i32
  }
}

</mosaic_0001>

<bundles_post_ra>
// kernel: encoder_cnn_forward.5
= control target key start
LH: loop header
LB: loop body
LE: loop exit
PB: predicated region body
PF: predicated region fallthrough
CT: control target
= control target key end

     0   :  { %s2288_s12 = smov 0   ;;  %s2290_s13 = smov 0   ;;  %s2805_s0 = inlined_call_operand.vmem [shape: bf16[2646,75], index: 0, kind: input, shape index: {}]   ;;  %s2806_s1 = inlined_call_operand.vmem [shape: bf16[75,32], index: 1, kind: input, shape index: {}]   ;;  %s2807_s2 = inlined_call_operand.vmem [shape: f32[1,32], index: 2, kind: input, shape index: {}]   ;;  %s2808_s3 = inlined_call_operand.vmem [shape: bf16[2646,32], index: 3, kind: output, shape index: {}]  }
   0x1   :  { %s2292_s14 = smov 0  }
   0x2 LB: > { %s2301_s15 = sadd.s32 4294967295, %s2233_s14   ;;  %s2303_s16 = sadd.s32 1, %s2233_s14   ;;  %s2233_s14 = sphi %s2292_s14, %s2815_s14   ;;  %s2229_s13 = sphi %s2290_s13, %s2814_s13   ;;  %s2225_s12 = sphi %s2288_s12, %s2813_s12  }
   0x3   : > { %s85_s17 = ssub.s32 %s2233_s14, %s2303_s16  ;;  %s88_s18 = sadd.s32 1, %s2229_s13 }
   0x4   : > { %p86_p0 = scmp.eq.s32.totalorder %s85_s17, 0  ;;  %p98_p1 = scmp.ne.s32.totalorder %s2229_s13, %s2225_s12 }
   0x5   : > { %p99_p2 = scmp.eq.s32.totalorder %s2301_s15, 5  ;;  %p1710_p3 = scmp.ge.s32.totalorder %s2233_s14, 1 }
   0x6   : > { %s2311_s19 = scalar_select %p86_p0, %s2229_s13, %s88_s18  }
   0x7   : > { %p2313_p4 = por %p99_p2, %p98_p1  ;;  %p146_p5 = scmp.lt.s32.totalorder %s2233_s14, 7 }
   0x9   : > { %p147_p6 = pnand %p1710_p3, %p146_p5 }
   0xa   : > { %v2142_v0 = vld [vmem:[%s2806_s1] sm:$0xff] (!%p147_p6)   ;;  %v2143_v1 = vld [vmem:[%s2806_s1 + $0x8] sm:$0xff] (!%p147_p6)   ;;  %vm560_vm0 = vcmask (!%p147_p6), 1044480   ;;  %v2144_v2 = vld [vmem:[%s2806_s1 + $0x10] sm:$0xff] (!%p147_p6)   ;;  %s2327_s27 = sshll.u32 (!%p147_p6), %s2301_s15, 6  ;;  %vm561_vm1 = vcmask (!%p147_p6), 1045504  }
   0xb   : > { %150 = sbr.rel (%p147_p6) target bundleno = 400 (0x190), region = 32  ;;  %1969 = vmatprep.subr.bf16.mxu0 (!%p147_p6), %v2142_v0  ;;  %2043 = vmatprep.subr.bf16.mxu1 (!%p147_p6), %v2142_v0  ;;  %v2267_v3 = vmov (!%p147_p6), 65535   ;;  %p178_p7 = scmp.lt.s32.totalorder (!%p147_p6), %s2327_s27, 330  ;;  %v2145_v5 = vld [vmem:[%s2806_s1 + $0x18] sm:$0xff] (!%p147_p6)   ;;  %v2146_v6 = vld [vmem:[%s2806_s1 + $0x20] sm:$0x3f] (!%p147_p6)  }
   0xc   : > { %1970 = vmatpush3.bf16.msra.mxu0 (!%p147_p6), %v2142_v0  ;;  %2048 = vmatpush3.bf16.msra.mxu1 (!%p147_p6), %v2142_v0  ;;  %v562_v4 = vsel (!%p147_p6), %vm560_vm0, 4294967295, %v2267_v3  ;;  %vm463_vm2 = vcmask (!%p147_p6), 613376   ;;  %s170_s10 = sand.u32 (!%p147_p6), 1, %s2225_s12   ;;  %v2410_v41 = vld [vmem:[%s2807_s2] ss:$0 sm:$0xff] (!%p147_p6)  ;;  %vm1176_vm3 = vcmask (!%p147_p6), 257024  }
   0xd   : > { %1971 = vmatprep.subr.bf16.mxu0 (!%p147_p6), %v2143_v1  ;;  %2044 = vmatprep.subr.bf16.mxu1 (!%p147_p6), %v2143_v1  ;;  %v563_v7 = vsel (!%p147_p6), %vm561_vm1, %v562_v4, 0  ;;  %s1711_s17 = sshll.u32 (!%p147_p6), %s170_s10, 8 }
   0xe   : > { %v565_v8 = vand.u32 (!%p147_p6), %v2146_v6, %v563_v7  ;;  %s2420_s12 = scalar_lea.vmem (!%p147_p6), [#allocation2], %s1711_s17  }
  0x10   : > { %1972 = vmatpush3.bf16.msra.mxu0 (!%p147_p6), %v2143_v1  ;;  %2049 = vmatpush3.bf16.msra.mxu1 (!%p147_p6), %v2143_v1 }
  0x11   : > { %1973 = vmatprep.subr.bf16.mxu0 (!%p147_p6), %v2144_v2  ;;  %2045 = vmatprep.subr.bf16.mxu1 (!%p147_p6), %v2144_v2 }
  0x12   : > { %s179_s5 = scalar_select %p178_p7, %s2327_s27, 330 }
  0x13   : > { %s1249_s18 = ssub.s32 (%p2313_p4), 331, %s2327_s27  ;;  %s1929_s21 = sshll.u32 (%p2313_p4), %s2301_s15, 8 }
  0x14   : > { %s1713_s6 = sshll.u32 %s179_s5, 2  ;;  %1974 = vmatpush3.bf16.msra.mxu0 %v2144_v2  ;;  %2050 = vmatpush3.bf16.msra.mxu1 %v2144_v2  ;;  %p1250_p8 = scmp.lt.s32.totalorder (%p2313_p4), %s1249_s18, 64 }
  0x15   : > { %s2340_s9 = scalar_lea.vmem %s2805_s0, %s1713_s6  ;;  %1975 = vmatprep.subr.bf16.mxu0 %v2145_v5  ;;  %2046 = vmatprep.subr.bf16.mxu1 %v2145_v5  ;;  %s2613_s24 = scalar_lea.vmem (%p2313_p4), %s2808_s3, %s1929_s21  }
  0x16   : > { %v2147_v9 = vld [vmem:[%s2340_s9] sm:$0xff]   ;;  %v2149_v11 = vld [vmem:[%s2340_s9 + $0x8] sm:$0xff]   ;;  %v2151_v13 = vld [vmem:[%s2340_s9 + $0x10] sm:$0xff]  }
  0x17   : > { %v2148_v10 = vld [vmem:[%s2340_s9 + $0x80] sm:$0xff]   ;;  %1979 = vmatprep.mubr.msk.bf16.mxu0 %vm463_vm2, %v2147_v9  ;;  %v2150_v12 = vld [vmem:[%s2340_s9 + $0x88] sm:$0xff]   ;;  %v2152_v14 = vld [vmem:[%s2340_s9 + $0x90] sm:$0xff]  }
  0x18   : > { %1976 = vmatpush3.bf16.msra.mxu0 %v2145_v5  ;;  %2051 = vmatpush3.bf16.msra.mxu1 %v2145_v5  ;;  %v2153_v15 = vld [vmem:[%s2340_s9 + $0x18] sm:$0xff]   ;;  %v2155_v17 = vld [vmem:[%s2340_s9 + $0x20] sm:$0xff]   ;;  %v2157_v19 = vld [vmem:[%s2340_s9 + $0x28] sm:$0xff]  }
  0x19   : > { %1977 = vmatprep.subr.bf16.mxu0 %v565_v8  ;;  %2047 = vmatprep.subr.bf16.mxu1 %v565_v8  ;;  %v2154_v16 = vld [vmem:[%s2340_s9 + $0x98] sm:$0xff]   ;;  %v2156_v18 = vld [vmem:[%s2340_s9 + $0xa0] sm:$0xff]   ;;  %v2158_v20 = vld [vmem:[%s2340_s9 + $0xa8] sm:$0xff]  }
  0x1a   : > { %2011 = vmatprep.mubr.msk.bf16.mxu1 %vm463_vm2, %v2148_v10  ;;  %v2159_v21 = vld [vmem:[%s2340_s9 + $0x30] sm:$0xff]   ;;  %v2161_v23 = vld [vmem:[%s2340_s9 + $0x38] sm:$0xff]   ;;  %v2163_v25 = vld [vmem:[%s2340_s9 + $0x40] sm:$0xff]  }
  0x1b   : > { %v2160_v22 = vld [vmem:[%s2340_s9 + $0xb0] sm:$0xff]   ;;  %v2162_v24 = vld [vmem:[%s2340_s9 + $0xb8] sm:$0xff]   ;;  %v2164_v26 = vld [vmem:[%s2340_s9 + $0xc0] sm:$0xff]  }
  0x1c   : > { %1978 = vmatpush3.bf16.msra.mxu0 %v565_v8  ;;  %2052 = vmatpush3.bf16.msra.mxu1 %v565_v8  ;;  %v2165_v27 = vld [vmem:[%s2340_s9 + $0x48] sm:$0xff]   ;;  %v2167_v29 = vld [vmem:[%s2340_s9 + $0x50] sm:$0xff]   ;;  %v2169_v31 = vld [vmem:[%s2340_s9 + $0x58] sm:$0xff]  }
  0x1d   : > { %v2166_v28 = vld [vmem:[%s2340_s9 + $0xc8] sm:$0xff]   ;;  %v2168_v30 = vld [vmem:[%s2340_s9 + $0xd0] sm:$0xff]   ;;  %v2170_v32 = vld [vmem:[%s2340_s9 + $0xd8] sm:$0xff]  }
  0x1e   : > { %v2171_v33 = vld [vmem:[%s2340_s9 + $0x60] sm:$0xff]   ;;  %v2173_v35 = vld [vmem:[%s2340_s9 + $0x68] sm:$0xff]   ;;  %v2175_v37 = vld [vmem:[%s2340_s9 + $0x70] sm:$0xff]  }
  0x1f   : > { %1980 = vmatmul.mubr.msk.bf16.vlgmr.msra.gmra.mrb[0].mxu0 %vm463_vm2, %v2149_v11  ;;  %2012 = vmatmul.mubr.msk.bf16.vlgmr.msra.gmra.mrb[0].mxu1 %vm463_vm2, %v2150_v12  ;;  %v2172_v34 = vld [vmem:[%s2340_s9 + $0xe0] sm:$0xff]   ;;  %v2174_v36 = vld [vmem:[%s2340_s9 + $0xe8] sm:$0xff]   ;;  %v2176_v38 = vld [vmem:[%s2340_s9 + $0xf0] sm:$0xff]  }
  0x20   : > { %1983 = vmatprep.mubr.msk.bf16.mxu0 %vm463_vm2, %v2151_v13  ;;  %2015 = vmatprep.mubr.msk.bf16.mxu1 %vm463_vm2, %v2152_v14  ;;  %v2177_v39 = vld [vmem:[%s2340_s9 + $0x78] sm:$0xff]  }
  0x21   : > { %v2178_v40 = vld [vmem:[%s2340_s9 + $0xf8] sm:$0xff]  }
  0x27   : > { %1984 = vmatmul.mubr.msk.bf16.gmra.mrb[4].mxu0 %vm463_vm2, %v2153_v15  ;;  %2016 = vmatmul.mubr.msk.bf16.gmra.mrb[4].mxu1 %vm463_vm2, %v2154_v16 }
  0x28   : > { %1987 = vmatprep.mubr.msk.bf16.mxu0 %vm463_vm2, %v2155_v17  ;;  %2019 = vmatprep.mubr.msk.bf16.mxu1 %vm463_vm2, %v2156_v18 }
  0x2f   : > { %1988 = vmatmul.mubr.msk.bf16.gmra.mrb[8].mxu0 %vm463_vm2, %v2157_v19  ;;  %2020 = vmatmul.mubr.msk.bf16.gmra.mrb[8].mxu1 %vm463_vm2, %v2158_v20 }
  0x30   : > { %1991 = vmatprep.mubr.msk.bf16.mxu0 %vm463_vm2, %v2159_v21  ;;  %2023 = vmatprep.mubr.msk.bf16.mxu1 %vm463_vm2, %v2160_v22 }
  0x37   : > { %1992 = vmatmul.mubr.msk.bf16.gmra.mrb[12].mxu0 %vm463_vm2, %v2161_v23  ;;  %2024 = vmatmul.mubr.msk.bf16.gmra.mrb[12].mxu1 %vm463_vm2, %v2162_v24 }
  0x38   : > { %1995 = vmatprep.mubr.msk.bf16.mxu0 %vm463_vm2, %v2163_v25  ;;  %2027 = vmatprep.mubr.msk.bf16.mxu1 %vm463_vm2, %v2164_v26 }
  0x3f   : > { %1996 = vmatmul.mubr.msk.bf16.gmra.mrb[16].mxu0 %vm463_vm2, %v2165_v27  ;;  %2028 = vmatmul.mubr.msk.bf16.gmra.mrb[16].mxu1 %vm463_vm2, %v2166_v28 }
  0x40   : > { %1999 = vmatprep.mubr.msk.bf16.mxu0 %vm463_vm2, %v2167_v29  ;;  %2031 = vmatprep.mubr.msk.bf16.mxu1 %vm463_vm2, %v2168_v30 }
  0x47   : > { %2000 = vmatmul.mubr.msk.bf16.gmra.mrb[20].mxu0 %vm463_vm2, %v2169_v31  ;;  %2032 = vmatmul.mubr.msk.bf16.gmra.mrb[20].mxu1 %vm463_vm2, %v2170_v32 }
  0x48   : > { %2003 = vmatprep.mubr.msk.bf16.mxu0 %vm463_vm2, %v2171_v33  ;;  %2035 = vmatprep.mubr.msk.bf16.mxu1 %vm463_vm2, %v2172_v34 }
  0x4f   : > { %2004 = vmatmul.mubr.msk.bf16.gmra.mrb[24].mxu0 %vm463_vm2, %v2173_v35  ;;  %2036 = vmatmul.mubr.msk.bf16.gmra.mrb[24].mxu1 %vm463_vm2, %v2174_v36 }
  0x50   : > { %2007 = vmatprep.mubr.msk.bf16.mxu0 %vm463_vm2, %v2175_v37  ;;  %2039 = vmatprep.mubr.msk.bf16.mxu1 %vm463_vm2, %v2176_v38 }
  0x57   : > { %2008 = vmatmul.mubr.msk.bf16.gmra.mrb[28].mxu0 %vm463_vm2, %v2177_v39  ;;  %2040 = vmatmul.mubr.msk.bf16.gmra.mrb[28].mxu1 %vm463_vm2, %v2178_v40 }
  0xf2   : > { %v1981_v42 = vpop.f32.mrb[0].mxu0  ;;  %v2013_v43 = vpop.f32.mrb[0].mxu1 }
  0xf3   : > { %v610_v44 = vadd.f32 %v1981_v42, %v2410_v41  ;;  %v738_v45 = vadd.f32 %v2013_v43, %v2410_v41  ;;  %v601_v46 = vpop.f32.mrb[1].mxu0  ;;  %v729_v47 = vpop.f32.mrb[1].mxu1 }
  0xf4   : > { %v602_v48 = vadd.f32 %v2410_v41, %v601_v46  ;;  %v730_v49 = vadd.f32 %v2410_v41, %v729_v47  ;;  %v1982_v50 = vpop.f32.mrb[2].mxu0  ;;  %v2014_v51 = vpop.f32.mrb[2].mxu1 }
  0xf5   : > { %v858_v52 = vmax.f32 %v610_v44, 0.0  ;;  %v890_v53 = vmax.f32 %v738_v45, 0.0  ;;  %v613_v54 = vadd.f32 %v1982_v50, %v2410_v41  ;;  %v741_v55 = vadd.f32 %v2014_v51, %v2410_v41  ;;  %v604_v56 = vpop.f32.mrb[3].mxu0  ;;  %v732_v57 = vpop.f32.mrb[3].mxu1 }
  0xf6   : > { %v856_v58 = vmax.f32 %v602_v48, 0.0  ;;  %v888_v59 = vmax.f32 %v730_v49, 0.0  ;;  %v605_v60 = vadd.f32 %v2410_v41, %v604_v56  ;;  %v733_v61 = vadd.f32 %v2410_v41, %v732_v57 }
  0xf7   : > { %v1867_v62 = vpack.c.bf16 %v858_v52, %v858_v52  ;;  %v1899_v63 = vpack.c.bf16 %v890_v53, %v890_v53  ;;  %v859_v0 = vmax.f32 %v613_v54, 0.0  ;;  %v891_v1 = vmax.f32 %v741_v55, 0.0 }
  0xf8   : > { %v1865_v2 = vpack.c.bf16 %v856_v58, %v856_v58  ;;  %v1897_v3 = vpack.c.bf16 %v888_v59, %v888_v59  ;;  %v857_v4 = vmax.f32 %v605_v60, 0.0  ;;  %v889_v5 = vmax.f32 %v733_v61, 0.0 }
  0xf9   : > { %1179 = vst.msk [vmem:[%s2420_s12 + $0x8] sm:$0xf] %vm1176_vm3, %v1867_v62  ;;  %1211 = vst.msk [vmem:[%s2420_s12 + $0x88] sm:$0xf] %vm1176_vm3, %v1899_v63  ;;  %v1868_v6 = vpack.c.bf16 %v859_v0, %v859_v0  ;;  %v1900_v7 = vpack.c.bf16 %v891_v1, %v891_v1 }
  0xfa   : > { %1177 = vst.msk [vmem:[%s2420_s12] sm:$0xf] %vm1176_vm3, %v1865_v2  ;;  %1209 = vst.msk [vmem:[%s2420_s12 + $0x80] sm:$0xf] %vm1176_vm3, %v1897_v3  ;;  %v1866_v8 = vpack.c.bf16 %v857_v4, %v857_v4  ;;  %v1898_v9 = vpack.c.bf16 %v889_v5, %v889_v5  ;;  %v1985_v10 = vpop.f32.mrb[4].mxu0  ;;  %v2017_v11 = vpop.f32.mrb[4].mxu1 }
  0xfb   : > { %1180 = vst.msk [vmem:[%s2420_s12 + $0xc] sm:$0xf] %vm1176_vm3, %v1868_v6  ;;  %1212 = vst.msk [vmem:[%s2420_s12 + $0x8c] sm:$0xf] %vm1176_vm3, %v1900_v7  ;;  %v626_v12 = vadd.f32 %v1985_v10, %v2410_v41  ;;  %v754_v13 = vadd.f32 %v2017_v11, %v2410_v41  ;;  %v617_v14 = vpop.f32.mrb[5].mxu0  ;;  %v745_v15 = vpop.f32.mrb[5].mxu1 }
  0xfc   : > { %1178 = vst.msk [vmem:[%s2420_s12 + $0x4] sm:$0xf] %vm1176_vm3, %v1866_v8  ;;  %1210 = vst.msk [vmem:[%s2420_s12 + $0x84] sm:$0xf] %vm1176_vm3, %v1898_v9  ;;  %v618_v16 = vadd.f32 %v2410_v41, %v617_v14  ;;  %v746_v17 = vadd.f32 %v2410_v41, %v745_v15  ;;  %v1986_v18 = vpop.f32.mrb[6].mxu0  ;;  %v2018_v19 = vpop.f32.mrb[6].mxu1 }
  0xfd   : > { %v862_v20 = vmax.f32 %v626_v12, 0.0  ;;  %v894_v21 = vmax.f32 %v754_v13, 0.0  ;;  %v629_v22 = vadd.f32 %v1986_v18, %v2410_v41  ;;  %v757_v23 = vadd.f32 %v2018_v19, %v2410_v41  ;;  %v620_v24 = vpop.f32.mrb[7].mxu0  ;;  %v748_v25 = vpop.f32.mrb[7].mxu1 }
  0xfe   : > { %v860_v26 = vmax.f32 %v618_v16, 0.0  ;;  %v892_v27 = vmax.f32 %v746_v17, 0.0  ;;  %v621_v28 = vadd.f32 %v2410_v41, %v620_v24  ;;  %v749_v29 = vadd.f32 %v2410_v41, %v748_v25 }
  0xff   : > { %v1871_v30 = vpack.c.bf16 %v862_v20, %v862_v20  ;;  %v1903_v31 = vpack.c.bf16 %v894_v21, %v894_v21  ;;  %v863_v32 = vmax.f32 %v629_v22, 0.0  ;;  %v895_v33 = vmax.f32 %v757_v23, 0.0 }
 0x100   : > { %v1869_v34 = vpack.c.bf16 %v860_v26, %v860_v26  ;;  %v1901_v35 = vpack.c.bf16 %v892_v27, %v892_v27  ;;  %v861_v36 = vmax.f32 %v621_v28, 0.0  ;;  %v893_v37 = vmax.f32 %v749_v29, 0.0 }
 0x101   : > { %1183 = vst.msk [vmem:[%s2420_s12 + $0x18] sm:$0xf] %vm1176_vm3, %v1871_v30  ;;  %1215 = vst.msk [vmem:[%s2420_s12 + $0x98] sm:$0xf] %vm1176_vm3, %v1903_v31  ;;  %v1872_v38 = vpack.c.bf16 %v863_v32, %v863_v32  ;;  %v1904_v39 = vpack.c.bf16 %v895_v33, %v895_v33 }
 0x102   : > { %1181 = vst.msk [vmem:[%s2420_s12 + $0x10] sm:$0xf] %vm1176_vm3, %v1869_v34  ;;  %1213 = vst.msk [vmem:[%s2420_s12 + $0x90] sm:$0xf] %vm1176_vm3, %v1901_v35  ;;  %v1870_v40 = vpack.c.bf16 %v861_v36, %v861_v36  ;;  %v1902_v42 = vpack.c.bf16 %v893_v37, %v893_v37  ;;  %v1989_v43 = vpop.f32.mrb[8].mxu0  ;;  %v2021_v44 = vpop.f32.mrb[8].mxu1 }
 0x103   : > { %1184 = vst.msk [vmem:[%s2420_s12 + $0x1c] sm:$0xf] %vm1176_vm3, %v1872_v38  ;;  %1216 = vst.msk [vmem:[%s2420_s12 + $0x9c] sm:$0xf] %vm1176_vm3, %v1904_v39  ;;  %v642_v45 = vadd.f32 %v1989_v43, %v2410_v41  ;;  %v770_v46 = vadd.f32 %v2021_v44, %v2410_v41  ;;  %v633_v47 = vpop.f32.mrb[9].mxu0  ;;  %v761_v48 = vpop.f32.mrb[9].mxu1 }
 0x104   : > { %1182 = vst.msk [vmem:[%s2420_s12 + $0x14] sm:$0xf] %vm1176_vm3, %v1870_v40  ;;  %1214 = vst.msk [vmem:[%s2420_s12 + $0x94] sm:$0xf] %vm1176_vm3, %v1902_v42  ;;  %v634_v49 = vadd.f32 %v2410_v41, %v633_v47  ;;  %v762_v50 = vadd.f32 %v2410_v41, %v761_v48  ;;  %v1990_v51 = vpop.f32.mrb[10].mxu0  ;;  %v2022_v52 = vpop.f32.mrb[10].mxu1 }
 0x105   : > { %v866_v53 = vmax.f32 %v642_v45, 0.0  ;;  %v898_v54 = vmax.f32 %v770_v46, 0.0  ;;  %v645_v55 = vadd.f32 %v1990_v51, %v2410_v41  ;;  %v773_v56 = vadd.f32 %v2022_v52, %v2410_v41  ;;  %v636_v57 = vpop.f32.mrb[11].mxu0  ;;  %v764_v58 = vpop.f32.mrb[11].mxu1 }
 0x106   : > { %v864_v59 = vmax.f32 %v634_v49, 0.0  ;;  %v896_v60 = vmax.f32 %v762_v50, 0.0  ;;  %v637_v61 = vadd.f32 %v2410_v41, %v636_v57  ;;  %v765_v62 = vadd.f32 %v2410_v41, %v764_v58 }
 0x107   : > { %v1875_v63 = vpack.c.bf16 %v866_v53, %v866_v53  ;;  %v1907_v0 = vpack.c.bf16 %v898_v54, %v898_v54  ;;  %v867_v1 = vmax.f32 %v645_v55, 0.0  ;;  %v899_v2 = vmax.f32 %v773_v56, 0.0 }
 0x108   : > { %v1873_v3 = vpack.c.bf16 %v864_v59, %v864_v59  ;;  %v1905_v4 = vpack.c.bf16 %v896_v60, %v896_v60  ;;  %v865_v5 = vmax.f32 %v637_v61, 0.0  ;;  %v897_v6 = vmax.f32 %v765_v62, 0.0 }
 0x109   : > { %1187 = vst.msk [vmem:[%s2420_s12 + $0x28] sm:$0xf] %vm1176_vm3, %v1875_v63  ;;  %1219 = vst.msk [vmem:[%s2420_s12 + $0xa8] sm:$0xf] %vm1176_vm3, %v1907_v0  ;;  %v1876_v7 = vpack.c.bf16 %v867_v1, %v867_v1  ;;  %v1908_v8 = vpack.c.bf16 %v899_v2, %v899_v2 }
 0x10a   : > { %1185 = vst.msk [vmem:[%s2420_s12 + $0x20] sm:$0xf] %vm1176_vm3, %v1873_v3  ;;  %1217 = vst.msk [vmem:[%s2420_s12 + $0xa0] sm:$0xf] %vm1176_vm3, %v1905_v4  ;;  %v1874_v9 = vpack.c.bf16 %v865_v5, %v865_v5  ;;  %v1906_v10 = vpack.c.bf16 %v897_v6, %v897_v6  ;;  %v1993_v11 = vpop.f32.mrb[12].mxu0  ;;  %v2025_v12 = vpop.f32.mrb[12].mxu1 }
 0x10b   : > { %1188 = vst.msk [vmem:[%s2420_s12 + $0x2c] sm:$0xf] %vm1176_vm3, %v1876_v7  ;;  %1220 = vst.msk [vmem:[%s2420_s12 + $0xac] sm:$0xf] %vm1176_vm3, %v1908_v8  ;;  %v658_v13 = vadd.f32 %v1993_v11, %v2410_v41  ;;  %v786_v14 = vadd.f32 %v2025_v12, %v2410_v41  ;;  %v649_v15 = vpop.f32.mrb[13].mxu0  ;;  %v777_v16 = vpop.f32.mrb[13].mxu1 }
 0x10c   : > { %1186 = vst.msk [vmem:[%s2420_s12 + $0x24] sm:$0xf] %vm1176_vm3, %v1874_v9  ;;  %1218 = vst.msk [vmem:[%s2420_s12 + $0xa4] sm:$0xf] %vm1176_vm3, %v1906_v10  ;;  %v650_v17 = vadd.f32 %v2410_v41, %v649_v15  ;;  %v778_v18 = vadd.f32 %v2410_v41, %v777_v16  ;;  %v1994_v19 = vpop.f32.mrb[14].mxu0  ;;  %v2026_v20 = vpop.f32.mrb[14].mxu1 }
 0x10d   : > { %v870_v21 = vmax.f32 %v658_v13, 0.0  ;;  %v902_v22 = vmax.f32 %v786_v14, 0.0  ;;  %v661_v23 = vadd.f32 %v1994_v19, %v2410_v41  ;;  %v789_v24 = vadd.f32 %v2026_v20, %v2410_v41  ;;  %v652_v25 = vpop.f32.mrb[15].mxu0  ;;  %v780_v26 = vpop.f32.mrb[15].mxu1 }
 0x10e   : > { %v868_v27 = vmax.f32 %v650_v17, 0.0  ;;  %v900_v28 = vmax.f32 %v778_v18, 0.0  ;;  %v653_v29 = vadd.f32 %v2410_v41, %v652_v25  ;;  %v781_v30 = vadd.f32 %v2410_v41, %v780_v26 }
 0x10f   : > { %v1879_v31 = vpack.c.bf16 %v870_v21, %v870_v21  ;;  %v1911_v32 = vpack.c.bf16 %v902_v22, %v902_v22  ;;  %v871_v33 = vmax.f32 %v661_v23, 0.0  ;;  %v903_v34 = vmax.f32 %v789_v24, 0.0 }
 0x110   : > { %v1877_v35 = vpack.c.bf16 %v868_v27, %v868_v27  ;;  %v1909_v36 = vpack.c.bf16 %v900_v28, %v900_v28  ;;  %v869_v37 = vmax.f32 %v653_v29, 0.0  ;;  %v901_v38 = vmax.f32 %v781_v30, 0.0 }
 0x111   : > { %1191 = vst.msk [vmem:[%s2420_s12 + $0x38] sm:$0xf] %vm1176_vm3, %v1879_v31  ;;  %1223 = vst.msk [vmem:[%s2420_s12 + $0xb8] sm:$0xf] %vm1176_vm3, %v1911_v32  ;;  %v1880_v39 = vpack.c.bf16 %v871_v33, %v871_v33  ;;  %v1912_v40 = vpack.c.bf16 %v903_v34, %v903_v34 }
 0x112   : > { %1189 = vst.msk [vmem:[%s2420_s12 + $0x30] sm:$0xf] %vm1176_vm3, %v1877_v35  ;;  %1221 = vst.msk [vmem:[%s2420_s12 + $0xb0] sm:$0xf] %vm1176_vm3, %v1909_v36  ;;  %v1878_v42 = vpack.c.bf16 %v869_v37, %v869_v37  ;;  %v1910_v43 = vpack.c.bf16 %v901_v38, %v901_v38  ;;  %v1997_v44 = vpop.f32.mrb[16].mxu0  ;;  %v2029_v45 = vpop.f32.mrb[16].mxu1 }
 0x113   : > { %1192 = vst.msk [vmem:[%s2420_s12 + $0x3c] sm:$0xf] %vm1176_vm3, %v1880_v39  ;;  %1224 = vst.msk [vmem:[%s2420_s12 + $0xbc] sm:$0xf] %vm1176_vm3, %v1912_v40  ;;  %v674_v46 = vadd.f32 %v1997_v44, %v2410_v41  ;;  %v802_v47 = vadd.f32 %v2029_v45, %v2410_v41  ;;  %v665_v48 = vpop.f32.mrb[17].mxu0  ;;  %v793_v49 = vpop.f32.mrb[17].mxu1 }
 0x114   : > { %1190 = vst.msk [vmem:[%s2420_s12 + $0x34] sm:$0xf] %vm1176_vm3, %v1878_v42  ;;  %1222 = vst.msk [vmem:[%s2420_s12 + $0xb4] sm:$0xf] %vm1176_vm3, %v1910_v43  ;;  %v666_v50 = vadd.f32 %v2410_v41, %v665_v48  ;;  %v794_v51 = vadd.f32 %v2410_v41, %v793_v49  ;;  %v1998_v52 = vpop.f32.mrb[18].mxu0  ;;  %v2030_v53 = vpop.f32.mrb[18].mxu1 }
 0x115   : > { %v874_v54 = vmax.f32 %v674_v46, 0.0  ;;  %v906_v55 = vmax.f32 %v802_v47, 0.0  ;;  %v677_v56 = vadd.f32 %v1998_v52, %v2410_v41  ;;  %v805_v57 = vadd.f32 %v2030_v53, %v2410_v41  ;;  %v668_v58 = vpop.f32.mrb[19].mxu0  ;;  %v796_v59 = vpop.f32.mrb[19].mxu1 }
 0x116   : > { %v872_v60 = vmax.f32 %v666_v50, 0.0  ;;  %v904_v61 = vmax.f32 %v794_v51, 0.0  ;;  %v669_v62 = vadd.f32 %v2410_v41, %v668_v58  ;;  %v797_v63 = vadd.f32 %v2410_v41, %v796_v59 }
 0x117   : > { %v1883_v0 = vpack.c.bf16 %v874_v54, %v874_v54  ;;  %v1915_v1 = vpack.c.bf16 %v906_v55, %v906_v55  ;;  %v875_v2 = vmax.f32 %v677_v56, 0.0  ;;  %v907_v3 = vmax.f32 %v805_v57, 0.0 }
 0x118   : > { %v1881_v4 = vpack.c.bf16 %v872_v60, %v872_v60  ;;  %v1913_v5 = vpack.c.bf16 %v904_v61, %v904_v61  ;;  %v873_v6 = vmax.f32 %v669_v62, 0.0  ;;  %v905_v7 = vmax.f32 %v797_v63, 0.0 }
 0x119   : > { %1195 = vst.msk [vmem:[%s2420_s12 + $0x48] sm:$0xf] %vm1176_vm3, %v1883_v0  ;;  %1227 = vst.msk [vmem:[%s2420_s12 + $0xc8] sm:$0xf] %vm1176_vm3, %v1915_v1  ;;  %v1884_v8 = vpack.c.bf16 %v875_v2, %v875_v2  ;;  %v1916_v9 = vpack.c.bf16 %v907_v3, %v907_v3 }
 0x11a   : > { %1193 = vst.msk [vmem:[%s2420_s12 + $0x40] sm:$0xf] %vm1176_vm3, %v1881_v4  ;;  %1225 = vst.msk [vmem:[%s2420_s12 + $0xc0] sm:$0xf] %vm1176_vm3, %v1913_v5  ;;  %v1882_v10 = vpack.c.bf16 %v873_v6, %v873_v6  ;;  %v1914_v11 = vpack.c.bf16 %v905_v7, %v905_v7  ;;  %v2001_v12 = vpop.f32.mrb[20].mxu0  ;;  %v2033_v13 = vpop.f32.mrb[20].mxu1 }
 0x11b   : > { %1196 = vst.msk [vmem:[%s2420_s12 + $0x4c] sm:$0xf] %vm1176_vm3, %v1884_v8  ;;  %1228 = vst.msk [vmem:[%s2420_s12 + $0xcc] sm:$0xf] %vm1176_vm3, %v1916_v9  ;;  %v690_v14 = vadd.f32 %v2001_v12, %v2410_v41  ;;  %v818_v15 = vadd.f32 %v2033_v13, %v2410_v41  ;;  %v681_v16 = vpop.f32.mrb[21].mxu0  ;;  %v809_v17 = vpop.f32.mrb[21].mxu1 }
 0x11c   : > { %1194 = vst.msk [vmem:[%s2420_s12 + $0x44] sm:$0xf] %vm1176_vm3, %v1882_v10  ;;  %1226 = vst.msk [vmem:[%s2420_s12 + $0xc4] sm:$0xf] %vm1176_vm3, %v1914_v11  ;;  %v682_v18 = vadd.f32 %v2410_v41, %v681_v16  ;;  %v810_v19 = vadd.f32 %v2410_v41, %v809_v17  ;;  %v2002_v20 = vpop.f32.mrb[22].mxu0  ;;  %v2034_v21 = vpop.f32.mrb[22].mxu1 }
 0x11d   : > { %v878_v22 = vmax.f32 %v690_v14, 0.0  ;;  %v910_v23 = vmax.f32 %v818_v15, 0.0  ;;  %v693_v24 = vadd.f32 %v2002_v20, %v2410_v41  ;;  %v821_v25 = vadd.f32 %v2034_v21, %v2410_v41  ;;  %v684_v26 = vpop.f32.mrb[23].mxu0  ;;  %v812_v27 = vpop.f32.mrb[23].mxu1 }
 0x11e   : > { %v876_v28 = vmax.f32 %v682_v18, 0.0  ;;  %v908_v29 = vmax.f32 %v810_v19, 0.0  ;;  %v685_v30 = vadd.f32 %v2410_v41, %v684_v26  ;;  %v813_v31 = vadd.f32 %v2410_v41, %v812_v27 }
 0x11f   : > { %v1887_v32 = vpack.c.bf16 %v878_v22, %v878_v22  ;;  %v1919_v33 = vpack.c.bf16 %v910_v23, %v910_v23  ;;  %v879_v34 = vmax.f32 %v693_v24, 0.0  ;;  %v911_v35 = vmax.f32 %v821_v25, 0.0 }
 0x120   : > { %v1885_v36 = vpack.c.bf16 %v876_v28, %v876_v28  ;;  %v1917_v37 = vpack.c.bf16 %v908_v29, %v908_v29  ;;  %v877_v38 = vmax.f32 %v685_v30, 0.0  ;;  %v909_v39 = vmax.f32 %v813_v31, 0.0 }
 0x121   : > { %1199 = vst.msk [vmem:[%s2420_s12 + $0x58] sm:$0xf] %vm1176_vm3, %v1887_v32  ;;  %1231 = vst.msk [vmem:[%s2420_s12 + $0xd8] sm:$0xf] %vm1176_vm3, %v1919_v33  ;;  %v1888_v40 = vpack.c.bf16 %v879_v34, %v879_v34  ;;  %v1920_v42 = vpack.c.bf16 %v911_v35, %v911_v35 }
 0x122   : > { %1197 = vst.msk [vmem:[%s2420_s12 + $0x50] sm:$0xf] %vm1176_vm3, %v1885_v36  ;;  %1229 = vst.msk [vmem:[%s2420_s12 + $0xd0] sm:$0xf] %vm1176_vm3, %v1917_v37  ;;  %v1886_v43 = vpack.c.bf16 %v877_v38, %v877_v38  ;;  %v1918_v44 = vpack.c.bf16 %v909_v39, %v909_v39  ;;  %v2005_v45 = vpop.f32.mrb[24].mxu0  ;;  %v2037_v46 = vpop.f32.mrb[24].mxu1 }
 0x123   : > { %1200 = vst.msk [vmem:[%s2420_s12 + $0x5c] sm:$0xf] %vm1176_vm3, %v1888_v40  ;;  %1232 = vst.msk [vmem:[%s2420_s12 + $0xdc] sm:$0xf] %vm1176_vm3, %v1920_v42  ;;  %v706_v47 = vadd.f32 %v2005_v45, %v2410_v41  ;;  %v834_v48 = vadd.f32 %v2037_v46, %v2410_v41  ;;  %v697_v49 = vpop.f32.mrb[25].mxu0  ;;  %v825_v50 = vpop.f32.mrb[25].mxu1 }
 0x124   : > { %1198 = vst.msk [vmem:[%s2420_s12 + $0x54] sm:$0xf] %vm1176_vm3, %v1886_v43  ;;  %1230 = vst.msk [vmem:[%s2420_s12 + $0xd4] sm:$0xf] %vm1176_vm3, %v1918_v44  ;;  %v698_v51 = vadd.f32 %v2410_v41, %v697_v49  ;;  %v826_v52 = vadd.f32 %v2410_v41, %v825_v50  ;;  %v2006_v53 = vpop.f32.mrb[26].mxu0  ;;  %v2038_v54 = vpop.f32.mrb[26].mxu1 }
 0x125   : > { %v882_v55 = vmax.f32 %v706_v47, 0.0  ;;  %v914_v56 = vmax.f32 %v834_v48, 0.0  ;;  %v709_v57 = vadd.f32 %v2006_v53, %v2410_v41  ;;  %v837_v58 = vadd.f32 %v2038_v54, %v2410_v41  ;;  %v700_v59 = vpop.f32.mrb[27].mxu0  ;;  %v828_v60 = vpop.f32.mrb[27].mxu1 }
 0x126   : > { %v880_v61 = vmax.f32 %v698_v51, 0.0  ;;  %v912_v62 = vmax.f32 %v826_v52, 0.0  ;;  %v701_v63 = vadd.f32 %v2410_v41, %v700_v59  ;;  %v829_v0 = vadd.f32 %v2410_v41, %v828_v60 }
 0x127   : > { %v1891_v1 = vpack.c.bf16 %v882_v55, %v882_v55  ;;  %v1923_v2 = vpack.c.bf16 %v914_v56, %v914_v56  ;;  %v883_v3 = vmax.f32 %v709_v57, 0.0  ;;  %v915_v4 = vmax.f32 %v837_v58, 0.0 }
 0x128   : > { %v1889_v5 = vpack.c.bf16 %v880_v61, %v880_v61  ;;  %v1921_v6 = vpack.c.bf16 %v912_v62, %v912_v62  ;;  %v881_v7 = vmax.f32 %v701_v63, 0.0  ;;  %v913_v8 = vmax.f32 %v829_v0, 0.0 }
 0x129   : > { %1203 = vst.msk [vmem:[%s2420_s12 + $0x68] sm:$0xf] %vm1176_vm3, %v1891_v1  ;;  %1235 = vst.msk [vmem:[%s2420_s12 + $0xe8] sm:$0xf] %vm1176_vm3, %v1923_v2  ;;  %v1892_v9 = vpack.c.bf16 %v883_v3, %v883_v3  ;;  %v1924_v10 = vpack.c.bf16 %v915_v4, %v915_v4 }
 0x12a   : > { %1201 = vst.msk [vmem:[%s2420_s12 + $0x60] sm:$0xf] %vm1176_vm3, %v1889_v5  ;;  %1233 = vst.msk [vmem:[%s2420_s12 + $0xe0] sm:$0xf] %vm1176_vm3, %v1921_v6  ;;  %v1890_v11 = vpack.c.bf16 %v881_v7, %v881_v7  ;;  %v1922_v12 = vpack.c.bf16 %v913_v8, %v913_v8  ;;  %v2009_v13 = vpop.f32.mrb[28].mxu0  ;;  %v2041_v14 = vpop.f32.mrb[28].mxu1 }
 0x12b   : > { %1204 = vst.msk [vmem:[%s2420_s12 + $0x6c] sm:$0xf] %vm1176_vm3, %v1892_v9  ;;  %1236 = vst.msk [vmem:[%s2420_s12 + $0xec] sm:$0xf] %vm1176_vm3, %v1924_v10  ;;  %v722_v15 = vadd.f32 %v2009_v13, %v2410_v41  ;;  %v850_v16 = vadd.f32 %v2041_v14, %v2410_v41  ;;  %v713_v17 = vpop.f32.mrb[29].mxu0  ;;  %v841_v18 = vpop.f32.mrb[29].mxu1 }
 0x12c   : > { %1202 = vst.msk [vmem:[%s2420_s12 + $0x64] sm:$0xf] %vm1176_vm3, %v1890_v11  ;;  %1234 = vst.msk [vmem:[%s2420_s12 + $0xe4] sm:$0xf] %vm1176_vm3, %v1922_v12  ;;  %v714_v19 = vadd.f32 %v2410_v41, %v713_v17  ;;  %v842_v20 = vadd.f32 %v2410_v41, %v841_v18  ;;  %v2010_v21 = vpop.f32.mrb[30].mxu0  ;;  %v2042_v22 = vpop.f32.mrb[30].mxu1 }
 0x12d   : > { %v886_v23 = vmax.f32 %v722_v15, 0.0  ;;  %v918_v24 = vmax.f32 %v850_v16, 0.0  ;;  %v725_v25 = vadd.f32 %v2010_v21, %v2410_v41  ;;  %v853_v26 = vadd.f32 %v2042_v22, %v2410_v41  ;;  %v716_v27 = vpop.f32.mrb[31].mxu0  ;;  %v844_v28 = vpop.f32.mrb[31].mxu1 }
 0x12e   : > { %v884_v29 = vmax.f32 %v714_v19, 0.0  ;;  %v916_v30 = vmax.f32 %v842_v20, 0.0  ;;  %v717_v31 = vadd.f32 %v2410_v41, %v716_v27  ;;  %v845_v32 = vadd.f32 %v2410_v41, %v844_v28  ;;  %1247 = sbr.rel (!%p2313_p4) target bundleno = 400 (0x190), region = 36 }
 0x12f   : > { %v1895_v33 = vpack.c.bf16 %v886_v23, %v886_v23  ;;  %v1927_v34 = vpack.c.bf16 %v918_v24, %v918_v24  ;;  %v887_v35 = vmax.f32 %v725_v25, 0.0  ;;  %v919_v36 = vmax.f32 %v853_v26, 0.0 }
 0x130   : > { %v1893_v37 = vpack.c.bf16 %v884_v29, %v884_v29  ;;  %v1925_v38 = vpack.c.bf16 %v916_v30, %v916_v30  ;;  %v885_v39 = vmax.f32 %v717_v31, 0.0  ;;  %v917_v40 = vmax.f32 %v845_v32, 0.0 }
 0x131   : > { %1207 = vst.msk [vmem:[%s2420_s12 + $0x78] sm:$0xf] %vm1176_vm3, %v1895_v33  ;;  %1239 = vst.msk [vmem:[%s2420_s12 + $0xf8] sm:$0xf] %vm1176_vm3, %v1927_v34  ;;  %v1896_v42 = vpack.c.bf16 %v887_v35, %v887_v35  ;;  %v1928_v43 = vpack.c.bf16 %v919_v36, %v919_v36 }
 0x132   : > { %1205 = vst.msk [vmem:[%s2420_s12 + $0x70] sm:$0xf] %vm1176_vm3, %v1893_v37  ;;  %1237 = vst.msk [vmem:[%s2420_s12 + $0xf0] sm:$0xf] %vm1176_vm3, %v1925_v38  ;;  %v1894_v41 = vpack.c.bf16 %v885_v39, %v885_v39  ;;  %v1926_v44 = vpack.c.bf16 %v917_v40, %v917_v40 }
 0x133   : > { %1208 = vst.msk [vmem:[%s2420_s12 + $0x7c] sm:$0xf] %vm1176_vm3, %v1896_v42  ;;  %1240 = vst.msk [vmem:[%s2420_s12 + $0xfc] sm:$0xf] %vm1176_vm3, %v1928_v43 }
 0x134   : > { %1206 = vst.msk [vmem:[%s2420_s12 + $0x74] sm:$0xf] %vm1176_vm3, %v1894_v41  ;;  %1238 = vst.msk [vmem:[%s2420_s12 + $0xf4] sm:$0xf] %vm1176_vm3, %v1926_v44 }
 0x135   : > { %s2817_s18 = smov (!%p1250_p8, %s1249_s18), 64 }
 0x136   : > { %s1850_s25 = sshll.u32 %s2817_s18, 6 }
 0x137   : > { %p1853_p9 = scmp.eq.s32.totalorder %s1850_s25, 0 }
 0x138   : > { %s2619_s26 = sshrl.u32 (!%p1853_p9), %s2817_s18, 6 }
 0x139   : > { %1258 = sbr.rel (%p1853_p9) target bundleno = 400 (0x190), region = 40  ;;  %p1854_p10 = scmp.le.s32.totalorder (!%p1853_p9), %s2619_s26, 0 }
 0x140   : > { %1663 = sbr.rel (%p1854_p10) target bundleno = 379 (0x17b), region = 112  ;;  %s2810_s15 = smov (!%p1854_p10), %s2613_s24 }
 0x141   : > { %s2811_s20 = smov (!%p1854_p10), %s2420_s12  ;;  %s2628_s27 = smov (!%p1854_p10), 0  }
 0x142   : > { %s2630_s28 = smov (!%p1854_p10), 0  }
 0x147 LB: >> { %v1274_v45 = vld [vmem:[%s2241_s20] sm:$0xf]  ;;  %v1276_v46 = vld [vmem:[%s2241_s20 + $0x4] sm:$0xf]  ;;  %v1278_v47 = vld [vmem:[%s2241_s20 + $0x8] sm:$0xf]  ;;  %s2249_s28 = sphi %s2630_s28, %s1268_s28   ;;  %s2245_s27 = sphi %s2628_s27, %s2812_s27   ;;  %s2241_s20 = sphi %s2811_s20, %s1407_s20   ;;  %s2237_s15 = sphi %s2810_s15, %s1408_s15  }
 0x148   : >> { %1275 = vst [vmem:[%s2237_s15] sm:$0xf] %v1274_v45  ;;  %1277 = vst [vmem:[%s2237_s15 + $0x4] sm:$0xf] %v1276_v46  ;;  %v1280_v48 = vld [vmem:[%s2241_s20 + $0xc] sm:$0xf]  ;;  %s1402_s29 = sadd.s32 1, %s2245_s27 }
 0x149   : >> { %1279 = vst [vmem:[%s2237_s15 + $0x8] sm:$0xf] %v1278_v47  ;;  %v1282_v49 = vld [vmem:[%s2241_s20 + $0x10] sm:$0xf]  ;;  %v1284_v50 = vld [vmem:[%s2241_s20 + $0x14] sm:$0xf]  ;;  %p1403_p11 = scmp.ge.s32.totalorder %s1402_s29, %s2619_s26 }
 0x14a   : >> { %1281 = vst [vmem:[%s2237_s15 + $0xc] sm:$0xf] %v1280_v48  ;;  %1283 = vst [vmem:[%s2237_s15 + $0x10] sm:$0xf] %v1282_v49  ;;  %v1286_v51 = vld [vmem:[%s2241_s20 + $0x18] sm:$0xf] }
 0x14b   : >> { %1285 = vst [vmem:[%s2237_s15 + $0x14] sm:$0xf] %v1284_v50  ;;  %v1288_v52 = vld [vmem:[%s2241_s20 + $0x1c] sm:$0xf]  ;;  %v1290_v53 = vld [vmem:[%s2241_s20 + $0x20] sm:$0xf] }
 0x14c   : >> { %1287 = vst [vmem:[%s2237_s15 + $0x18] sm:$0xf] %v1286_v51  ;;  %1289 = vst [vmem:[%s2237_s15 + $0x1c] sm:$0xf] %v1288_v52  ;;  %v1292_v54 = vld [vmem:[%s2241_s20 + $0x24] sm:$0xf] }
 0x14d   : >> { %1291 = vst [vmem:[%s2237_s15 + $0x20] sm:$0xf] %v1290_v53  ;;  %v1294_v55 = vld [vmem:[%s2241_s20 + $0x28] sm:$0xf]  ;;  %v1296_v56 = vld [vmem:[%s2241_s20 + $0x2c] sm:$0xf] }
 0x14e   : >> { %1293 = vst [vmem:[%s2237_s15 + $0x24] sm:$0xf] %v1292_v54  ;;  %1295 = vst [vmem:[%s2237_s15 + $0x28] sm:$0xf] %v1294_v55  ;;  %v1298_v57 = vld [vmem:[%s2241_s20 + $0x30] sm:$0xf] }
 0x14f   : >> { %1297 = vst [vmem:[%s2237_s15 + $0x2c] sm:$0xf] %v1296_v56  ;;  %v1300_v58 = vld [vmem:[%s2241_s20 + $0x34] sm:$0xf]  ;;  %v1302_v59 = vld [vmem:[%s2241_s20 + $0x38] sm:$0xf] }
 0x150   : >> { %1299 = vst [vmem:[%s2237_s15 + $0x30] sm:$0xf] %v1298_v57  ;;  %1301 = vst [vmem:[%s2237_s15 + $0x34] sm:$0xf] %v1300_v58  ;;  %v1304_v60 = vld [vmem:[%s2241_s20 + $0x3c] sm:$0xf] }
 0x151   : >> { %1303 = vst [vmem:[%s2237_s15 + $0x38] sm:$0xf] %v1302_v59  ;;  %v1306_v61 = vld [vmem:[%s2241_s20 + $0x40] sm:$0xf]  ;;  %v1308_v62 = vld [vmem:[%s2241_s20 + $0x44] sm:$0xf] }
 0x152   : >> { %1305 = vst [vmem:[%s2237_s15 + $0x3c] sm:$0xf] %v1304_v60  ;;  %1307 = vst [vmem:[%s2237_s15 + $0x40] sm:$0xf] %v1306_v61  ;;  %v1310_v63 = vld [vmem:[%s2241_s20 + $0x48] sm:$0xf] }
 0x153   : >> { %1309 = vst [vmem:[%s2237_s15 + $0x44] sm:$0xf] %v1308_v62  ;;  %v1312_v0 = vld [vmem:[%s2241_s20 + $0x4c] sm:$0xf]  ;;  %v1314_v1 = vld [vmem:[%s2241_s20 + $0x50] sm:$0xf] }
 0x154   : >> { %1311 = vst [vmem:[%s2237_s15 + $0x48] sm:$0xf] %v1310_v63  ;;  %1313 = vst [vmem:[%s2237_s15 + $0x4c] sm:$0xf] %v1312_v0  ;;  %v1316_v2 = vld [vmem:[%s2241_s20 + $0x54] sm:$0xf] }
 0x155   : >> { %1315 = vst [vmem:[%s2237_s15 + $0x50] sm:$0xf] %v1314_v1  ;;  %v1318_v3 = vld [vmem:[%s2241_s20 + $0x58] sm:$0xf]  ;;  %v1320_v4 = vld [vmem:[%s2241_s20 + $0x5c] sm:$0xf] }
 0x156   : >> { %1317 = vst [vmem:[%s2237_s15 + $0x54] sm:$0xf] %v1316_v2  ;;  %1319 = vst [vmem:[%s2237_s15 + $0x58] sm:$0xf] %v1318_v3  ;;  %v1322_v5 = vld [vmem:[%s2241_s20 + $0x60] sm:$0xf] }
 0x157   : >> { %1321 = vst [vmem:[%s2237_s15 + $0x5c] sm:$0xf] %v1320_v4  ;;  %v1324_v6 = vld [vmem:[%s2241_s20 + $0x64] sm:$0xf]  ;;  %v1326_v7 = vld [vmem:[%s2241_s20 + $0x68] sm:$0xf] }
 0x158   : >> { %1323 = vst [vmem:[%s2237_s15 + $0x60] sm:$0xf] %v1322_v5  ;;  %1325 = vst [vmem:[%s2237_s15 + $0x64] sm:$0xf] %v1324_v6  ;;  %v1328_v8 = vld [vmem:[%s2241_s20 + $0x6c] sm:$0xf] }
 0x159   : >> { %1327 = vst [vmem:[%s2237_s15 + $0x68] sm:$0xf] %v1326_v7  ;;  %v1330_v9 = vld [vmem:[%s2241_s20 + $0x70] sm:$0xf]  ;;  %v1332_v10 = vld [vmem:[%s2241_s20 + $0x74] sm:$0xf] }
 0x15a   : >> { %1329 = vst [vmem:[%s2237_s15 + $0x6c] sm:$0xf] %v1328_v8  ;;  %1331 = vst [vmem:[%s2237_s15 + $0x70] sm:$0xf] %v1330_v9  ;;  %v1334_v11 = vld [vmem:[%s2241_s20 + $0x78] sm:$0xf] }
 0x15b   : >> { %1333 = vst [vmem:[%s2237_s15 + $0x74] sm:$0xf] %v1332_v10  ;;  %v1336_v12 = vld [vmem:[%s2241_s20 + $0x7c] sm:$0xf]  ;;  %v1338_v13 = vld [vmem:[%s2241_s20 + $0x80] sm:$0xf] }
 0x15c   : >> { %1335 = vst [vmem:[%s2237_s15 + $0x78] sm:$0xf] %v1334_v11  ;;  %1337 = vst [vmem:[%s2237_s15 + $0x7c] sm:$0xf] %v1336_v12  ;;  %v1340_v14 = vld [vmem:[%s2241_s20 + $0x84] sm:$0xf] }
 0x15d   : >> { %1339 = vst [vmem:[%s2237_s15 + $0x80] sm:$0xf] %v1338_v13  ;;  %v1342_v15 = vld [vmem:[%s2241_s20 + $0x88] sm:$0xf]  ;;  %v1344_v16 = vld [vmem:[%s2241_s20 + $0x8c] sm:$0xf] }
 0x15e   : >> { %1341 = vst [vmem:[%s2237_s15 + $0x84] sm:$0xf] %v1340_v14  ;;  %1343 = vst [vmem:[%s2237_s15 + $0x88] sm:$0xf] %v1342_v15  ;;  %v1346_v17 = vld [vmem:[%s2241_s20 + $0x90] sm:$0xf] }
 0x15f   : >> { %1345 = vst [vmem:[%s2237_s15 + $0x8c] sm:$0xf] %v1344_v16  ;;  %v1348_v18 = vld [vmem:[%s2241_s20 + $0x94] sm:$0xf]  ;;  %v1350_v19 = vld [vmem:[%s2241_s20 + $0x98] sm:$0xf] }
 0x160   : >> { %1347 = vst [vmem:[%s2237_s15 + $0x90] sm:$0xf] %v1346_v17  ;;  %1349 = vst [vmem:[%s2237_s15 + $0x94] sm:$0xf] %v1348_v18  ;;  %v1352_v20 = vld [vmem:[%s2241_s20 + $0x9c] sm:$0xf] }
 0x161   : >> { %1351 = vst [vmem:[%s2237_s15 + $0x98] sm:$0xf] %v1350_v19  ;;  %v1354_v21 = vld [vmem:[%s2241_s20 + $0xa0] sm:$0xf]  ;;  %v1356_v22 = vld [vmem:[%s2241_s20 + $0xa4] sm:$0xf] }
 0x162   : >> { %1353 = vst [vmem:[%s2237_s15 + $0x9c] sm:$0xf] %v1352_v20  ;;  %1355 = vst [vmem:[%s2237_s15 + $0xa0] sm:$0xf] %v1354_v21  ;;  %v1358_v23 = vld [vmem:[%s2241_s20 + $0xa8] sm:$0xf] }
 0x163   : >> { %1357 = vst [vmem:[%s2237_s15 + $0xa4] sm:$0xf] %v1356_v22  ;;  %v1360_v24 = vld [vmem:[%s2241_s20 + $0xac] sm:$0xf]  ;;  %v1362_v25 = vld [vmem:[%s2241_s20 + $0xb0] sm:$0xf] }
 0x164   : >> { %1359 = vst [vmem:[%s2237_s15 + $0xa8] sm:$0xf] %v1358_v23  ;;  %1361 = vst [vmem:[%s2237_s15 + $0xac] sm:$0xf] %v1360_v24  ;;  %v1364_v26 = vld [vmem:[%s2241_s20 + $0xb4] sm:$0xf] }
 0x165   : >> { %1363 = vst [vmem:[%s2237_s15 + $0xb0] sm:$0xf] %v1362_v25  ;;  %v1366_v27 = vld [vmem:[%s2241_s20 + $0xb8] sm:$0xf]  ;;  %v1368_v28 = vld [vmem:[%s2241_s20 + $0xbc] sm:$0xf] }
 0x166   : >> { %1365 = vst [vmem:[%s2237_s15 + $0xb4] sm:$0xf] %v1364_v26  ;;  %1367 = vst [vmem:[%s2237_s15 + $0xb8] sm:$0xf] %v1366_v27  ;;  %v1370_v29 = vld [vmem:[%s2241_s20 + $0xc0] sm:$0xf] }
 0x167   : >> { %1369 = vst [vmem:[%s2237_s15 + $0xbc] sm:$0xf] %v1368_v28  ;;  %v1372_v30 = vld [vmem:[%s2241_s20 + $0xc4] sm:$0xf]  ;;  %v1374_v31 = vld [vmem:[%s2241_s20 + $0xc8] sm:$0xf] }
 0x168   : >> { %1371 = vst [vmem:[%s2237_s15 + $0xc0] sm:$0xf] %v1370_v29  ;;  %1373 = vst [vmem:[%s2237_s15 + $0xc4] sm:$0xf] %v1372_v30  ;;  %v1376_v32 = vld [vmem:[%s2241_s20 + $0xcc] sm:$0xf] }
 0x169   : >> { %1375 = vst [vmem:[%s2237_s15 + $0xc8] sm:$0xf] %v1374_v31  ;;  %v1378_v33 = vld [vmem:[%s2241_s20 + $0xd0] sm:$0xf]  ;;  %v1380_v34 = vld [vmem:[%s2241_s20 + $0xd4] sm:$0xf] }
 0x16a   : >> { %1377 = vst [vmem:[%s2237_s15 + $0xcc] sm:$0xf] %v1376_v32  ;;  %1379 = vst [vmem:[%s2237_s15 + $0xd0] sm:$0xf] %v1378_v33  ;;  %v1382_v35 = vld [vmem:[%s2241_s20 + $0xd8] sm:$0xf] }
 0x16b   : >> { %1381 = vst [vmem:[%s2237_s15 + $0xd4] sm:$0xf] %v1380_v34  ;;  %v1384_v36 = vld [vmem:[%s2241_s20 + $0xdc] sm:$0xf]  ;;  %v1386_v37 = vld [vmem:[%s2241_s20 + $0xe0] sm:$0xf] }
 0x16c   : >> { %1383 = vst [vmem:[%s2237_s15 + $0xd8] sm:$0xf] %v1382_v35  ;;  %1385 = vst [vmem:[%s2237_s15 + $0xdc] sm:$0xf] %v1384_v36  ;;  %v1388_v38 = vld [vmem:[%s2241_s20 + $0xe4] sm:$0xf] }
 0x16d   : >> { %1387 = vst [vmem:[%s2237_s15 + $0xe0] sm:$0xf] %v1386_v37  ;;  %v1390_v39 = vld [vmem:[%s2241_s20 + $0xe8] sm:$0xf]  ;;  %v1392_v40 = vld [vmem:[%s2241_s20 + $0xec] sm:$0xf] }
 0x16e   : >> { %1389 = vst [vmem:[%s2237_s15 + $0xe4] sm:$0xf] %v1388_v38  ;;  %1391 = vst [vmem:[%s2237_s15 + $0xe8] sm:$0xf] %v1390_v39  ;;  %v1394_v42 = vld [vmem:[%s2241_s20 + $0xf0] sm:$0xf] }
 0x16f   : >> { %1393 = vst [vmem:[%s2237_s15 + $0xec] sm:$0xf] %v1392_v40  ;;  %v1396_v43 = vld [vmem:[%s2241_s20 + $0xf4] sm:$0xf]  ;;  %v1398_v41 = vld [vmem:[%s2241_s20 + $0xf8] sm:$0xf] }
 0x170   : >> { %1395 = vst [vmem:[%s2237_s15 + $0xf0] sm:$0xf] %v1394_v42  ;;  %1397 = vst [vmem:[%s2237_s15 + $0xf4] sm:$0xf] %v1396_v43  ;;  %v1400_v44 = vld [vmem:[%s2241_s20 + $0xfc] sm:$0xf] }
 0x171   : >> { %1399 = vst [vmem:[%s2237_s15 + $0xf8] sm:$0xf] %v1398_v41  ;;  %1401 = vst [vmem:[%s2237_s15 + $0xfc] sm:$0xf] %v1400_v44  ;;  %s2819_s29 = smov (%p1403_p11, %s1402_s29), 0  ;;  %s1268_s28 = sadd.s32 1, %s2249_s28  }
 0x172   : >> { %s1855_s30 = sshll.u32 %s2819_s29, 8  ;;  %p1267_p12 = scmp.ge.s32.totalorder %s1268_s28, %s2619_s26 }
 0x173   : >> { %s1407_s20 = scalar_lea.vmem %s2420_s12, %s1855_s30 [#allocation2]   ;;  %s1408_s15 = scalar_lea.vmem %s2613_s24, %s1855_s30  }
 0x174   : >> { %s2812_s27 = smov %s2819_s29  ;;  %1270 = sbr.rel (!%p1267_p12) target bundleno = 327 (0x147), region = 118 }
 0x17b PF: > { %s2787_s4 = sand.u32 63, %s2817_s18   ;;  %s1930_s5 = sshll.u32 %s2619_s26, 8 }
 0x17c   : > { %s1413_s6 = scalar_lea.vmem %s2420_s12, %s1930_s5 [#allocation2]   ;;  %s1415_s7 = scalar_lea.vmem %s2613_s24, %s1930_s5  }
 0x17d   : > { %p1860_p13 = scmp.le.s32.totalorder %s2787_s4, 0 }
 0x17e   : > { %s2251_s8 = smov (!%p1860_p13), %s1415_s7   ;;  %s2255_s9 = smov (!%p1860_p13), %s1413_s6  }
 0x17f   : > { %1677 = sbr.rel (%p1860_p13) target bundleno = 400 (0x190), region = 123  ;;  %s2259_s10 = smov (!%p1860_p13), 0  }
 0x180   : > { %s2263_s11 = smov (!%p1860_p13), 0  }
 0x186 LB: >> { %v1425_v45 = vld [vmem:[%s2257_s9] sm:$0xf]  ;;  %s1427_s14 = sadd.s32 1, %s2261_s10  ;;  %s1419_s11 = sadd.s32 1, %s2265_s11   ;;  %s2265_s11 = sphi %s2263_s11, %s1419_s11   ;;  %s2261_s10 = sphi %s2259_s10, %s2260_s10   ;;  %s2257_s9 = sphi %s2255_s9, %s1432_s9   ;;  %s2253_s8 = sphi %s2251_s8, %s1433_s8  }
 0x187   : >> { %1426 = vst [vmem:[%s2253_s8] sm:$0xf] %v1425_v45  ;;  %p1428_p0 = scmp.ge.s32.totalorder %s1427_s14, %s2787_s4  ;;  %p1418_p1 = scmp.ge.s32.totalorder %s1419_s11, %s2787_s4 }
 0x189   : >> { %s2821_s14 = smov (%p1428_p0, %s1427_s14), 0  ;;  %1421 = sbr.rel (!%p1418_p1) target bundleno = 390 (0x186), region = 129 }
 0x18a   : >> { %s1861_s17 = sshll.u32 %s2821_s14, 2  ;;  %s2260_s10 = smov %s2821_s14  }
 0x18b   : >> { %s1432_s9 = scalar_lea.vmem %s1413_s6, %s1861_s17 [#allocation2]   ;;  %s1433_s8 = scalar_lea.vmem %s1415_s7, %s1861_s17  }
 0x190 PF: > { %p10_p2 = scmp.ge.s32.totalorder %s2303_s16, 8   ;;  %s2813_s12 = smov %s2229_s13 }
 0x191   : > { %s2814_s13 = smov %s2311_s19  ;;  %s2815_s14 = smov %s2303_s16 }
 0x192   :  { %12 = sbr.rel (!%p10_p2) target bundleno = 2 (0x2), region = 140 }

// kernel: encoder_cnn_forward.6
= control target key start
LH: loop header
LB: loop body
LE: loop exit
PB: predicated region body
PF: predicated region fallthrough
CT: control target
= control target key end

     0   :  { %s3267_s12 = smov 0   ;;  %s3269_s13 = smov 0   ;;  %s4045_s0 = inlined_call_operand.vmem [shape: bf16[600,288], index: 0, kind: input, shape index: {}]   ;;  %s4046_s1 = inlined_call_operand.vmem [shape: bf16[288,64], index: 1, kind: input, shape index: {}]   ;;  %s4047_s2 = inlined_call_operand.vmem [shape: f32[1,64], index: 2, kind: input, shape index: {}]   ;;  %s4048_s3 = inlined_call_operand.vmem [shape: bf16[600,64], index: 3, kind: output, shape index: {}]  }
   0x1   :  { %s3271_s14 = smov 0  }
   0x2 LB: > { %s3280_s15 = sadd.s32 4294967295, %s3212_s14   ;;  %s3282_s16 = sadd.s32 1, %s3212_s14   ;;  %s3212_s14 = sphi %s3271_s14, %s4055_s14   ;;  %s3208_s13 = sphi %s3269_s13, %s4054_s13   ;;  %s3204_s12 = sphi %s3267_s12, %s4053_s12  }
   0x3   : > { %s85_s17 = ssub.s32 %s3212_s14, %s3282_s16  ;;  %s88_s18 = sadd.s32 1, %s3208_s13 }
   0x4   : > { %p86_p0 = scmp.eq.s32.totalorder %s85_s17, 0  ;;  %p98_p1 = scmp.ne.s32.totalorder %s3208_s13, %s3204_s12 }
   0x5   : > { %p99_p2 = scmp.eq.s32.totalorder %s3280_s15, 1  ;;  %p2489_p3 = scmp.ge.s32.totalorder %s3212_s14, 1 }
   0x6   : > { %s3290_s19 = scalar_select %p86_p0, %s3208_s13, %s88_s18  }
   0x7   : > { %p3292_p4 = por %p99_p2, %p98_p1  ;;  %p149_p5 = scmp.lt.s32.totalorder %s3212_s14, 3 }
   0x9   : > { %p150_p6 = pnand %p2489_p3, %p149_p5 }
   0xa   : > { %v3012_v0 = vld [vmem:[%s4046_s1] sm:$0xff] (!%p150_p6)   ;;  %v3246_v1 = vmov (!%p150_p6), 0   ;;  %s3302_s23 = sshll.u32 (!%p150_p6), %s3280_s15, 6  ;;  %v3013_v2 = vld [vmem:[%s4046_s1 + $0x8] sm:$0xff] (!%p150_p6)   ;;  %v3014_v3 = vld [vmem:[%s4046_s1 + $0x10] sm:$0xff] (!%p150_p6)   ;;  %vm960_vm0 = vcmask (!%p150_p6), 261120  }
   0xb   : > { %153 = sbr.rel (%p150_p6) target bundleno = 573 (0x23d), region = 32  ;;  %1057 = vmatprep.subr.bf16.mxu0 (!%p150_p6), %v3246_v1  ;;  %2890 = vmatprep.subr.bf16.mxu1 (!%p150_p6), %v3246_v1  ;;  %p184_p7 = scmp.lt.s32.totalorder (!%p150_p6), %s3302_s23, 74  ;;  %v3015_v4 = vld [vmem:[%s4046_s1 + $0x18] sm:$0xff] (!%p150_p6)   ;;  %v3016_v5 = vld [vmem:[%s4046_s1 + $0x20] sm:$0xff] (!%p150_p6)   ;;  %v3017_v7 = vld [vmem:[%s4046_s1 + $0x28] sm:$0xff] (!%p150_p6)   ;;  %vm1955_vm1 = vcmask (!%p150_p6), 519168  }
   0xc   : > { %1058 = vmatpush1.bf16.msra.mxu0 (!%p150_p6), %v3012_v0  ;;  %2906 = vmatpush1.bf16.msra.mxu1 (!%p150_p6), %v3012_v0  ;;  %v3018_v9 = vld [vmem:[%s4046_s1 + $0x30] sm:$0xff] (!%p150_p6)   ;;  %v3019_v10 = vld [vmem:[%s4046_s1 + $0x38] sm:$0xff] (!%p150_p6)   ;;  %v3020_v11 = vld [vmem:[%s4046_s1 + $0x40] sm:$0xff] (!%p150_p6)   ;;  %s175_s25 = sand.u32 (!%p150_p6), 1, %s3204_s12  }
   0xd   : > { %1059 = vmatprep.subr.bf16.mxu0 (!%p150_p6), %v3246_v1  ;;  %2891 = vmatprep.subr.bf16.mxu1 (!%p150_p6), %v3246_v1  ;;  %v3021_v12 = vld [vmem:[%s4046_s1 + $0x48] sm:$0xff] (!%p150_p6)   ;;  %v3022_v13 = vld [vmem:[%s4046_s1 + $0x50] sm:$0xff] (!%p150_p6)   ;;  %v3023_v14 = vld [vmem:[%s4046_s1 + $0x58] sm:$0xff] (!%p150_p6)   ;;  %s2490_s26 = sshll.u32 (!%p150_p6), %s175_s25, 8 }
   0xe   : > { %v3024_v15 = vld [vmem:[%s4046_s1 + $0x60] sm:$0xff] (!%p150_p6)   ;;  %v3025_v16 = vld [vmem:[%s4046_s1 + $0x68] sm:$0xff] (!%p150_p6)   ;;  %v3026_v17 = vld [vmem:[%s4046_s1 + $0x70] sm:$0xff] (!%p150_p6)   ;;  %s3598_s12 = scalar_lea.vmem (!%p150_p6), [#allocation2], %s2490_s26  }
   0xf   : > { %v3027_v18 = vld [vmem:[%s4046_s1 + $0x78] sm:$0xff] (!%p150_p6)   ;;  %v3034_v19 = vld [vmem:[%s4046_s1 + $0x80] sm:$0xff] (!%p150_p6)   ;;  %v3059_v24 = vld [vmem:[%s4046_s1 + $0x88] sm:$0xff] (!%p150_p6)  }
  0x10   : > { %1060 = vmatpush1.bf16.msra.mxu0 (!%p150_p6), %v3013_v2  ;;  %2907 = vmatpush1.bf16.msra.mxu1 (!%p150_p6), %v3013_v2 }
  0x11   : > { %1061 = vmatprep.subr.bf16.mxu0 (!%p150_p6), %v3246_v1  ;;  %2892 = vmatprep.subr.bf16.mxu1 (!%p150_p6), %v3246_v1 }
  0x12   : > { %s185_s28 = scalar_select %p184_p7, %s3302_s23, 74 }
  0x13   : > { %s2028_s27 = ssub.s32 (%p3292_p4), 75, %s3302_s23 }
  0x14   : > { %1062 = vmatpush1.bf16.msra.mxu0 %v3014_v3  ;;  %2908 = vmatpush1.bf16.msra.mxu1 %v3014_v3  ;;  %s2922_s4 = smul.u32 12, %s185_s28  ;;  %s2785_s28 = sshll.u32 (%p3292_p4), %s3280_s15, 8 }
  0x15   : > { %1063 = vmatprep.subr.bf16.mxu0 %v3246_v1  ;;  %2893 = vmatprep.subr.bf16.mxu1 %v3246_v1  ;;  %p2029_p8 = scmp.lt.s32.totalorder (%p3292_p4), %s2028_s27, 64 }
  0x16   : > { %s3327_s9 = scalar_lea.vmem %s4045_s0, %s2922_s4  ;;  %s3853_s4 = scalar_lea.vmem (%p3292_p4), %s4048_s3, %s2785_s28  }
  0x17   : > { %v3030_v6 = vld [vmem:[%s3327_s9 + $0x4] ss:$12 sps:$4 sm:$0xff]   ;;  %v3028_v20 = vld [vmem:[%s3327_s9] ss:$12 sps:$4 sm:$0xff]   ;;  %v3035_v22 = vld [vmem:[%s3327_s9 + $0x1c] ss:$12 sps:$4 sm:$0xff]  }
  0x18   : > { %1064 = vmatpush1.bf16.msra.mxu0 %v3015_v4  ;;  %2909 = vmatpush1.bf16.msra.mxu1 %v3015_v4  ;;  %v3033_v8 = vld [vmem:[%s3327_s9 + $0x244] ss:$12 sps:$4 sm:$0xff]   ;;  %v3031_v21 = vld [vmem:[%s3327_s9 + $0x240] ss:$12 sps:$4 sm:$0xff]   ;;  %v3037_v23 = vld [vmem:[%s3327_s9 + $0x25c] ss:$12 sps:$4 sm:$0xff]  }
  0x19   : > { %1065 = vmatprep.subr.bf16.mxu0 %v3246_v1  ;;  %2894 = vmatprep.subr.bf16.mxu1 %v3246_v1  ;;  %v3039_v25 = vld [vmem:[%s3327_s9 + $0x18] ss:$12 sps:$4 sm:$0xff]   ;;  %v3041_v27 = vld [vmem:[%s3327_s9 + $0x34] ss:$12 sps:$4 sm:$0xff]   ;;  %v3045_v29 = vld [vmem:[%s3327_s9 + $0x30] ss:$12 sps:$4 sm:$0xff]  }
  0x1a   : > { %1089 = vmatprep.mubr.bf16.mxu0 %v3030_v6  ;;  %1281 = vmatprep.mubr.bf16.mxu1 %v3033_v8  ;;  %v3040_v26 = vld [vmem:[%s3327_s9 + $0x258] ss:$12 sps:$4 sm:$0xff]   ;;  %v3043_v28 = vld [vmem:[%s3327_s9 + $0x274] ss:$12 sps:$4 sm:$0xff]   ;;  %v3046_v30 = vld [vmem:[%s3327_s9 + $0x270] ss:$12 sps:$4 sm:$0xff]  }
  0x1b   : > { %v3047_v31 = vld [vmem:[%s3327_s9 + $0x4c] ss:$12 sps:$4 sm:$0xff]   ;;  %v3051_v33 = vld [vmem:[%s3327_s9 + $0x48] ss:$12 sps:$4 sm:$0xff]   ;;  %v3053_v35 = vld [vmem:[%s3327_s9 + $0x64] ss:$12 sps:$4 sm:$0xff]  }
  0x1c   : > { %1066 = vmatpush1.bf16.msra.mxu0 %v3016_v5  ;;  %2910 = vmatpush1.bf16.msra.mxu1 %v3016_v5  ;;  %v3049_v32 = vld [vmem:[%s3327_s9 + $0x28c] ss:$12 sps:$4 sm:$0xff]   ;;  %v3052_v34 = vld [vmem:[%s3327_s9 + $0x288] ss:$12 sps:$4 sm:$0xff]   ;;  %v3055_v36 = vld [vmem:[%s3327_s9 + $0x2a4] ss:$12 sps:$4 sm:$0xff]  }
  0x1d   : > { %1067 = vmatprep.subr.bf16.mxu0 %v3246_v1  ;;  %2895 = vmatprep.subr.bf16.mxu1 %v3246_v1  ;;  %v3057_v37 = vld [vmem:[%s3327_s9 + $0x60] ss:$12 sps:$4 sm:$0xff]   ;;  %v3060_v39 = vld [vmem:[%s3327_s9 + $0x7c] ss:$12 sps:$4 sm:$0xff]   ;;  %v3064_v41 = vld [vmem:[%s3327_s9 + $0x78] ss:$12 sps:$4 sm:$0xff]  }
  0x1e   : > { %v3058_v38 = vld [vmem:[%s3327_s9 + $0x2a0] ss:$12 sps:$4 sm:$0xff]   ;;  %v3062_v40 = vld [vmem:[%s3327_s9 + $0x2bc] ss:$12 sps:$4 sm:$0xff]   ;;  %v3065_v42 = vld [vmem:[%s3327_s9 + $0x2b8] ss:$12 sps:$4 sm:$0xff]  }
  0x1f   : > { %v3066_v43 = vld [vmem:[%s3327_s9 + $0x94] ss:$12 sps:$4 sm:$0xff]   ;;  %v3070_v45 = vld [vmem:[%s3327_s9 + $0x90] ss:$12 sps:$4 sm:$0xff]   ;;  %v3072_v47 = vld [vmem:[%s3327_s9 + $0xac] ss:$12 sps:$4 sm:$0xff]  }
  0x20   : > { %1068 = vmatpush1.bf16.msra.mxu0 %v3017_v7  ;;  %2911 = vmatpush1.bf16.msra.mxu1 %v3017_v7  ;;  %v3068_v44 = vld [vmem:[%s3327_s9 + $0x2d4] ss:$12 sps:$4 sm:$0xff]   ;;  %v3071_v46 = vld [vmem:[%s3327_s9 + $0x2d0] ss:$12 sps:$4 sm:$0xff]   ;;  %v3074_v48 = vld [vmem:[%s3327_s9 + $0x2ec] ss:$12 sps:$4 sm:$0xff]  }
  0x21   : > { %1069 = vmatprep.subr.bf16.mxu0 %v3246_v1  ;;  %2896 = vmatprep.subr.bf16.mxu1 %v3246_v1  ;;  %v3076_v49 = vld [vmem:[%s3327_s9 + $0xa8] ss:$12 sps:$4 sm:$0xff]   ;;  %v3078_v51 = vld [vmem:[%s3327_s9 + $0xc4] ss:$12 sps:$4 sm:$0xff]   ;;  %v3081_v53 = vld [vmem:[%s3327_s9 + $0xc0] ss:$12 sps:$4 sm:$0xff]  }
  0x22   : > { %v3077_v50 = vld [vmem:[%s3327_s9 + $0x2e8] ss:$12 sps:$4 sm:$0xff]   ;;  %v3082_v54 = vld [vmem:[%s3327_s9 + $0x20] ss:$12 sps:$4 sm:$0xff]   ;;  %v3085_v56 = vld [vmem:[%s3327_s9 + $0x38] ss:$12 sps:$4 sm:$0xff]  }
  0x23   : > { %v3080_v52 = vld [vmem:[%s3327_s9 + $0x8] ss:$12 sps:$4 sm:$0xff]   ;;  %v3086_v57 = vld [vmem:[%s3327_s9 + $0xd8] ss:$12 sps:$4 sm:$0xff]   ;;  %v3087_v58 = vld [vmem:[%s3327_s9 + $0x50] ss:$12 sps:$4 sm:$0xff]  }
  0x24   : > { %1070 = vmatpush1.bf16.msra.mxu0 %v3018_v9  ;;  %2912 = vmatpush1.bf16.msra.mxu1 %v3018_v9  ;;  %v3083_v55 = vld [vmem:[%s3327_s9 + $0xdc] ss:$12 sps:$4 sm:$0xff]   ;;  %v3088_v59 = vld [vmem:[%s3327_s9 + $0xf4] ss:$12 sps:$4 sm:$0xff]   ;;  %v3093_v63 = vld [vmem:[%s3327_s9 + $0x10c] ss:$12 sps:$4 sm:$0xff]  }
  0x25   : > { %1071 = vmatprep.subr.bf16.mxu0 %v3246_v1  ;;  %2897 = vmatprep.subr.bf16.mxu1 %v3246_v1  ;;  %v3090_v60 = vld [vmem:[%s3327_s9 + $0x68] ss:$12 sps:$4 sm:$0xff]   ;;  %v3091_v61 = vld [vmem:[%s3327_s9 + $0xf0] ss:$12 sps:$4 sm:$0xff]   ;;  %v3092_v62 = vld [vmem:[%s3327_s9 + $0x80] ss:$12 sps:$4 sm:$0xff]  }
  0x26   : > { %v3095_v0 = vld [vmem:[%s3327_s9 + $0x98] ss:$12 sps:$4 sm:$0xff]   ;;  %v3097_v2 = vld [vmem:[%s3327_s9 + $0xb0] ss:$12 sps:$4 sm:$0xff]   ;;  %v3100_v4 = vld [vmem:[%s3327_s9 + $0xc8] ss:$12 sps:$4 sm:$0xff]  }
  0x27   : > { %v3098_v3 = vld [vmem:[%s3327_s9 + $0x124] ss:$12 sps:$4 sm:$0xff]   ;;  %v3101_v5 = vld [vmem:[%s3327_s9 + $0x120] ss:$12 sps:$4 sm:$0xff]   ;;  %v3103_v7 = vld [vmem:[%s3327_s9 + $0x13c] ss:$12 sps:$4 sm:$0xff]  }
  0x28   : > { %1072 = vmatpush1.bf16.msra.mxu0 %v3019_v10  ;;  %2913 = vmatpush1.bf16.msra.mxu1 %v3019_v10  ;;  %v3102_v6 = vld [vmem:[%s3327_s9 + $0xe0] ss:$12 sps:$4 sm:$0xff]   ;;  %v3105_v8 = vld [vmem:[%s3327_s9 + $0xf8] ss:$12 sps:$4 sm:$0xff]   ;;  %v3107_v10 = vld [vmem:[%s3327_s9 + $0x110] ss:$12 sps:$4 sm:$0xff]  }
  0x29   : > { %1073 = vmatprep.subr.bf16.mxu0 %v3246_v1  ;;  %2898 = vmatprep.subr.bf16.mxu1 %v3246_v1  ;;  %v3106_v9 = vld [vmem:[%s3327_s9 + $0x138] ss:$12 sps:$4 sm:$0xff]  }
  0x2c   : > { %1074 = vmatpush1.bf16.msra.mxu0 %v3020_v11  ;;  %2914 = vmatpush1.bf16.msra.mxu1 %v3020_v11  ;;  %v3108_v11 = vld [vmem:[%s3327_s9 + $0x154] ss:$12 sps:$4 sm:$0xff]  }
  0x2d   : > { %1075 = vmatprep.subr.bf16.mxu0 %v3246_v1  ;;  %2899 = vmatprep.subr.bf16.mxu1 %v3246_v1 }
  0x30   : > { %1076 = vmatpush1.bf16.msra.mxu0 %v3021_v12  ;;  %2915 = vmatpush1.bf16.msra.mxu1 %v3021_v12  ;;  %v3110_v12 = vld [vmem:[%s3327_s9 + $0x128] ss:$12 sps:$4 sm:$0xff]  }
  0x31   : > { %1077 = vmatprep.subr.bf16.mxu0 %v3246_v1  ;;  %2900 = vmatprep.subr.bf16.mxu1 %v3246_v1 }
  0x34   : > { %1078 = vmatpush1.bf16.msra.mxu0 %v3022_v13  ;;  %2916 = vmatpush1.bf16.msra.mxu1 %v3022_v13  ;;  %v3111_v13 = vld [vmem:[%s3327_s9 + $0x150] ss:$12 sps:$4 sm:$0xff]  }
  0x35   : > { %1079 = vmatprep.subr.bf16.mxu0 %v3246_v1  ;;  %2901 = vmatprep.subr.bf16.mxu1 %v3246_v1 }
  0x38   : > { %1080 = vmatpush1.bf16.msra.mxu0 %v3023_v14  ;;  %2917 = vmatpush1.bf16.msra.mxu1 %v3023_v14  ;;  %v3112_v14 = vld [vmem:[%s3327_s9 + $0x140] ss:$12 sps:$4 sm:$0xff]  }
  0x39   : > { %1081 = vmatprep.subr.bf16.mxu0 %v3246_v1  ;;  %2902 = vmatprep.subr.bf16.mxu1 %v3246_v1 }
  0x3c   : > { %1082 = vmatpush1.bf16.msra.mxu0 %v3024_v15  ;;  %2918 = vmatpush1.bf16.msra.mxu1 %v3024_v15  ;;  %v3113_v15 = vld [vmem:[%s3327_s9 + $0x16c] ss:$12 sps:$4 sm:$0xff]  }
  0x3d   : > { %1083 = vmatprep.subr.bf16.mxu0 %v3246_v1  ;;  %2903 = vmatprep.subr.bf16.mxu1 %v3246_v1 }
  0x40   : > { %1084 = vmatpush1.bf16.msra.mxu0 %v3025_v16  ;;  %2919 = vmatpush1.bf16.msra.mxu1 %v3025_v16  ;;  %v3115_v16 = vld [vmem:[%s3327_s9 + $0x158] ss:$12 sps:$4 sm:$0xff]  }
  0x41   : > { %1085 = vmatprep.subr.bf16.mxu0 %v3246_v1  ;;  %2904 = vmatprep.subr.bf16.mxu1 %v3246_v1 }
  0x44   : > { %1086 = vmatpush1.bf16.msra.mxu0 %v3026_v17  ;;  %2920 = vmatpush1.bf16.msra.mxu1 %v3026_v17  ;;  %v3116_v17 = vld [vmem:[%s3327_s9 + $0x168] ss:$12 sps:$4 sm:$0xff]  }
  0x45   : > { %1087 = vmatprep.subr.bf16.mxu0 %v3246_v1  ;;  %2905 = vmatprep.subr.bf16.mxu1 %v3246_v1  ;;  %v3096_v1 = vld [vmem:[%s3327_s9 + $0x108] ss:$12 sps:$4 sm:$0xff]  }
  0x48   : > { %1088 = vmatpush1.bf16.msra.mxu0 %v3027_v18  ;;  %2921 = vmatpush1.bf16.msra.mxu1 %v3027_v18  ;;  %v3117_v18 = vld [vmem:[%s3327_s9 + $0x170] ss:$12 sps:$4 sm:$0xff]  }
  0x49   : > { %2822 = vmatprep.subr.bf16.mxu1 %v3034_v19 }
  0x4b   : > { %1090 = vmatmul.mubr.bf16.vlgmr.msra.gmra.mrb[0].mxu0 %v3028_v20  ;;  %1282 = vmatmul.mubr.bf16.vlgmr.msra.gmra.mrb[0].mxu1 %v3031_v21  ;;  %v3120_v20 = vld [vmem:[%s3327_s9 + $0x188] ss:$12 sps:$4 sm:$0xff]   ;;  %v3121_v21 = vld [vmem:[%s3327_s9 + $0x180] ss:$12 sps:$4 sm:$0xff]  }
  0x4c   : > { %2823 = vmatpush3.bf16.msra.mxu1 %v3034_v19  ;;  %1097 = vmatprep.mubr.bf16.mxu0 %v3035_v22  ;;  %v3118_v19 = vld [vmem:[%s3327_s9 + $0x184] ss:$12 sps:$4 sm:$0xff]   ;;  %v3122_v22 = vld [vmem:[%s3327_s9 + $0x1a0] ss:$12 sps:$4 sm:$0xff]  }
  0x4d   : > { %1289 = vmatprep.mubr.bf16.mxu1 %v3037_v23  ;;  %2824 = vmatprep.subr.bf16.mxu1 %v3059_v24  ;;  %v3123_v23 = vld [vmem:[%s3327_s9 + $0x19c] ss:$12 sps:$4 sm:$0xff]  }
  0x50   : > { %2825 = vmatpush3.bf16.msra.mxu1 %v3059_v24  ;;  %v3125_v24 = vld [vmem:[%s3327_s9 + $0x1b8] ss:$12 sps:$4 sm:$0xff]  }
  0x53   : > { %1098 = vmatmul.mubr.bf16.gmra.mrb[4].mxu0 %v3039_v25  ;;  %1290 = vmatmul.mubr.bf16.gmra.mrb[4].mxu1 %v3040_v26  ;;  %v3126_v25 = vld [vmem:[%s3327_s9 + $0x198] ss:$12 sps:$4 sm:$0xff]   ;;  %v3127_v26 = vld [vmem:[%s3327_s9 + $0x1d0] ss:$12 sps:$4 sm:$0xff]  }
  0x54   : > { %1105 = vmatprep.mubr.bf16.mxu0 %v3041_v27  ;;  %1297 = vmatprep.mubr.bf16.mxu1 %v3043_v28  ;;  %v3128_v27 = vld [vmem:[%s3327_s9 + $0x1b4] ss:$12 sps:$4 sm:$0xff]  }
  0x55   : > { %v3130_v28 = vld [vmem:[%s3327_s9 + $0x1e8] ss:$12 sps:$4 sm:$0xff]  }
  0x5b   : > { %1106 = vmatmul.mubr.bf16.gmra.mrb[8].mxu0 %v3045_v29  ;;  %1298 = vmatmul.mubr.bf16.gmra.mrb[8].mxu1 %v3046_v30  ;;  %v3131_v29 = vld [vmem:[%s3327_s9 + $0x1b0] ss:$12 sps:$4 sm:$0xff]   ;;  %v3132_v30 = vld [vmem:[%s3327_s9 + $0x200] ss:$12 sps:$4 sm:$0xff]  }
  0x5c   : > { %1113 = vmatprep.mubr.bf16.mxu0 %v3047_v31  ;;  %1305 = vmatprep.mubr.bf16.mxu1 %v3049_v32  ;;  %v3133_v31 = vld [vmem:[%s3327_s9 + $0x1cc] ss:$12 sps:$4 sm:$0xff]  }
  0x5d   : > { %v3135_v32 = vld [vmem:[%s3327_s9 + $0x218] ss:$12 sps:$4 sm:$0xff]  }
  0x63   : > { %1114 = vmatmul.mubr.bf16.gmra.mrb[12].mxu0 %v3051_v33  ;;  %1306 = vmatmul.mubr.bf16.gmra.mrb[12].mxu1 %v3052_v34  ;;  %v3136_v33 = vld [vmem:[%s3327_s9 + $0x1c8] ss:$12 sps:$4 sm:$0xff]   ;;  %v3137_v34 = vld [vmem:[%s3327_s9 + $0x230] ss:$12 sps:$4 sm:$0xff]  }
  0x64   : > { %1121 = vmatprep.mubr.bf16.mxu0 %v3053_v35  ;;  %1313 = vmatprep.mubr.bf16.mxu1 %v3055_v36  ;;  %v3138_v35 = vld [vmem:[%s3327_s9 + $0x1e4] ss:$12 sps:$4 sm:$0xff]   ;;  %v3140_v36 = vld [vmem:[%s3327_s9 + $0x248] ss:$12 sps:$4 sm:$0xff]  }
  0x6b   : > { %1122 = vmatmul.mubr.bf16.gmra.mrb[16].mxu0 %v3057_v37  ;;  %1314 = vmatmul.mubr.bf16.gmra.mrb[16].mxu1 %v3058_v38  ;;  %v3141_v37 = vld [vmem:[%s3327_s9 + $0x1e0] ss:$12 sps:$4 sm:$0xff]  }
  0x6c   : > { %1129 = vmatprep.mubr.bf16.mxu0 %v3060_v39  ;;  %1321 = vmatprep.mubr.bf16.mxu1 %v3062_v40  ;;  %v3142_v38 = vld [vmem:[%s3327_s9 + $0x260] ss:$12 sps:$4 sm:$0xff]   ;;  %v3143_v39 = vld [vmem:[%s3327_s9 + $0x1fc] ss:$12 sps:$4 sm:$0xff]   ;;  %v3145_v40 = vld [vmem:[%s3327_s9 + $0x278] ss:$12 sps:$4 sm:$0xff]  }
  0x73   : > { %1130 = vmatmul.mubr.bf16.gmra.mrb[20].mxu0 %v3064_v41  ;;  %1322 = vmatmul.mubr.bf16.gmra.mrb[20].mxu1 %v3065_v42  ;;  %v3146_v41 = vld [vmem:[%s3327_s9 + $0x1f8] ss:$12 sps:$4 sm:$0xff]   ;;  %v3147_v42 = vld [vmem:[%s3327_s9 + $0x290] ss:$12 sps:$4 sm:$0xff]  }
  0x74   : > { %1137 = vmatprep.mubr.bf16.mxu0 %v3066_v43  ;;  %1329 = vmatprep.mubr.bf16.mxu1 %v3068_v44  ;;  %v3148_v43 = vld [vmem:[%s3327_s9 + $0x214] ss:$12 sps:$4 sm:$0xff]  }
  0x75   : > { %v3150_v44 = vld [vmem:[%s3327_s9 + $0x2a8] ss:$12 sps:$4 sm:$0xff]  }
  0x7b   : > { %1138 = vmatmul.mubr.bf16.gmra.mrb[24].mxu0 %v3070_v45  ;;  %1330 = vmatmul.mubr.bf16.gmra.mrb[24].mxu1 %v3071_v46  ;;  %v3151_v45 = vld [vmem:[%s3327_s9 + $0x210] ss:$12 sps:$4 sm:$0xff]   ;;  %v3152_v46 = vld [vmem:[%s3327_s9 + $0x2c0] ss:$12 sps:$4 sm:$0xff]  }
  0x7c   : > { %1145 = vmatprep.mubr.bf16.mxu0 %v3072_v47  ;;  %1337 = vmatprep.mubr.bf16.mxu1 %v3074_v48  ;;  %v3153_v47 = vld [vmem:[%s3327_s9 + $0x22c] ss:$12 sps:$4 sm:$0xff]  }
  0x7d   : > { %v3155_v48 = vld [vmem:[%s3327_s9 + $0x2d8] ss:$12 sps:$4 sm:$0xff]  }
  0x83   : > { %1146 = vmatmul.mubr.bf16.gmra.mrb[28].mxu0 %v3076_v49  ;;  %1338 = vmatmul.mubr.bf16.gmra.mrb[28].mxu1 %v3077_v50  ;;  %v3156_v49 = vld [vmem:[%s3327_s9 + $0x228] ss:$12 sps:$4 sm:$0xff]   ;;  %v3157_v50 = vld [vmem:[%s3327_s9 + $0x2f0] ss:$12 sps:$4 sm:$0xff]  }
  0x84   : > { %1153 = vmatprep.mubr.bf16.mxu0 %v3078_v51  ;;  %2826 = vmatprep.mubr.msk.bf16.mxu1 %vm960_vm0, %v3080_v52 }
  0x8b   : > { %1154 = vmatmul.mubr.bf16.gmra.mrb[32].mxu0 %v3081_v53  ;;  %2827 = vmatmul.mubr.msk.bf16.vlgmr.msra.gmra.mrb[32].mxu1 %vm960_vm0, %v3082_v54 }
  0x8c   : > { %1161 = vmatprep.mubr.bf16.mxu0 %v3083_v55  ;;  %2830 = vmatprep.mubr.msk.bf16.mxu1 %vm960_vm0, %v3085_v56 }
  0x93   : > { %1162 = vmatmul.mubr.bf16.gmra.mrb[36].mxu0 %v3086_v57  ;;  %2831 = vmatmul.mubr.msk.bf16.gmra.mrb[36].mxu1 %vm960_vm0, %v3087_v58 }
  0x94   : > { %1169 = vmatprep.mubr.bf16.mxu0 %v3088_v59  ;;  %2834 = vmatprep.mubr.msk.bf16.mxu1 %vm960_vm0, %v3090_v60 }
  0x9b   : > { %1170 = vmatmul.mubr.bf16.gmra.mrb[40].mxu0 %v3091_v61  ;;  %2835 = vmatmul.mubr.msk.bf16.gmra.mrb[40].mxu1 %vm960_vm0, %v3092_v62 }
  0x9c   : > { %1177 = vmatprep.mubr.bf16.mxu0 %v3093_v63  ;;  %2838 = vmatprep.mubr.msk.bf16.mxu1 %vm960_vm0, %v3095_v0 }
  0xa3   : > { %1178 = vmatmul.mubr.bf16.gmra.mrb[44].mxu0 %v3096_v1  ;;  %2839 = vmatmul.mubr.msk.bf16.gmra.mrb[44].mxu1 %vm960_vm0, %v3097_v2 }
  0xa4   : > { %1185 = vmatprep.mubr.bf16.mxu0 %v3098_v3  ;;  %2842 = vmatprep.mubr.msk.bf16.mxu1 %vm960_vm0, %v3100_v4 }
  0xab   : > { %1186 = vmatmul.mubr.bf16.gmra.mrb[48].mxu0 %v3101_v5  ;;  %2843 = vmatmul.mubr.msk.bf16.gmra.mrb[48].mxu1 %vm960_vm0, %v3102_v6 }
  0xac   : > { %1193 = vmatprep.mubr.bf16.mxu0 %v3103_v7  ;;  %2846 = vmatprep.mubr.msk.bf16.mxu1 %vm960_vm0, %v3105_v8 }
  0xb3   : > { %1194 = vmatmul.mubr.bf16.gmra.mrb[52].mxu0 %v3106_v9  ;;  %2847 = vmatmul.mubr.msk.bf16.gmra.mrb[52].mxu1 %vm960_vm0, %v3107_v10 }
  0xb4   : > { %1201 = vmatprep.mubr.bf16.mxu0 %v3108_v11  ;;  %2850 = vmatprep.mubr.msk.bf16.mxu1 %vm960_vm0, %v3110_v12 }
  0xbb   : > { %1202 = vmatmul.mubr.bf16.gmra.mrb[56].mxu0 %v3111_v13  ;;  %2851 = vmatmul.mubr.msk.bf16.gmra.mrb[56].mxu1 %vm960_vm0, %v3112_v14 }
  0xbc   : > { %1209 = vmatprep.mubr.bf16.mxu0 %v3113_v15  ;;  %2854 = vmatprep.mubr.msk.bf16.mxu1 %vm960_vm0, %v3115_v16 }
  0xc3   : > { %1210 = vmatmul.mubr.bf16.gmra.mrb[60].mxu0 %v3116_v17  ;;  %2855 = vmatmul.mubr.msk.bf16.gmra.mrb[60].mxu1 %vm960_vm0, %v3117_v18 }
  0xc4   : > { %1217 = vmatprep.mubr.bf16.mxu0 %v3118_v19  ;;  %2858 = vmatprep.mubr.msk.bf16.mxu1 %vm960_vm0, %v3120_v20 }
  0xcb   : > { %1218 = vmatmul.mubr.bf16.gmra.mrb[64].mxu0 %v3121_v21  ;;  %2859 = vmatmul.mubr.msk.bf16.gmra.mrb[64].mxu1 %vm960_vm0, %v3122_v22 }
  0xcc   : > { %1225 = vmatprep.mubr.bf16.mxu0 %v3123_v23  ;;  %2862 = vmatprep.mubr.msk.bf16.mxu1 %vm960_vm0, %v3125_v24 }
  0xd3   : > { %1226 = vmatmul.mubr.bf16.gmra.mrb[68].mxu0 %v3126_v25  ;;  %2863 = vmatmul.mubr.msk.bf16.gmra.mrb[68].mxu1 %vm960_vm0, %v3127_v26 }
  0xd4   : > { %1233 = vmatprep.mubr.bf16.mxu0 %v3128_v27  ;;  %2866 = vmatprep.mubr.msk.bf16.mxu1 %vm960_vm0, %v3130_v28 }
  0xdb   : > { %1234 = vmatmul.mubr.bf16.gmra.mrb[72].mxu0 %v3131_v29  ;;  %2867 = vmatmul.mubr.msk.bf16.gmra.mrb[72].mxu1 %vm960_vm0, %v3132_v30 }
  0xdc   : > { %1241 = vmatprep.mubr.bf16.mxu0 %v3133_v31  ;;  %2870 = vmatprep.mubr.msk.bf16.mxu1 %vm960_vm0, %v3135_v32 }
  0xe3   : > { %1242 = vmatmul.mubr.bf16.gmra.mrb[76].mxu0 %v3136_v33  ;;  %2871 = vmatmul.mubr.msk.bf16.gmra.mrb[76].mxu1 %vm960_vm0, %v3137_v34 }
  0xe4   : > { %1249 = vmatprep.mubr.bf16.mxu0 %v3138_v35  ;;  %2874 = vmatprep.mubr.msk.bf16.mxu1 %vm960_vm0, %v3140_v36 }
  0xeb   : > { %1250 = vmatmul.mubr.bf16.gmra.mrb[80].mxu0 %v3141_v37  ;;  %2875 = vmatmul.mubr.msk.bf16.gmra.mrb[80].mxu1 %vm960_vm0, %v3142_v38 }
  0xec   : > { %1257 = vmatprep.mubr.bf16.mxu0 %v3143_v39  ;;  %2878 = vmatprep.mubr.msk.bf16.mxu1 %vm960_vm0, %v3145_v40 }
  0xf3   : > { %1258 = vmatmul.mubr.bf16.gmra.mrb[84].mxu0 %v3146_v41  ;;  %2879 = vmatmul.mubr.msk.bf16.gmra.mrb[84].mxu1 %vm960_vm0, %v3147_v42 }
  0xf4   : > { %1265 = vmatprep.mubr.bf16.mxu0 %v3148_v43  ;;  %2882 = vmatprep.mubr.msk.bf16.mxu1 %vm960_vm0, %v3150_v44 }
  0xfb   : > { %1266 = vmatmul.mubr.bf16.gmra.mrb[88].mxu0 %v3151_v45  ;;  %2883 = vmatmul.mubr.msk.bf16.gmra.mrb[88].mxu1 %vm960_vm0, %v3152_v46 }
  0xfc   : > { %1273 = vmatprep.mubr.bf16.mxu0 %v3153_v47  ;;  %2886 = vmatprep.mubr.msk.bf16.mxu1 %vm960_vm0, %v3155_v48 }
 0x103   : > { %1274 = vmatmul.mubr.bf16.gmra.mrb[92].mxu0 %v3156_v49  ;;  %2887 = vmatmul.mubr.msk.bf16.gmra.mrb[92].mxu1 %vm960_vm0, %v3157_v50 }
 0x11e   : > { %v3520_v51 = vpop.f32.mrb[0].mxu0  ;;  %v3522_v52 = vpop.f32.mrb[0].mxu1 }
 0x11f   : > { %v1093_v53 = vpop.f32.mrb[1].mxu0  ;;  %v1285_v54 = vpop.f32.mrb[1].mxu1 }
 0x120   : > { %v3524_v55 = vpop.f32.mrb[2].mxu0  ;;  %v3526_v56 = vpop.f32.mrb[2].mxu1  ;;  %v3583_v53 = vld [vmem:[%s4047_s2] ss:$0 sm:$0xff] }
 0x121   : > { %v1096_v57 = vpop.f32.mrb[3].mxu0  ;;  %v1288_v58 = vpop.f32.mrb[3].mxu1 }
 0x122   : > { %v1092_v57 = vadd.f32 %v3583_v53, %v3520_v51 }
 0x126   : > { %v1099_v59 = vpop.f32.mrb[4].mxu0  ;;  %v3528_v60 = vpop.f32.mrb[4].mxu1 }
 0x127   : > { %v1101_v61 = vpop.f32.mrb[5].mxu0  ;;  %v1293_v62 = vpop.f32.mrb[5].mxu1  ;;  %v1100_v54 = vadd.f32 %v3583_v53, %v1099_v59 }
 0x128   : > { %v1102_v63 = vpop.f32.mrb[6].mxu0  ;;  %v3530_v0 = vpop.f32.mrb[6].mxu1 }
 0x129   : > { %v1104_v1 = vpop.f32.mrb[7].mxu0  ;;  %v1296_v2 = vpop.f32.mrb[7].mxu1  ;;  %v1103_v62 = vadd.f32 %v3583_v53, %v1102_v63 }
 0x12e   : > { %v3532_v3 = vpop.f32.mrb[8].mxu0  ;;  %v3534_v4 = vpop.f32.mrb[8].mxu1 }
 0x12f   : > { %v1109_v5 = vpop.f32.mrb[9].mxu0  ;;  %v1301_v6 = vpop.f32.mrb[9].mxu1 }
 0x130   : > { %v3536_v7 = vpop.f32.mrb[10].mxu0  ;;  %v3538_v8 = vpop.f32.mrb[10].mxu1  ;;  %v1095_v6 = vadd.f32 %v3583_v53, %v3524_v55 }
 0x131   : > { %v1112_v9 = vpop.f32.mrb[11].mxu0  ;;  %v1304_v10 = vpop.f32.mrb[11].mxu1 }
 0x136   : > { %v3540_v11 = vpop.f32.mrb[12].mxu0  ;;  %v3542_v12 = vpop.f32.mrb[12].mxu1 }
 0x137   : > { %v1117_v13 = vpop.f32.mrb[13].mxu0  ;;  %v1309_v14 = vpop.f32.mrb[13].mxu1 }
 0x138   : > { %v3544_v15 = vpop.f32.mrb[14].mxu0  ;;  %v3546_v16 = vpop.f32.mrb[14].mxu1 }
 0x139   : > { %v1120_v17 = vpop.f32.mrb[15].mxu0  ;;  %v1312_v18 = vpop.f32.mrb[15].mxu1 }
 0x13e   : > { %v3548_v19 = vpop.f32.mrb[16].mxu0  ;;  %v3550_v20 = vpop.f32.mrb[16].mxu1 }
 0x13f   : > { %v1125_v21 = vpop.f32.mrb[17].mxu0  ;;  %v1317_v22 = vpop.f32.mrb[17].mxu1 }
 0x140   : > { %v3552_v23 = vpop.f32.mrb[18].mxu0  ;;  %v3554_v24 = vpop.f32.mrb[18].mxu1 }
 0x141   : > { %v1128_v25 = vpop.f32.mrb[19].mxu0  ;;  %v1320_v26 = vpop.f32.mrb[19].mxu1 }
 0x146   : > { %v3556_v27 = vpop.f32.mrb[20].mxu0  ;;  %v3558_v28 = vpop.f32.mrb[20].mxu1 }
 0x147   : > { %v1133_v29 = vpop.f32.mrb[21].mxu0  ;;  %v1325_v30 = vpop.f32.mrb[21].mxu1 }
 0x148   : > { %v3560_v31 = vpop.f32.mrb[22].mxu0  ;;  %v3562_v32 = vpop.f32.mrb[22].mxu1  ;;  %v1116_v29 = vadd.f32 %v3583_v53, %v3540_v11  ;;  %v1108_v30 = vadd.f32 %v3583_v53, %v3532_v3  ;;  %v1119_v11 = vadd.f32 %v3583_v53, %v3544_v15 }
 0x149   : > { %v1136_v33 = vpop.f32.mrb[23].mxu0  ;;  %v1328_v34 = vpop.f32.mrb[23].mxu1 }
 0x14e   : > { %v3564_v35 = vpop.f32.mrb[24].mxu0  ;;  %v3566_v36 = vpop.f32.mrb[24].mxu1 }
 0x14f   : > { %v1141_v37 = vpop.f32.mrb[25].mxu0  ;;  %v1333_v38 = vpop.f32.mrb[25].mxu1 }
 0x150   : > { %v3568_v39 = vpop.f32.mrb[26].mxu0  ;;  %v3570_v40 = vpop.f32.mrb[26].mxu1 }
 0x151   : > { %v1144_v41 = vpop.f32.mrb[27].mxu0  ;;  %v1336_v42 = vpop.f32.mrb[27].mxu1 }
 0x156   : > { %v3572_v43 = vpop.f32.mrb[28].mxu0  ;;  %v3574_v44 = vpop.f32.mrb[28].mxu1 }
 0x157   : > { %v1149_v45 = vpop.f32.mrb[29].mxu0  ;;  %v1341_v46 = vpop.f32.mrb[29].mxu1 }
 0x158   : > { %v3576_v47 = vpop.f32.mrb[30].mxu0  ;;  %v3578_v48 = vpop.f32.mrb[30].mxu1  ;;  %v1111_v45 = vadd.f32 %v3583_v53, %v3536_v7 }
 0x159   : > { %v1152_v49 = vpop.f32.mrb[31].mxu0  ;;  %v1344_v50 = vpop.f32.mrb[31].mxu1 }
 0x15e   : > { %v3589_v58 = vpop.f32.mrb[32].mxu0  ;;  %v2828_v61 = vpop.f32.mrb[32].mxu1 }
 0x15f   : > { %v1389_v1 = vadd.f32 %v2828_v61, %v1100_v54  ;;  %v1157_v2 = vpop.f32.mrb[33].mxu0  ;;  %v1380_v5 = vpop.f32.mrb[33].mxu1 }
 0x160   : > { %v1381_v9 = vadd.f32 %v1380_v5, %v1092_v57  ;;  %v3594_v10 = vpop.f32.mrb[34].mxu0  ;;  %v2829_v13 = vpop.f32.mrb[34].mxu1 }
 0x161   : > { %v1637_v59 = vmax.f32 %v1389_v1, 0.0  ;;  %v1392_v14 = vadd.f32 %v2829_v13, %v1103_v62  ;;  %v1160_v17 = vpop.f32.mrb[35].mxu0  ;;  %v1383_v51 = vpop.f32.mrb[35].mxu1  ;;  %v1124_v13 = vadd.f32 %v3583_v53, %v3548_v19 }
 0x162   : > { %v1635_v18 = vmax.f32 %v1381_v9, 0.0  ;;  %v1384_v21 = vadd.f32 %v1383_v51, %v1095_v6  ;;  %v1132_v6 = vadd.f32 %v3583_v53, %v3556_v27  ;;  %v1135_v51 = vadd.f32 %v3583_v53, %v3560_v31 }
 0x163   : > { %v2723_v22 = vpack.c.bf16 %v1637_v59, %v1637_v59  ;;  %v1638_v63 = vmax.f32 %v1392_v14, 0.0 }
 0x164   : > { %v2721_v25 = vpack.c.bf16 %v1635_v18, %v1635_v18  ;;  %v1636_v26 = vmax.f32 %v1384_v21, 0.0 }
 0x165   : > { %1958 = vst.msk [vmem:[%s3598_s12 + $0x8] sm:$0xf] %vm1955_vm1, %v2723_v22  ;;  %v2724_v55 = vpack.c.bf16 %v1638_v63, %v1638_v63  ;;  %v1127_v22 = vadd.f32 %v3583_v53, %v3552_v23 }
 0x166   : > { %1956 = vst.msk [vmem:[%s3598_s12] sm:$0xf] %vm1955_vm1, %v2721_v25  ;;  %v2722_v33 = vpack.c.bf16 %v1636_v26, %v1636_v26  ;;  %v3606_v34 = vpop.f32.mrb[36].mxu0  ;;  %v2832_v37 = vpop.f32.mrb[36].mxu1 }
 0x167   : > { %1959 = vst.msk [vmem:[%s3598_s12 + $0xc] sm:$0xf] %vm1955_vm1, %v2724_v55  ;;  %v1405_v38 = vadd.f32 %v2832_v37, %v1116_v29  ;;  %v1165_v41 = vpop.f32.mrb[37].mxu0  ;;  %v1396_v42 = vpop.f32.mrb[37].mxu1 }
 0x168   : > { %1957 = vst.msk [vmem:[%s3598_s12 + $0x4] sm:$0xf] %vm1955_vm1, %v2722_v33  ;;  %v1397_v3 = vadd.f32 %v1396_v42, %v1108_v30  ;;  %v3616_v46 = vpop.f32.mrb[38].mxu0  ;;  %v2833_v49 = vpop.f32.mrb[38].mxu1  ;;  %v1148_v41 = vadd.f32 %v3583_v53, %v3572_v43  ;;  %v1143_v43 = vadd.f32 %v3583_v53, %v3568_v39  ;;  %v1164_v39 = vadd.f32 %v3583_v53, %v3606_v34 }
 0x169   : > { %v1641_v50 = vmax.f32 %v1405_v38, 0.0  ;;  %v1408_v54 = vadd.f32 %v2833_v49, %v1119_v11  ;;  %v1168_v57 = vpop.f32.mrb[39].mxu0  ;;  %v1399_v15 = vpop.f32.mrb[39].mxu1  ;;  %v1159_v34 = vadd.f32 %v3583_v53, %v3594_v10 }
 0x16a   : > { %v1639_v61 = vmax.f32 %v1397_v3, 0.0  ;;  %v1400_v62 = vadd.f32 %v1399_v15, %v1111_v45  ;;  %v1140_v45 = vadd.f32 %v3583_v53, %v3564_v35 }
 0x16b   : > { %v2727_v1 = vpack.c.bf16 %v1641_v50, %v1641_v50  ;;  %v1642_v2 = vmax.f32 %v1408_v54, 0.0  ;;  %v1151_v54 = vadd.f32 %v3583_v53, %v3576_v47 }
 0x16c   : > { %v2725_v5 = vpack.c.bf16 %v1639_v61, %v1639_v61  ;;  %v1640_v7 = vmax.f32 %v1400_v62, 0.0 }
 0x16d   : > { %1962 = vst.msk [vmem:[%s3598_s12 + $0x18] sm:$0xf] %vm1955_vm1, %v2727_v1  ;;  %v2728_v9 = vpack.c.bf16 %v1642_v2, %v1642_v2 }
 0x16e   : > { %1960 = vst.msk [vmem:[%s3598_s12 + $0x10] sm:$0xf] %vm1955_vm1, %v2725_v5  ;;  %v2726_v59 = vpack.c.bf16 %v1640_v7, %v1640_v7  ;;  %v3626_v14 = vpop.f32.mrb[40].mxu0  ;;  %v2836_v17 = vpop.f32.mrb[40].mxu1 }
 0x16f   : > { %1963 = vst.msk [vmem:[%s3598_s12 + $0x1c] sm:$0xf] %vm1955_vm1, %v2728_v9  ;;  %v1421_v18 = vadd.f32 %v2836_v17, %v1132_v6  ;;  %v1173_v21 = vpop.f32.mrb[41].mxu0  ;;  %v1412_v27 = vpop.f32.mrb[41].mxu1 }
 0x170   : > { %1961 = vst.msk [vmem:[%s3598_s12 + $0x14] sm:$0xf] %vm1955_vm1, %v2726_v59  ;;  %v1413_v19 = vadd.f32 %v1412_v27, %v1124_v13  ;;  %v3636_v63 = vpop.f32.mrb[42].mxu0  ;;  %v2837_v25 = vpop.f32.mrb[42].mxu1  ;;  %v1156_v21 = vadd.f32 %v3583_v53, %v3589_v58 }
 0x171   : > { %v1645_v26 = vmax.f32 %v1421_v18, 0.0  ;;  %v1424_v29 = vadd.f32 %v2837_v25, %v1135_v51  ;;  %v1176_v55 = vpop.f32.mrb[43].mxu0  ;;  %v1415_v31 = vpop.f32.mrb[43].mxu1  ;;  %v1167_v25 = vadd.f32 %v3583_v53, %v3616_v46 }
 0x172   : > { %v1643_v30 = vmax.f32 %v1413_v19, 0.0  ;;  %v1416_v33 = vadd.f32 %v1415_v31, %v1127_v22 }
 0x173   : > { %v2731_v37 = vpack.c.bf16 %v1645_v26, %v1645_v26  ;;  %v1646_v11 = vmax.f32 %v1424_v29, 0.0 }
 0x174   : > { %v2729_v38 = vpack.c.bf16 %v1643_v30, %v1643_v30  ;;  %v1644_v23 = vmax.f32 %v1416_v33, 0.0 }
 0x175   : > { %1966 = vst.msk [vmem:[%s3598_s12 + $0x28] sm:$0xf] %vm1955_vm1, %v2731_v37  ;;  %v2732_v42 = vpack.c.bf16 %v1646_v11, %v1646_v11 }
 0x176   : > { %1964 = vst.msk [vmem:[%s3598_s12 + $0x20] sm:$0xf] %vm1955_vm1, %v2729_v38  ;;  %v2730_v3 = vpack.c.bf16 %v1644_v23, %v1644_v23  ;;  %v1179_v49 = vpop.f32.mrb[44].mxu0  ;;  %v2840_v50 = vpop.f32.mrb[44].mxu1 }
 0x177   : > { %1967 = vst.msk [vmem:[%s3598_s12 + $0x2c] sm:$0xf] %vm1955_vm1, %v2732_v42  ;;  %v1437_v57 = vadd.f32 %v2840_v50, %v1148_v41  ;;  %v1181_v15 = vpop.f32.mrb[45].mxu0  ;;  %v1428_v61 = vpop.f32.mrb[45].mxu1  ;;  %v1180_v10 = vadd.f32 %v3583_v53, %v1179_v49  ;;  %v1175_v49 = vadd.f32 %v3583_v53, %v3636_v63 }
 0x178   : > { %1965 = vst.msk [vmem:[%s3598_s12 + $0x24] sm:$0xf] %vm1955_vm1, %v2730_v3  ;;  %v1429_v35 = vadd.f32 %v1428_v61, %v1140_v45  ;;  %v1182_v62 = vpop.f32.mrb[46].mxu0  ;;  %v2841_v1 = vpop.f32.mrb[46].mxu1 }
 0x179   : > { %v1649_v2 = vmax.f32 %v1437_v57, 0.0  ;;  %v1440_v5 = vadd.f32 %v2841_v1, %v1151_v54  ;;  %v1184_v7 = vpop.f32.mrb[47].mxu0  ;;  %v1431_v6 = vpop.f32.mrb[47].mxu1  ;;  %v1172_v54 = vadd.f32 %v3583_v53, %v3626_v14 }
 0x17a   : > { %v1647_v47 = vmax.f32 %v1429_v35, 0.0  ;;  %v1432_v9 = vadd.f32 %v1431_v6, %v1143_v43  ;;  %v1183_v43 = vadd.f32 %v3583_v53, %v1182_v62 }
 0x17b   : > { %v2735_v13 = vpack.c.bf16 %v1649_v2, %v1649_v2  ;;  %v1650_v59 = vmax.f32 %v1440_v5, 0.0 }
 0x17c   : > { %v2733_v17 = vpack.c.bf16 %v1647_v47, %v1647_v47  ;;  %v1648_v51 = vmax.f32 %v1432_v9, 0.0 }
 0x17d   : > { %1970 = vst.msk [vmem:[%s3598_s12 + $0x38] sm:$0xf] %vm1955_vm1, %v2735_v13  ;;  %v2736_v18 = vpack.c.bf16 %v1650_v59, %v1650_v59 }
 0x17e   : > { %1968 = vst.msk [vmem:[%s3598_s12 + $0x30] sm:$0xf] %vm1955_vm1, %v2733_v17  ;;  %v2734_v27 = vpack.c.bf16 %v1648_v51, %v1648_v51  ;;  %v1187_v22 = vpop.f32.mrb[48].mxu0  ;;  %v2844_v19 = vpop.f32.mrb[48].mxu1 }
 0x17f   : > { %1971 = vst.msk [vmem:[%s3598_s12 + $0x3c] sm:$0xf] %vm1955_vm1, %v2736_v18  ;;  %v1453_v26 = vadd.f32 %v2844_v19, %v1164_v39  ;;  %v1189_v29 = vpop.f32.mrb[49].mxu0  ;;  %v1444_v55 = vpop.f32.mrb[49].mxu1 }
 0x180   : > { %1969 = vst.msk [vmem:[%s3598_s12 + $0x34] sm:$0xf] %vm1955_vm1, %v2734_v27  ;;  %v1445_v58 = vadd.f32 %v1444_v55, %v1156_v21  ;;  %v1190_v31 = vpop.f32.mrb[50].mxu0  ;;  %v2845_v30 = vpop.f32.mrb[50].mxu1  ;;  %v1188_v27 = vadd.f32 %v3583_v53, %v1187_v22 }
 0x181   : > { %v1653_v33 = vmax.f32 %v1453_v26, 0.0  ;;  %v1456_v37 = vadd.f32 %v2845_v30, %v1167_v25  ;;  %v1192_v11 = vpop.f32.mrb[51].mxu0  ;;  %v1447_v38 = vpop.f32.mrb[51].mxu1  ;;  %v1191_v30 = vadd.f32 %v3583_v53, %v1190_v31 }
 0x182   : > { %v1651_v46 = vmax.f32 %v1445_v58, 0.0  ;;  %v1448_v23 = vadd.f32 %v1447_v38, %v1159_v34 }
 0x183   : > { %v2739_v41 = vpack.c.bf16 %v1653_v33, %v1653_v33  ;;  %v1654_v42 = vmax.f32 %v1456_v37, 0.0 }
 0x184   : > { %v2737_v45 = vpack.c.bf16 %v1651_v46, %v1651_v46  ;;  %v1652_v3 = vmax.f32 %v1448_v23, 0.0 }
 0x185   : > { %1974 = vst.msk [vmem:[%s3598_s12 + $0x48] sm:$0xf] %vm1955_vm1, %v2739_v41  ;;  %v2740_v50 = vpack.c.bf16 %v1654_v42, %v1654_v42 }
 0x186   : > { %1972 = vst.msk [vmem:[%s3598_s12 + $0x40] sm:$0xf] %vm1955_vm1, %v2737_v45  ;;  %v2738_v57 = vpack.c.bf16 %v1652_v3, %v1652_v3  ;;  %v1195_v15 = vpop.f32.mrb[52].mxu0  ;;  %v2848_v61 = vpop.f32.mrb[52].mxu1 }
 0x187   : > { %1975 = vst.msk [vmem:[%s3598_s12 + $0x4c] sm:$0xf] %vm1955_vm1, %v2740_v50  ;;  %v1469_v35 = vadd.f32 %v2848_v61, %v1180_v10  ;;  %v1197_v1 = vpop.f32.mrb[53].mxu0  ;;  %v1460_v2 = vpop.f32.mrb[53].mxu1  ;;  %v1196_v63 = vadd.f32 %v3583_v53, %v1195_v15 }
 0x188   : > { %1973 = vst.msk [vmem:[%s3598_s12 + $0x44] sm:$0xf] %vm1955_vm1, %v2738_v57  ;;  %v1461_v5 = vadd.f32 %v1460_v2, %v1172_v54  ;;  %v1198_v14 = vpop.f32.mrb[54].mxu0  ;;  %v2849_v7 = vpop.f32.mrb[54].mxu1 }
 0x189   : > { %v1657_v6 = vmax.f32 %v1469_v35, 0.0  ;;  %v1472_v47 = vadd.f32 %v2849_v7, %v1183_v43  ;;  %v1200_v9 = vpop.f32.mrb[55].mxu0  ;;  %v1463_v13 = vpop.f32.mrb[55].mxu1  ;;  %v1199_v29 = vadd.f32 %v3583_v53, %v1198_v14 }
 0x18a   : > { %v1655_v62 = vmax.f32 %v1461_v5, 0.0  ;;  %v1464_v59 = vadd.f32 %v1463_v13, %v1175_v49 }
 0x18b   : > { %v2743_v17 = vpack.c.bf16 %v1657_v6, %v1657_v6  ;;  %v1658_v51 = vmax.f32 %v1472_v47, 0.0 }
 0x18c   : > { %v2741_v39 = vpack.c.bf16 %v1655_v62, %v1655_v62  ;;  %v1656_v18 = vmax.f32 %v1464_v59, 0.0 }
 0x18d   : > { %1978 = vst.msk [vmem:[%s3598_s12 + $0x58] sm:$0xf] %vm1955_vm1, %v2743_v17  ;;  %v2744_v21 = vpack.c.bf16 %v1658_v51, %v1658_v51 }
 0x18e   : > { %1976 = vst.msk [vmem:[%s3598_s12 + $0x50] sm:$0xf] %vm1955_vm1, %v2741_v39  ;;  %v2742_v19 = vpack.c.bf16 %v1656_v18, %v1656_v18  ;;  %v1203_v25 = vpop.f32.mrb[56].mxu0  ;;  %v2852_v26 = vpop.f32.mrb[56].mxu1 }
 0x18f   : > { %1979 = vst.msk [vmem:[%s3598_s12 + $0x5c] sm:$0xf] %vm1955_vm1, %v2744_v21  ;;  %v1485_v55 = vadd.f32 %v2852_v26, %v1196_v63  ;;  %v1205_v34 = vpop.f32.mrb[57].mxu0  ;;  %v1476_v58 = vpop.f32.mrb[57].mxu1  ;;  %v1204_v54 = vadd.f32 %v3583_v53, %v1203_v25 }
 0x190   : > { %1977 = vst.msk [vmem:[%s3598_s12 + $0x54] sm:$0xf] %vm1955_vm1, %v2742_v19  ;;  %v1477_v33 = vadd.f32 %v1476_v58, %v1188_v27  ;;  %v1206_v22 = vpop.f32.mrb[58].mxu0  ;;  %v2853_v37 = vpop.f32.mrb[58].mxu1 }
 0x191   : > { %v1661_v11 = vmax.f32 %v1485_v55, 0.0  ;;  %v1488_v38 = vadd.f32 %v2853_v37, %v1199_v29  ;;  %v1208_v46 = vpop.f32.mrb[59].mxu0  ;;  %v1479_v23 = vpop.f32.mrb[59].mxu1  ;;  %v1207_v2 = vadd.f32 %v3583_v53, %v1206_v22 }
 0x192   : > { %v1659_v41 = vmax.f32 %v1477_v33, 0.0  ;;  %v1480_v42 = vadd.f32 %v1479_v23, %v1191_v30 }
 0x193   : > { %v2747_v45 = vpack.c.bf16 %v1661_v11, %v1661_v11  ;;  %v1662_v3 = vmax.f32 %v1488_v38, 0.0 }
 0x194   : > { %v2745_v10 = vpack.c.bf16 %v1659_v41, %v1659_v41  ;;  %v1660_v50 = vmax.f32 %v1480_v42, 0.0 }
 0x195   : > { %1982 = vst.msk [vmem:[%s3598_s12 + $0x68] sm:$0xf] %vm1955_vm1, %v2747_v45  ;;  %v2748_v31 = vpack.c.bf16 %v1662_v3, %v1662_v3 }
 0x196   : > { %1980 = vst.msk [vmem:[%s3598_s12 + $0x60] sm:$0xf] %vm1955_vm1, %v2745_v10  ;;  %v2746_v57 = vpack.c.bf16 %v1660_v50, %v1660_v50  ;;  %v1211_v15 = vpop.f32.mrb[60].mxu0  ;;  %v2856_v61 = vpop.f32.mrb[60].mxu1 }
 0x197   : > { %1983 = vst.msk [vmem:[%s3598_s12 + $0x6c] sm:$0xf] %vm1955_vm1, %v2748_v31  ;;  %v1212_v43 = vadd.f32 %v3583_v53, %v1211_v15  ;;  %v1213_v35 = vpop.f32.mrb[61].mxu0  ;;  %v1492_v1 = vpop.f32.mrb[61].mxu1 }
 0x198   : > { %1981 = vst.msk [vmem:[%s3598_s12 + $0x64] sm:$0xf] %vm1955_vm1, %v2746_v57  ;;  %v1493_v49 = vadd.f32 %v1492_v1, %v1204_v54  ;;  %v1214_v5 = vpop.f32.mrb[62].mxu0  ;;  %v2857_v14 = vpop.f32.mrb[62].mxu1 }
 0x199   : > { %v1501_v7 = vadd.f32 %v2856_v61, %v1212_v43  ;;  %v1215_v6 = vadd.f32 %v3583_v53, %v1214_v5  ;;  %v1216_v47 = vpop.f32.mrb[63].mxu0  ;;  %v1495_v9 = vpop.f32.mrb[63].mxu1 }
 0x19a   : > { %v1663_v13 = vmax.f32 %v1493_v49, 0.0  ;;  %v1496_v62 = vadd.f32 %v1495_v9, %v1207_v2 }
 0x19b   : > { %v1665_v59 = vmax.f32 %v1501_v7, 0.0  ;;  %v1504_v17 = vadd.f32 %v2857_v14, %v1215_v6 }
 0x19c   : > { %v2749_v51 = vpack.c.bf16 %v1663_v13, %v1663_v13  ;;  %v1664_v39 = vmax.f32 %v1496_v62, 0.0 }
 0x19d   : > { %v2751_v18 = vpack.c.bf16 %v1665_v59, %v1665_v59  ;;  %v1666_v63 = vmax.f32 %v1504_v17, 0.0 }
 0x19e   : > { %1984 = vst.msk [vmem:[%s3598_s12 + $0x70] sm:$0xf] %vm1955_vm1, %v2749_v51  ;;  %v2750_v21 = vpack.c.bf16 %v1664_v39, %v1664_v39  ;;  %v1219_v27 = vpop.f32.mrb[64].mxu0  ;;  %v2860_v19 = vpop.f32.mrb[64].mxu1 }
 0x19f   : > { %1986 = vst.msk [vmem:[%s3598_s12 + $0x78] sm:$0xf] %vm1955_vm1, %v2751_v18  ;;  %v2752_v25 = vpack.c.bf16 %v1666_v63, %v1666_v63  ;;  %v1220_v26 = vadd.f32 %v3583_v53, %v1219_v27  ;;  %v1221_v29 = vpop.f32.mrb[65].mxu0  ;;  %v1508_v55 = vpop.f32.mrb[65].mxu1 }
 0x1a0   : > { %1985 = vst.msk [vmem:[%s3598_s12 + $0x74] sm:$0xf] %vm1955_vm1, %v2750_v21  ;;  %v1222_v34 = vpop.f32.mrb[66].mxu0  ;;  %v2861_v58 = vpop.f32.mrb[66].mxu1 }
 0x1a1   : > { %1987 = vst.msk [vmem:[%s3598_s12 + $0x7c] sm:$0xf] %vm1955_vm1, %v2752_v25  ;;  %v1509_v30 = vadd.f32 %v1508_v55, %v1220_v26  ;;  %v1223_v33 = vadd.f32 %v3583_v53, %v1222_v34  ;;  %v1224_v22 = vpop.f32.mrb[67].mxu0  ;;  %v1511_v37 = vpop.f32.mrb[67].mxu1 }
 0x1a3   : > { %v1667_v11 = vmax.f32 %v1509_v30, 0.0  ;;  %v1512_v38 = vadd.f32 %v1511_v37, %v1223_v33 }
 0x1a5   : > { %v2753_v46 = vpack.c.bf16 %v1667_v11, %v1667_v11  ;;  %v1668_v23 = vmax.f32 %v1512_v38, 0.0 }
 0x1a6   : > { %v1227_v41 = vpop.f32.mrb[68].mxu0  ;;  %v2864_v42 = vpop.f32.mrb[68].mxu1 }
 0x1a7   : > { %1988 = vst.msk [vmem:[%s3598_s12 + $0x80] sm:$0xf] %vm1955_vm1, %v2753_v46  ;;  %v2754_v45 = vpack.c.bf16 %v1668_v23, %v1668_v23  ;;  %v1228_v3 = vadd.f32 %v3583_v53, %v1227_v41  ;;  %v1229_v10 = vpop.f32.mrb[69].mxu0  ;;  %v1524_v50 = vpop.f32.mrb[69].mxu1  ;;  %v1292_v23 = vadd.f32 %v3583_v53, %v3528_v60  ;;  %v1287_v60 = vadd.f32 %v3583_v53, %v3526_v56 }
 0x1a8   : > { %v1230_v31 = vpop.f32.mrb[70].mxu0  ;;  %v2865_v54 = vpop.f32.mrb[70].mxu1 }
 0x1a9   : > { %1989 = vst.msk [vmem:[%s3598_s12 + $0x84] sm:$0xf] %vm1955_vm1, %v2754_v45  ;;  %v1517_v57 = vadd.f32 %v2860_v19, %v1228_v3  ;;  %v1231_v15 = vadd.f32 %v3583_v53, %v1230_v31  ;;  %v1232_v61 = vpop.f32.mrb[71].mxu0  ;;  %v1527_v43 = vpop.f32.mrb[71].mxu1  ;;  %v1284_v3 = vadd.f32 %v3583_v53, %v3522_v52 }
 0x1ab   : > { %v1669_v35 = vmax.f32 %v1517_v57, 0.0  ;;  %v1520_v1 = vadd.f32 %v2861_v58, %v1231_v15 }
 0x1ad   : > { %v2755_v2 = vpack.c.bf16 %v1669_v35, %v1669_v35  ;;  %v1670_v49 = vmax.f32 %v1520_v1, 0.0 }
 0x1ae   : > { %v1235_v5 = vpop.f32.mrb[72].mxu0  ;;  %v3724_v14 = vpop.f32.mrb[72].mxu1 }
 0x1af   : > { %1990 = vst.msk [vmem:[%s3598_s12 + $0x88] sm:$0xf] %vm1955_vm1, %v2755_v2  ;;  %v2756_v7 = vpack.c.bf16 %v1670_v49, %v1670_v49  ;;  %v1236_v6 = vadd.f32 %v3583_v53, %v1235_v5  ;;  %v1237_v47 = vpop.f32.mrb[73].mxu0  ;;  %v1540_v9 = vpop.f32.mrb[73].mxu1 }
 0x1b0   : > { %v1238_v13 = vpop.f32.mrb[74].mxu0  ;;  %v3729_v62 = vpop.f32.mrb[74].mxu1 }
 0x1b1   : > { %1991 = vst.msk [vmem:[%s3598_s12 + $0x8c] sm:$0xf] %vm1955_vm1, %v2756_v7  ;;  %v1525_v59 = vadd.f32 %v1524_v50, %v1236_v6  ;;  %v1239_v17 = vadd.f32 %v3583_v53, %v1238_v13  ;;  %v1240_v51 = vpop.f32.mrb[75].mxu0  ;;  %v1543_v39 = vpop.f32.mrb[75].mxu1 }
 0x1b3   : > { %v1671_v18 = vmax.f32 %v1525_v59, 0.0  ;;  %v1528_v63 = vadd.f32 %v1527_v43, %v1239_v17 }
 0x1b5   : > { %v2757_v21 = vpack.c.bf16 %v1671_v18, %v1671_v18  ;;  %v1672_v27 = vmax.f32 %v1528_v63, 0.0 }
 0x1b6   : > { %v1243_v19 = vpop.f32.mrb[76].mxu0  ;;  %v3734_v25 = vpop.f32.mrb[76].mxu1 }
 0x1b7   : > { %1992 = vst.msk [vmem:[%s3598_s12 + $0x90] sm:$0xf] %vm1955_vm1, %v2757_v21  ;;  %v2758_v26 = vpack.c.bf16 %v1672_v27, %v1672_v27  ;;  %v1244_v29 = vadd.f32 %v3583_v53, %v1243_v19  ;;  %v1245_v55 = vpop.f32.mrb[77].mxu0  ;;  %v3739_v34 = vpop.f32.mrb[77].mxu1  ;;  %v1300_v19 = vadd.f32 %v3583_v53, %v3534_v4  ;;  %v1303_v4 = vadd.f32 %v3583_v53, %v3538_v8 }
 0x1b8   : > { %v1246_v58 = vpop.f32.mrb[78].mxu0  ;;  %v3741_v30 = vpop.f32.mrb[78].mxu1  ;;  %v1311_v55 = vadd.f32 %v3583_v53, %v3546_v16 }
 0x1b9   : > { %1993 = vst.msk [vmem:[%s3598_s12 + $0x94] sm:$0xf] %vm1955_vm1, %v2758_v26  ;;  %v1533_v33 = vadd.f32 %v2864_v42, %v1244_v29  ;;  %v1247_v22 = vadd.f32 %v3583_v53, %v1246_v58  ;;  %v1248_v37 = vpop.f32.mrb[79].mxu0  ;;  %v3746_v11 = vpop.f32.mrb[79].mxu1  ;;  %v1295_v42 = vadd.f32 %v3583_v53, %v3530_v0 }
 0x1bb   : > { %v1673_v38 = vmax.f32 %v1533_v33, 0.0  ;;  %v1536_v46 = vadd.f32 %v2865_v54, %v1247_v22 }
 0x1bd   : > { %v2759_v41 = vpack.c.bf16 %v1673_v38, %v1673_v38  ;;  %v1674_v45 = vmax.f32 %v1536_v46, 0.0 }
 0x1be   : > { %v1251_v10 = vpop.f32.mrb[80].mxu0  ;;  %v2876_v50 = vpop.f32.mrb[80].mxu1 }
 0x1bf   : > { %1994 = vst.msk [vmem:[%s3598_s12 + $0x98] sm:$0xf] %vm1955_vm1, %v2759_v41  ;;  %v2760_v31 = vpack.c.bf16 %v1674_v45, %v1674_v45  ;;  %v1252_v57 = vadd.f32 %v3583_v53, %v1251_v10  ;;  %v1581_v54 = vadd.f32 %v2876_v50, %v1292_v23  ;;  %v1253_v15 = vpop.f32.mrb[81].mxu0  ;;  %v1572_v61 = vpop.f32.mrb[81].mxu1 }
 0x1c0   : > { %v1573_v43 = vadd.f32 %v1572_v61, %v1284_v3  ;;  %v1254_v35 = vpop.f32.mrb[82].mxu0  ;;  %v2877_v1 = vpop.f32.mrb[82].mxu1 }
 0x1c1   : > { %1995 = vst.msk [vmem:[%s3598_s12 + $0x9c] sm:$0xf] %vm1955_vm1, %v2760_v31  ;;  %v1541_v52 = vadd.f32 %v1540_v9, %v1252_v57  ;;  %v1685_v2 = vmax.f32 %v1581_v54, 0.0  ;;  %v1255_v0 = vadd.f32 %v3583_v53, %v1254_v35  ;;  %v1584_v49 = vadd.f32 %v2877_v1, %v1295_v42  ;;  %v1256_v5 = vpop.f32.mrb[83].mxu0  ;;  %v1575_v7 = vpop.f32.mrb[83].mxu1 }
 0x1c2   : > { %v1683_v6 = vmax.f32 %v1573_v43, 0.0  ;;  %v1576_v47 = vadd.f32 %v1575_v7, %v1287_v60  ;;  %v1308_v9 = vadd.f32 %v3583_v53, %v3542_v12 }
 0x1c3   : > { %v1675_v13 = vmax.f32 %v1541_v52, 0.0  ;;  %v2771_v59 = vpack.c.bf16 %v1685_v2, %v1685_v2  ;;  %v1544_v56 = vadd.f32 %v1543_v39, %v1255_v0  ;;  %v1686_v17 = vmax.f32 %v1584_v49, 0.0 }
 0x1c4   : > { %v2769_v51 = vpack.c.bf16 %v1683_v6, %v1683_v6  ;;  %v1684_v18 = vmax.f32 %v1576_v47, 0.0  ;;  %v1316_v52 = vadd.f32 %v3583_v53, %v3550_v20  ;;  %v1327_v49 = vadd.f32 %v3583_v53, %v3562_v32 }
 0x1c5   : > { %v2761_v63 = vpack.c.bf16 %v1675_v13, %v1675_v13  ;;  %2006 = vst.msk [vmem:[%s3598_s12 + $0xc8] sm:$0xf] %vm1955_vm1, %v2771_v59  ;;  %v1676_v21 = vmax.f32 %v1544_v56, 0.0  ;;  %v2772_v27 = vpack.c.bf16 %v1686_v17, %v1686_v17  ;;  %v1319_v20 = vadd.f32 %v3583_v53, %v3554_v24 }
 0x1c6   : > { %2004 = vst.msk [vmem:[%s3598_s12 + $0xc0] sm:$0xf] %vm1955_vm1, %v2769_v51  ;;  %v2770_v26 = vpack.c.bf16 %v1684_v18, %v1684_v18  ;;  %v1259_v39 = vpop.f32.mrb[84].mxu0  ;;  %v2880_v29 = vpop.f32.mrb[84].mxu1 }
 0x1c7   : > { %1996 = vst.msk [vmem:[%s3598_s12 + $0xa0] sm:$0xf] %vm1955_vm1, %v2761_v63  ;;  %v2762_v12 = vpack.c.bf16 %v1676_v21, %v1676_v21  ;;  %2007 = vst.msk [vmem:[%s3598_s12 + $0xcc] sm:$0xf] %vm1955_vm1, %v2772_v27  ;;  %v1260_v58 = vadd.f32 %v3583_v53, %v1259_v39  ;;  %v1597_v33 = vadd.f32 %v2880_v29, %v1308_v9  ;;  %v1261_v22 = vpop.f32.mrb[85].mxu0  ;;  %v1588_v37 = vpop.f32.mrb[85].mxu1 }
 0x1c8   : > { %2005 = vst.msk [vmem:[%s3598_s12 + $0xc4] sm:$0xf] %vm1955_vm1, %v2770_v26  ;;  %v1589_v38 = vadd.f32 %v1588_v37, %v1300_v19  ;;  %v1262_v46 = vpop.f32.mrb[86].mxu0  ;;  %v2881_v23 = vpop.f32.mrb[86].mxu1  ;;  %v1332_v22 = vadd.f32 %v3583_v53, %v3566_v36  ;;  %v1335_v36 = vadd.f32 %v3583_v53, %v3570_v40 }
 0x1c9   : > { %1997 = vst.msk [vmem:[%s3598_s12 + $0xa4] sm:$0xf] %vm1955_vm1, %v2762_v12  ;;  %v1549_v16 = vadd.f32 %v3724_v14, %v1260_v58  ;;  %v1689_v41 = vmax.f32 %v1597_v33, 0.0  ;;  %v1263_v45 = vadd.f32 %v3583_v53, %v1262_v46  ;;  %v1600_v3 = vadd.f32 %v2881_v23, %v1311_v55  ;;  %v1264_v10 = vpop.f32.mrb[87].mxu0  ;;  %v1591_v50 = vpop.f32.mrb[87].mxu1 }
 0x1ca   : > { %v1687_v42 = vmax.f32 %v1589_v38, 0.0  ;;  %v1592_v31 = vadd.f32 %v1591_v50, %v1303_v4  ;;  %v1324_v14 = vadd.f32 %v3583_v53, %v3558_v28  ;;  %v1343_v38 = vadd.f32 %v3583_v53, %v3578_v48 }
 0x1cb   : > { %v1677_v8 = vmax.f32 %v1549_v16, 0.0  ;;  %v2775_v57 = vpack.c.bf16 %v1689_v41, %v1689_v41  ;;  %v1552_v54 = vadd.f32 %v3729_v62, %v1263_v45  ;;  %v1690_v15 = vmax.f32 %v1600_v3, 0.0 }
 0x1cc   : > { %v2773_v61 = vpack.c.bf16 %v1687_v42, %v1687_v42  ;;  %v1688_v60 = vmax.f32 %v1592_v31, 0.0 }
 0x1cd   : > { %v2763_v43 = vpack.c.bf16 %v1677_v8, %v1677_v8  ;;  %2010 = vst.msk [vmem:[%s3598_s12 + $0xd8] sm:$0xf] %vm1955_vm1, %v2775_v57  ;;  %v1678_v35 = vmax.f32 %v1552_v54, 0.0  ;;  %v2776_v1 = vpack.c.bf16 %v1690_v15, %v1690_v15 }
 0x1ce   : > { %2008 = vst.msk [vmem:[%s3598_s12 + $0xd0] sm:$0xf] %vm1955_vm1, %v2773_v61  ;;  %v2774_v2 = vpack.c.bf16 %v1688_v60, %v1688_v60  ;;  %v1267_v62 = vpop.f32.mrb[88].mxu0  ;;  %v2884_v0 = vpop.f32.mrb[88].mxu1 }
 0x1cf   : > { %1998 = vst.msk [vmem:[%s3598_s12 + $0xa8] sm:$0xf] %vm1955_vm1, %v2763_v43  ;;  %v2764_v28 = vpack.c.bf16 %v1678_v35, %v1678_v35  ;;  %2011 = vst.msk [vmem:[%s3598_s12 + $0xdc] sm:$0xf] %vm1955_vm1, %v2776_v1  ;;  %v1268_v5 = vadd.f32 %v3583_v53, %v1267_v62  ;;  %v1613_v7 = vadd.f32 %v2884_v0, %v1324_v14  ;;  %v1269_v6 = vpop.f32.mrb[89].mxu0  ;;  %v1604_v47 = vpop.f32.mrb[89].mxu1 }
 0x1d0   : > { %2009 = vst.msk [vmem:[%s3598_s12 + $0xd4] sm:$0xf] %vm1955_vm1, %v2774_v2  ;;  %v1605_v13 = vadd.f32 %v1604_v47, %v1316_v52  ;;  %v1270_v59 = vpop.f32.mrb[90].mxu0  ;;  %v2885_v56 = vpop.f32.mrb[90].mxu1 }
 0x1d1   : > { %1999 = vst.msk [vmem:[%s3598_s12 + $0xac] sm:$0xf] %vm1955_vm1, %v2764_v28  ;;  %v1557_v32 = vadd.f32 %v3739_v34, %v1268_v5  ;;  %v1693_v17 = vmax.f32 %v1613_v7, 0.0  ;;  %v1271_v51 = vadd.f32 %v3583_v53, %v1270_v59  ;;  %v1616_v18 = vadd.f32 %v2885_v56, %v1327_v49  ;;  %v1272_v9 = vpop.f32.mrb[91].mxu0  ;;  %v1607_v63 = vpop.f32.mrb[91].mxu1 }
 0x1d2   : > { %v1691_v21 = vmax.f32 %v1605_v13, 0.0  ;;  %v1608_v27 = vadd.f32 %v1607_v63, %v1319_v20  ;;  %v1340_v34 = vadd.f32 %v3583_v53, %v3574_v44 }
 0x1d3   : > { %v1679_v24 = vmax.f32 %v1557_v32, 0.0  ;;  %v2779_v19 = vpack.c.bf16 %v1693_v17, %v1693_v17  ;;  %v1560_v26 = vadd.f32 %v3746_v11, %v1271_v51  ;;  %v1694_v39 = vmax.f32 %v1616_v18, 0.0 }
 0x1d4   : > { %v2777_v29 = vpack.c.bf16 %v1691_v21, %v1691_v21  ;;  %v1692_v55 = vmax.f32 %v1608_v27, 0.0 }
 0x1d5   : > { %v2765_v12 = vpack.c.bf16 %v1679_v24, %v1679_v24  ;;  %2014 = vst.msk [vmem:[%s3598_s12 + $0xe8] sm:$0xf] %vm1955_vm1, %v2779_v19  ;;  %v1680_v58 = vmax.f32 %v1560_v26, 0.0  ;;  %v2780_v33 = vpack.c.bf16 %v1694_v39, %v1694_v39 }
 0x1d6   : > { %2012 = vst.msk [vmem:[%s3598_s12 + $0xe0] sm:$0xf] %vm1955_vm1, %v2777_v29  ;;  %v2778_v37 = vpack.c.bf16 %v1692_v55, %v1692_v55  ;;  %v1275_v11 = vpop.f32.mrb[92].mxu0  ;;  %v2888_v4 = vpop.f32.mrb[92].mxu1 }
 0x1d7   : > { %2000 = vst.msk [vmem:[%s3598_s12 + $0xb0] sm:$0xf] %vm1955_vm1, %v2765_v12  ;;  %v2766_v44 = vpack.c.bf16 %v1680_v58, %v1680_v58  ;;  %2015 = vst.msk [vmem:[%s3598_s12 + $0xec] sm:$0xf] %vm1955_vm1, %v2780_v33  ;;  %v1276_v46 = vadd.f32 %v3583_v53, %v1275_v11  ;;  %v1629_v23 = vadd.f32 %v2888_v4, %v1340_v34  ;;  %v1277_v16 = vpop.f32.mrb[93].mxu0  ;;  %v1620_v41 = vpop.f32.mrb[93].mxu1 }
 0x1d8   : > { %2013 = vst.msk [vmem:[%s3598_s12 + $0xe4] sm:$0xf] %vm1955_vm1, %v2778_v37  ;;  %v1621_v45 = vadd.f32 %v1620_v41, %v1332_v22  ;;  %v1278_v3 = vpop.f32.mrb[94].mxu0  ;;  %v2889_v10 = vpop.f32.mrb[94].mxu1 }
 0x1d9   : > { %2001 = vst.msk [vmem:[%s3598_s12 + $0xb4] sm:$0xf] %vm1955_vm1, %v2766_v44  ;;  %v1565_v48 = vadd.f32 %v3734_v25, %v1276_v46  ;;  %v1697_v50 = vmax.f32 %v1629_v23, 0.0  ;;  %v1279_v42 = vadd.f32 %v3583_v53, %v1278_v3  ;;  %v1632_v31 = vadd.f32 %v2889_v10, %v1343_v38  ;;  %v1280_v8 = vpop.f32.mrb[95].mxu0  ;;  %v1623_v57 = vpop.f32.mrb[95].mxu1 }
 0x1da   : > { %v1695_v54 = vmax.f32 %v1621_v45, 0.0  ;;  %v1624_v40 = vadd.f32 %v1623_v57, %v1335_v36 }
 0x1db   : > { %v1681_v15 = vmax.f32 %v1565_v48, 0.0  ;;  %v2783_v61 = vpack.c.bf16 %v1697_v50, %v1697_v50  ;;  %v1568_v60 = vadd.f32 %v3741_v30, %v1279_v42  ;;  %v1698_v14 = vmax.f32 %v1632_v31, 0.0  ;;  %2026 = sbr.rel (!%p3292_p4) target bundleno = 573 (0x23d), region = 36 }
 0x1dc   : > { %v2781_v43 = vpack.c.bf16 %v1695_v54, %v1695_v54  ;;  %v1696_v25 = vmax.f32 %v1624_v40, 0.0 }
 0x1dd   : > { %v2767_v35 = vpack.c.bf16 %v1681_v15, %v1681_v15  ;;  %2018 = vst.msk [vmem:[%s3598_s12 + $0xf8] sm:$0xf] %vm1955_vm1, %v2783_v61  ;;  %v1682_v53 = vmax.f32 %v1568_v60, 0.0  ;;  %v2784_v1 = vpack.c.bf16 %v1698_v14, %v1698_v14 }
 0x1de   : > { %2016 = vst.msk [vmem:[%s3598_s12 + $0xf0] sm:$0xf] %vm1955_vm1, %v2781_v43  ;;  %v2782_v52 = vpack.c.bf16 %v1696_v25, %v1696_v25 }
 0x1df   : > { %2002 = vst.msk [vmem:[%s3598_s12 + $0xb8] sm:$0xf] %vm1955_vm1, %v2767_v35  ;;  %v2768_v2 = vpack.c.bf16 %v1682_v53, %v1682_v53  ;;  %2019 = vst.msk [vmem:[%s3598_s12 + $0xfc] sm:$0xf] %vm1955_vm1, %v2784_v1 }
 0x1e0   : > { %2017 = vst.msk [vmem:[%s3598_s12 + $0xf4] sm:$0xf] %vm1955_vm1, %v2782_v52 }
 0x1e1   : > { %2003 = vst.msk [vmem:[%s3598_s12 + $0xbc] sm:$0xf] %vm1955_vm1, %v2768_v2 }
 0x1e2   : > { %s4057_s27 = smov (!%p2029_p8, %s2028_s27), 64 }
 0x1e3   : > { %s2706_s5 = sshll.u32 %s4057_s27, 6 }
 0x1e4   : > { %p2709_p9 = scmp.eq.s32.totalorder %s2706_s5, 0 }
 0x1e5   : > { %s3859_s6 = sshrl.u32 (!%p2709_p9), %s4057_s27, 6 }
 0x1e6   : > { %2037 = sbr.rel (%p2709_p9) target bundleno = 573 (0x23d), region = 40  ;;  %p2710_p10 = scmp.le.s32.totalorder (!%p2709_p9), %s3859_s6, 0 }
 0x1ed   : > { %2442 = sbr.rel (%p2710_p10) target bundleno = 552 (0x228), region = 112  ;;  %s4050_s15 = smov (!%p2710_p10), %s3853_s4 }
 0x1ee   : > { %s4051_s20 = smov (!%p2710_p10), %s3598_s12  ;;  %s3868_s23 = smov (!%p2710_p10), 0  }
 0x1ef   : > { %s3870_s7 = smov (!%p2710_p10), 0  }
 0x1f4 LB: >> { %v2053_v30 = vld [vmem:[%s3220_s20] sm:$0xf]  ;;  %v2055_v62 = vld [vmem:[%s3220_s20 + $0x4] sm:$0xf]  ;;  %v2057_v0 = vld [vmem:[%s3220_s20 + $0x8] sm:$0xf]  ;;  %s3228_s7 = sphi %s3870_s7, %s2047_s7   ;;  %s3224_s23 = sphi %s3868_s23, %s4052_s23   ;;  %s3220_s20 = sphi %s4051_s20, %s2186_s20   ;;  %s3216_s15 = sphi %s4050_s15, %s2187_s15  }
 0x1f5   : >> { %2054 = vst [vmem:[%s3216_s15] sm:$0xf] %v2053_v30  ;;  %2056 = vst [vmem:[%s3216_s15 + $0x4] sm:$0xf] %v2055_v62  ;;  %v2059_v49 = vld [vmem:[%s3220_s20 + $0xc] sm:$0xf]  ;;  %s2181_s8 = sadd.s32 1, %s3224_s23 }
 0x1f6   : >> { %2058 = vst [vmem:[%s3216_s15 + $0x8] sm:$0xf] %v2057_v0  ;;  %v2061_v28 = vld [vmem:[%s3220_s20 + $0x10] sm:$0xf]  ;;  %v2063_v5 = vld [vmem:[%s3220_s20 + $0x14] sm:$0xf]  ;;  %p2182_p11 = scmp.ge.s32.totalorder %s2181_s8, %s3859_s6 }
 0x1f7   : >> { %2060 = vst [vmem:[%s3216_s15 + $0xc] sm:$0xf] %v2059_v49  ;;  %2062 = vst [vmem:[%s3216_s15 + $0x10] sm:$0xf] %v2061_v28  ;;  %v2065_v7 = vld [vmem:[%s3220_s20 + $0x18] sm:$0xf] }
 0x1f8   : >> { %2064 = vst [vmem:[%s3216_s15 + $0x14] sm:$0xf] %v2063_v5  ;;  %v2067_v6 = vld [vmem:[%s3220_s20 + $0x1c] sm:$0xf]  ;;  %v2069_v47 = vld [vmem:[%s3220_s20 + $0x20] sm:$0xf] }
 0x1f9   : >> { %2066 = vst [vmem:[%s3216_s15 + $0x18] sm:$0xf] %v2065_v7  ;;  %2068 = vst [vmem:[%s3216_s15 + $0x1c] sm:$0xf] %v2067_v6  ;;  %v2071_v20 = vld [vmem:[%s3220_s20 + $0x24] sm:$0xf] }
 0x1fa   : >> { %2070 = vst [vmem:[%s3216_s15 + $0x20] sm:$0xf] %v2069_v47  ;;  %v2073_v13 = vld [vmem:[%s3220_s20 + $0x28] sm:$0xf]  ;;  %v2075_v59 = vld [vmem:[%s3220_s20 + $0x2c] sm:$0xf] }
 0x1fb   : >> { %2072 = vst [vmem:[%s3216_s15 + $0x24] sm:$0xf] %v2071_v20  ;;  %2074 = vst [vmem:[%s3216_s15 + $0x28] sm:$0xf] %v2073_v13  ;;  %v2077_v56 = vld [vmem:[%s3220_s20 + $0x30] sm:$0xf] }
 0x1fc   : >> { %2076 = vst [vmem:[%s3216_s15 + $0x2c] sm:$0xf] %v2075_v59  ;;  %v2079_v32 = vld [vmem:[%s3220_s20 + $0x34] sm:$0xf]  ;;  %v2081_v17 = vld [vmem:[%s3220_s20 + $0x38] sm:$0xf] }
 0x1fd   : >> { %2078 = vst [vmem:[%s3216_s15 + $0x30] sm:$0xf] %v2077_v56  ;;  %2080 = vst [vmem:[%s3216_s15 + $0x34] sm:$0xf] %v2079_v32  ;;  %v2083_v51 = vld [vmem:[%s3220_s20 + $0x3c] sm:$0xf] }
 0x1fe   : >> { %2082 = vst [vmem:[%s3216_s15 + $0x38] sm:$0xf] %v2081_v17  ;;  %v2085_v18 = vld [vmem:[%s3220_s20 + $0x40] sm:$0xf]  ;;  %v2087_v9 = vld [vmem:[%s3220_s20 + $0x44] sm:$0xf] }
 0x1ff   : >> { %2084 = vst [vmem:[%s3216_s15 + $0x3c] sm:$0xf] %v2083_v51  ;;  %2086 = vst [vmem:[%s3216_s15 + $0x40] sm:$0xf] %v2085_v18  ;;  %v2089_v63 = vld [vmem:[%s3220_s20 + $0x48] sm:$0xf] }
 0x200   : >> { %2088 = vst [vmem:[%s3216_s15 + $0x44] sm:$0xf] %v2087_v9  ;;  %v2091_v21 = vld [vmem:[%s3220_s20 + $0x4c] sm:$0xf]  ;;  %v2093_v27 = vld [vmem:[%s3220_s20 + $0x50] sm:$0xf] }
 0x201   : >> { %2090 = vst [vmem:[%s3216_s15 + $0x48] sm:$0xf] %v2089_v63  ;;  %2092 = vst [vmem:[%s3216_s15 + $0x4c] sm:$0xf] %v2091_v21  ;;  %v2095_v24 = vld [vmem:[%s3220_s20 + $0x54] sm:$0xf] }
 0x202   : >> { %2094 = vst [vmem:[%s3216_s15 + $0x50] sm:$0xf] %v2093_v27  ;;  %v2097_v19 = vld [vmem:[%s3220_s20 + $0x58] sm:$0xf]  ;;  %v2099_v26 = vld [vmem:[%s3220_s20 + $0x5c] sm:$0xf] }
 0x203   : >> { %2096 = vst [vmem:[%s3216_s15 + $0x54] sm:$0xf] %v2095_v24  ;;  %2098 = vst [vmem:[%s3216_s15 + $0x58] sm:$0xf] %v2097_v19  ;;  %v2101_v39 = vld [vmem:[%s3220_s20 + $0x60] sm:$0xf] }
 0x204   : >> { %2100 = vst [vmem:[%s3216_s15 + $0x5c] sm:$0xf] %v2099_v26  ;;  %v2103_v29 = vld [vmem:[%s3220_s20 + $0x64] sm:$0xf]  ;;  %v2105_v55 = vld [vmem:[%s3220_s20 + $0x68] sm:$0xf] }
 0x205   : >> { %2102 = vst [vmem:[%s3216_s15 + $0x60] sm:$0xf] %v2101_v39  ;;  %2104 = vst [vmem:[%s3216_s15 + $0x64] sm:$0xf] %v2103_v29  ;;  %v2107_v34 = vld [vmem:[%s3220_s20 + $0x6c] sm:$0xf] }
 0x206   : >> { %2106 = vst [vmem:[%s3216_s15 + $0x68] sm:$0xf] %v2105_v55  ;;  %v2109_v12 = vld [vmem:[%s3220_s20 + $0x70] sm:$0xf]  ;;  %v2111_v58 = vld [vmem:[%s3220_s20 + $0x74] sm:$0xf] }
 0x207   : >> { %2108 = vst [vmem:[%s3216_s15 + $0x6c] sm:$0xf] %v2107_v34  ;;  %2110 = vst [vmem:[%s3216_s15 + $0x70] sm:$0xf] %v2109_v12  ;;  %v2113_v33 = vld [vmem:[%s3220_s20 + $0x78] sm:$0xf] }
 0x208   : >> { %2112 = vst [vmem:[%s3216_s15 + $0x74] sm:$0xf] %v2111_v58  ;;  %v2115_v22 = vld [vmem:[%s3220_s20 + $0x7c] sm:$0xf]  ;;  %v2117_v37 = vld [vmem:[%s3220_s20 + $0x80] sm:$0xf] }
 0x209   : >> { %2114 = vst [vmem:[%s3216_s15 + $0x78] sm:$0xf] %v2113_v33  ;;  %2116 = vst [vmem:[%s3216_s15 + $0x7c] sm:$0xf] %v2115_v22  ;;  %v2119_v11 = vld [vmem:[%s3220_s20 + $0x84] sm:$0xf] }
 0x20a   : >> { %2118 = vst [vmem:[%s3216_s15 + $0x80] sm:$0xf] %v2117_v37  ;;  %v2121_v4 = vld [vmem:[%s3220_s20 + $0x88] sm:$0xf]  ;;  %v2123_v38 = vld [vmem:[%s3220_s20 + $0x8c] sm:$0xf] }
 0x20b   : >> { %2120 = vst [vmem:[%s3216_s15 + $0x84] sm:$0xf] %v2119_v11  ;;  %2122 = vst [vmem:[%s3216_s15 + $0x88] sm:$0xf] %v2121_v4  ;;  %v2125_v44 = vld [vmem:[%s3220_s20 + $0x90] sm:$0xf] }
 0x20c   : >> { %2124 = vst [vmem:[%s3216_s15 + $0x8c] sm:$0xf] %v2123_v38  ;;  %v2127_v46 = vld [vmem:[%s3220_s20 + $0x94] sm:$0xf]  ;;  %v2129_v23 = vld [vmem:[%s3220_s20 + $0x98] sm:$0xf] }
 0x20d   : >> { %2126 = vst [vmem:[%s3216_s15 + $0x90] sm:$0xf] %v2125_v44  ;;  %2128 = vst [vmem:[%s3216_s15 + $0x94] sm:$0xf] %v2127_v46  ;;  %v2131_v16 = vld [vmem:[%s3220_s20 + $0x9c] sm:$0xf] }
 0x20e   : >> { %2130 = vst [vmem:[%s3216_s15 + $0x98] sm:$0xf] %v2129_v23  ;;  %v2133_v41 = vld [vmem:[%s3220_s20 + $0xa0] sm:$0xf]  ;;  %v2135_v36 = vld [vmem:[%s3220_s20 + $0xa4] sm:$0xf] }
 0x20f   : >> { %2132 = vst [vmem:[%s3216_s15 + $0x9c] sm:$0xf] %v2131_v16  ;;  %2134 = vst [vmem:[%s3216_s15 + $0xa0] sm:$0xf] %v2133_v41  ;;  %v2137_v45 = vld [vmem:[%s3220_s20 + $0xa8] sm:$0xf] }
 0x210   : >> { %2136 = vst [vmem:[%s3216_s15 + $0xa4] sm:$0xf] %v2135_v36  ;;  %v2139_v3 = vld [vmem:[%s3220_s20 + $0xac] sm:$0xf]  ;;  %v2141_v10 = vld [vmem:[%s3220_s20 + $0xb0] sm:$0xf] }
 0x211   : >> { %2138 = vst [vmem:[%s3216_s15 + $0xa8] sm:$0xf] %v2137_v45  ;;  %2140 = vst [vmem:[%s3216_s15 + $0xac] sm:$0xf] %v2139_v3  ;;  %v2143_v48 = vld [vmem:[%s3220_s20 + $0xb4] sm:$0xf] }
 0x212   : >> { %2142 = vst [vmem:[%s3216_s15 + $0xb0] sm:$0xf] %v2141_v10  ;;  %v2145_v50 = vld [vmem:[%s3220_s20 + $0xb8] sm:$0xf]  ;;  %v2147_v42 = vld [vmem:[%s3220_s20 + $0xbc] sm:$0xf] }
 0x213   : >> { %2144 = vst [vmem:[%s3216_s15 + $0xb4] sm:$0xf] %v2143_v48  ;;  %2146 = vst [vmem:[%s3216_s15 + $0xb8] sm:$0xf] %v2145_v50  ;;  %v2149_v31 = vld [vmem:[%s3220_s20 + $0xc0] sm:$0xf] }
 0x214   : >> { %2148 = vst [vmem:[%s3216_s15 + $0xbc] sm:$0xf] %v2147_v42  ;;  %v2151_v8 = vld [vmem:[%s3220_s20 + $0xc4] sm:$0xf]  ;;  %v2153_v57 = vld [vmem:[%s3220_s20 + $0xc8] sm:$0xf] }
 0x215   : >> { %2150 = vst [vmem:[%s3216_s15 + $0xc0] sm:$0xf] %v2149_v31  ;;  %2152 = vst [vmem:[%s3216_s15 + $0xc4] sm:$0xf] %v2151_v8  ;;  %v2155_v54 = vld [vmem:[%s3220_s20 + $0xcc] sm:$0xf] }
 0x216   : >> { %2154 = vst [vmem:[%s3216_s15 + $0xc8] sm:$0xf] %v2153_v57  ;;  %v2157_v40 = vld [vmem:[%s3220_s20 + $0xd0] sm:$0xf]  ;;  %v2159_v15 = vld [vmem:[%s3220_s20 + $0xd4] sm:$0xf] }
 0x217   : >> { %2156 = vst [vmem:[%s3216_s15 + $0xcc] sm:$0xf] %v2155_v54  ;;  %2158 = vst [vmem:[%s3216_s15 + $0xd0] sm:$0xf] %v2157_v40  ;;  %v2161_v61 = vld [vmem:[%s3220_s20 + $0xd8] sm:$0xf] }
 0x218   : >> { %2160 = vst [vmem:[%s3216_s15 + $0xd4] sm:$0xf] %v2159_v15  ;;  %v2163_v60 = vld [vmem:[%s3220_s20 + $0xdc] sm:$0xf]  ;;  %v2165_v14 = vld [vmem:[%s3220_s20 + $0xe0] sm:$0xf] }
 0x219   : >> { %2162 = vst [vmem:[%s3216_s15 + $0xd8] sm:$0xf] %v2161_v61  ;;  %2164 = vst [vmem:[%s3216_s15 + $0xdc] sm:$0xf] %v2163_v60  ;;  %v2167_v43 = vld [vmem:[%s3220_s20 + $0xe4] sm:$0xf] }
 0x21a   : >> { %2166 = vst [vmem:[%s3216_s15 + $0xe0] sm:$0xf] %v2165_v14  ;;  %v2169_v25 = vld [vmem:[%s3220_s20 + $0xe8] sm:$0xf]  ;;  %v2171_v35 = vld [vmem:[%s3220_s20 + $0xec] sm:$0xf] }
 0x21b   : >> { %2168 = vst [vmem:[%s3216_s15 + $0xe4] sm:$0xf] %v2167_v43  ;;  %2170 = vst [vmem:[%s3216_s15 + $0xe8] sm:$0xf] %v2169_v25  ;;  %v2173_v53 = vld [vmem:[%s3220_s20 + $0xf0] sm:$0xf] }
 0x21c   : >> { %2172 = vst [vmem:[%s3216_s15 + $0xec] sm:$0xf] %v2171_v35  ;;  %v2175_v1 = vld [vmem:[%s3220_s20 + $0xf4] sm:$0xf]  ;;  %v2177_v52 = vld [vmem:[%s3220_s20 + $0xf8] sm:$0xf] }
 0x21d   : >> { %2174 = vst [vmem:[%s3216_s15 + $0xf0] sm:$0xf] %v2173_v53  ;;  %2176 = vst [vmem:[%s3216_s15 + $0xf4] sm:$0xf] %v2175_v1  ;;  %v2179_v2 = vld [vmem:[%s3220_s20 + $0xfc] sm:$0xf] }
 0x21e   : >> { %2178 = vst [vmem:[%s3216_s15 + $0xf8] sm:$0xf] %v2177_v52  ;;  %2180 = vst [vmem:[%s3216_s15 + $0xfc] sm:$0xf] %v2179_v2  ;;  %s4059_s8 = smov (%p2182_p11, %s2181_s8), 0  ;;  %s2047_s7 = sadd.s32 1, %s3228_s7  }
 0x21f   : >> { %s2711_s10 = sshll.u32 %s4059_s8, 8  ;;  %p2046_p12 = scmp.ge.s32.totalorder %s2047_s7, %s3859_s6 }
 0x220   : >> { %s2186_s20 = scalar_lea.vmem %s3598_s12, %s2711_s10 [#allocation2]   ;;  %s2187_s15 = scalar_lea.vmem %s3853_s4, %s2711_s10  }
 0x221   : >> { %s4052_s23 = smov %s4059_s8  ;;  %2049 = sbr.rel (!%p2046_p12) target bundleno = 500 (0x1f4), region = 118 }
 0x228 PF: > { %s4027_s11 = sand.u32 63, %s4057_s27   ;;  %s2786_s14 = sshll.u32 %s3859_s6, 8 }
 0x229   : > { %s2192_s17 = scalar_lea.vmem %s3598_s12, %s2786_s14 [#allocation2]   ;;  %s2194_s18 = scalar_lea.vmem %s3853_s4, %s2786_s14  }
 0x22a   : > { %p2716_p13 = scmp.le.s32.totalorder %s4027_s11, 0 }
 0x22b   : > { %s3230_s21 = smov (!%p2716_p13), %s2194_s18   ;;  %s3234_s22 = smov (!%p2716_p13), %s2192_s17  }
 0x22c   : > { %2456 = sbr.rel (%p2716_p13) target bundleno = 573 (0x23d), region = 123  ;;  %s3238_s9 = smov (!%p2716_p13), 0  }
 0x22d   : > { %s3242_s24 = smov (!%p2716_p13), 0  }
 0x233 LB: >> { %v2204_v30 = vld [vmem:[%s3236_s22] sm:$0xf]  ;;  %s2206_s25 = sadd.s32 1, %s3240_s9  ;;  %s2198_s24 = sadd.s32 1, %s3244_s24   ;;  %s3244_s24 = sphi %s3242_s24, %s2198_s24   ;;  %s3240_s9 = sphi %s3238_s9, %s3239_s9   ;;  %s3236_s22 = sphi %s3234_s22, %s2211_s22   ;;  %s3232_s21 = sphi %s3230_s21, %s2212_s21  }
 0x234   : >> { %2205 = vst [vmem:[%s3232_s21] sm:$0xf] %v2204_v30  ;;  %p2207_p0 = scmp.ge.s32.totalorder %s2206_s25, %s4027_s11  ;;  %p2197_p1 = scmp.ge.s32.totalorder %s2198_s24, %s4027_s11 }
 0x236   : >> { %s4061_s25 = smov (%p2207_p0, %s2206_s25), 0  ;;  %2200 = sbr.rel (!%p2197_p1) target bundleno = 563 (0x233), region = 129 }
 0x237   : >> { %s2717_s26 = sshll.u32 %s4061_s25, 2  ;;  %s3239_s9 = smov %s4061_s25  }
 0x238   : >> { %s2211_s22 = scalar_lea.vmem %s2192_s17, %s2717_s26 [#allocation2]   ;;  %s2212_s21 = scalar_lea.vmem %s2194_s18, %s2717_s26  }
 0x23d PF: > { %p10_p2 = scmp.ge.s32.totalorder %s3282_s16, 4   ;;  %s4053_s12 = smov %s3208_s13 }
 0x23e   : > { %s4054_s13 = smov %s3290_s19  ;;  %s4055_s14 = smov %s3282_s16 }
 0x23f   :  { %12 = sbr.rel (!%p10_p2) target bundleno = 2 (0x2), region = 140 }

// kernel: encoder_cnn_forward.7
= control target key start
LH: loop header
LB: loop body
LE: loop exit
PB: predicated region body
PF: predicated region fallthrough
CT: control target
= control target key end

     0   :  { %vm496_vm0 = vcmask 523264   ;;  %s1454_s1 = inlined_call_operand.vmem [shape: bf16[576,128], index: 1, kind: input, shape index: {}]   ;;  %s1455_s0 = inlined_call_operand.vmem [shape: bf16[96,576], index: 0, kind: input, shape index: {}]   ;;  %s1456_s2 = inlined_call_operand.vmem [shape: f32[1,128], index: 2, kind: input, shape index: {}]   ;;  %s1457_s3 = inlined_call_operand.vmem [shape: bf16[96,128], index: 3, kind: output, shape index: {}]  }
   0x1   :  { %v1108_v0 = vld [vmem:[%s1454_s1 + $0x40] sm:$0xff]   ;;  %v1112_v4 = vld [vmem:[%s1454_s1 + $0x48] sm:$0xff]   ;;  %v1116_v8 = vld [vmem:[%s1454_s1 + $0x50] sm:$0xff]  }
   0x2   :  { %v1109_v1 = vld [vmem:[%s1454_s1 + $0xc0] sm:$0xff]   ;;  %966 = vmatprep.subr.bf16.mxu0 %v1108_v0  ;;  %v1113_v5 = vld [vmem:[%s1454_s1 + $0xc8] sm:$0xff]   ;;  %v1117_v9 = vld [vmem:[%s1454_s1 + $0xd0] sm:$0xff]  }
   0x3   :  { %v1110_v2 = vld [vmem:[%s1454_s1] sm:$0xff]   ;;  %1018 = vmatprep.subr.bf16.mxu1 %v1109_v1  ;;  %v1114_v6 = vld [vmem:[%s1454_s1 + $0x8] sm:$0xff]   ;;  %v1118_v10 = vld [vmem:[%s1454_s1 + $0x10] sm:$0xff]  }
   0x4   :  { %v1111_v3 = vld [vmem:[%s1454_s1 + $0x80] sm:$0xff]   ;;  %967 = vmatpush3.bf16.msra.mxu0 %v1110_v2  ;;  %v1115_v7 = vld [vmem:[%s1454_s1 + $0x88] sm:$0xff]   ;;  %v1119_v11 = vld [vmem:[%s1454_s1 + $0x90] sm:$0xff]  }
   0x5   :  { %1019 = vmatpush3.bf16.msra.mxu1 %v1111_v3  ;;  %968 = vmatprep.subr.bf16.mxu0 %v1112_v4  ;;  %v1120_v12 = vld [vmem:[%s1454_s1 + $0x58] sm:$0xff]   ;;  %v1124_v16 = vld [vmem:[%s1454_s1 + $0x60] sm:$0xff]   ;;  %v1128_v20 = vld [vmem:[%s1454_s1 + $0x68] sm:$0xff]  }
   0x6   :  { %1020 = vmatprep.subr.bf16.mxu1 %v1113_v5  ;;  %v1121_v13 = vld [vmem:[%s1454_s1 + $0xd8] sm:$0xff]   ;;  %v1125_v17 = vld [vmem:[%s1454_s1 + $0xe0] sm:$0xff]   ;;  %v1129_v21 = vld [vmem:[%s1454_s1 + $0xe8] sm:$0xff]  }
   0x7   :  { %v1122_v14 = vld [vmem:[%s1454_s1 + $0x18] sm:$0xff]   ;;  %v1126_v18 = vld [vmem:[%s1454_s1 + $0x20] sm:$0xff]   ;;  %v1130_v22 = vld [vmem:[%s1454_s1 + $0x28] sm:$0xff]  }
   0x8   :  { %969 = vmatpush3.bf16.msra.mxu0 %v1114_v6  ;;  %v1123_v15 = vld [vmem:[%s1454_s1 + $0x98] sm:$0xff]   ;;  %v1127_v19 = vld [vmem:[%s1454_s1 + $0xa0] sm:$0xff]   ;;  %v1131_v23 = vld [vmem:[%s1454_s1 + $0xa8] sm:$0xff]  }
   0x9   :  { %1021 = vmatpush3.bf16.msra.mxu1 %v1115_v7  ;;  %970 = vmatprep.subr.bf16.mxu0 %v1116_v8  ;;  %v1132_v24 = vld [vmem:[%s1454_s1 + $0x70] sm:$0xff]   ;;  %v1136_v28 = vld [vmem:[%s1454_s1 + $0x78] sm:$0xff]   ;;  %v1145_v35 = vld [vmem:[%s1455_s0 + $0xc] ss:$20 sps:$4 sm:$0xff]  }
   0xa   :  { %1022 = vmatprep.subr.bf16.mxu1 %v1117_v9  ;;  %v1133_v25 = vld [vmem:[%s1454_s1 + $0xf0] sm:$0xff]   ;;  %v1137_v29 = vld [vmem:[%s1454_s1 + $0xf8] sm:$0xff]   ;;  %v1146_v36 = vld [vmem:[%s1454_s1 + $0x100] sm:$0xff]   ;;  %628 = vmatprep.mubr.bf16.mxu1 %v1145_v35 }
   0xb   :  { %v1134_v26 = vld [vmem:[%s1454_s1 + $0x30] sm:$0xff]   ;;  %v1138_v30 = vld [vmem:[%s1454_s1 + $0x38] sm:$0xff]   ;;  %v1147_v37 = vld [vmem:[%s1455_s0 + $0x2c] ss:$20 sps:$4 sm:$0xff]  }
   0xc   :  { %971 = vmatpush3.bf16.msra.mxu0 %v1118_v10  ;;  %v1135_v27 = vld [vmem:[%s1454_s1 + $0xb0] sm:$0xff]   ;;  %v1139_v31 = vld [vmem:[%s1454_s1 + $0xb8] sm:$0xff]   ;;  %v1153_v39 = vld [vmem:[%s1454_s1 + $0x108] sm:$0xff]  }
   0xd   :  { %1023 = vmatpush3.bf16.msra.mxu1 %v1119_v11  ;;  %972 = vmatprep.subr.bf16.mxu0 %v1120_v12  ;;  %v1140_v32 = vld [vmem:[%s1455_s0] ss:$20 sps:$4 sm:$0xff]   ;;  %v1142_v33 = vld [vmem:[%s1455_s0 + $0x4] ss:$20 sps:$4 sm:$0xff]   ;;  %v1143_v34 = vld [vmem:[%s1455_s0 + $0x8] ss:$20 sps:$4 sm:$0xff]  }
   0xe   :  { %1024 = vmatprep.subr.bf16.mxu1 %v1121_v13  ;;  %547 = vmatprep.mubr.bf16.mxu0 %v1142_v33  ;;  %v1149_v38 = vld [vmem:[%s1455_s0 + $0x34] ss:$20 sps:$4 sm:$0xff]   ;;  %v1152_v41 = vld [vmem:[%s1455_s0 + $0x30] ss:$20 sps:$4 sm:$0xff]   ;;  %v1159_v46 = vld [vmem:[%s1455_s0 + $0x58] ss:$20 sps:$4 sm:$0xff]  }
   0xf   :  { %v1151_v40 = vld [vmem:[%s1455_s0 + $0x28] ss:$20 sps:$4 sm:$0xff]   ;;  %v1166_v44 = vld [vmem:[%s1454_s1 + $0x110] sm:$0xff]   ;;  %v1162_v49 = vld [vmem:[%s1455_s0 + $0x84] ss:$20 sps:$4 sm:$0xff]  }
  0x10   :  { %973 = vmatpush3.bf16.msra.mxu0 %v1122_v14  ;;  %v1154_v42 = vld [vmem:[%s1455_s0 + $0x54] ss:$20 sps:$4 sm:$0xff]   ;;  %v1156_v43 = vld [vmem:[%s1455_s0 + $0x5c] ss:$20 sps:$4 sm:$0xff]   ;;  %v1164_v50 = vld [vmem:[%s1455_s0 + $0x78] ss:$20 sps:$4 sm:$0xff]  }
  0x11   :  { %1025 = vmatpush3.bf16.msra.mxu1 %v1123_v15  ;;  %974 = vmatprep.subr.bf16.mxu0 %v1124_v16  ;;  %v1158_v45 = vld [vmem:[%s1455_s0 + $0x50] ss:$20 sps:$4 sm:$0xff]   ;;  %v1173_v48 = vld [vmem:[%s1454_s1 + $0x118] sm:$0xff]   ;;  %v1165_v51 = vld [vmem:[%s1455_s0 + $0x80] ss:$20 sps:$4 sm:$0xff]  }
  0x12   :  { %1026 = vmatprep.subr.bf16.mxu1 %v1125_v17  ;;  %v1160_v47 = vld [vmem:[%s1455_s0 + $0x7c] ss:$20 sps:$4 sm:$0xff]   ;;  %v1167_v52 = vld [vmem:[%s1455_s0 + $0xa4] ss:$20 sps:$4 sm:$0xff]   ;;  %v1169_v53 = vld [vmem:[%s1455_s0 + $0xac] ss:$20 sps:$4 sm:$0xff]  }
  0x13   :  { %v1171_v54 = vld [vmem:[%s1455_s0 + $0xa0] ss:$20 sps:$4 sm:$0xff]   ;;  %v1172_v55 = vld [vmem:[%s1455_s0 + $0xa8] ss:$20 sps:$4 sm:$0xff]   ;;  %v1179_v59 = vld [vmem:[%s1455_s0 + $0xd0] ss:$20 sps:$4 sm:$0xff]  }
  0x14   :  { %975 = vmatpush3.bf16.msra.mxu0 %v1126_v18  ;;  %v1174_v56 = vld [vmem:[%s1455_s0 + $0xcc] ss:$20 sps:$4 sm:$0xff]   ;;  %v1176_v57 = vld [vmem:[%s1455_s0 + $0xd4] ss:$20 sps:$4 sm:$0xff]   ;;  %v1180_v60 = vld [vmem:[%s1455_s0 + $0x10] ss:$20 sps:$4 sm:$0xff]  }
  0x15   :  { %1027 = vmatpush3.bf16.msra.mxu1 %v1127_v19  ;;  %976 = vmatprep.subr.bf16.mxu0 %v1128_v20  ;;  %v1178_v58 = vld [vmem:[%s1455_s0 + $0xc8] ss:$20 sps:$4 sm:$0xff]   ;;  %v1181_v61 = vld [vmem:[%s1455_s0 + $0x60] ss:$20 sps:$4 sm:$0xff]   ;;  %v1182_v62 = vld [vmem:[%s1455_s0 + $0x38] ss:$20 sps:$4 sm:$0xff]  }
  0x16   :  { %1028 = vmatprep.subr.bf16.mxu1 %v1129_v21  ;;  %v1183_v63 = vld [vmem:[%s1455_s0 + $0x88] ss:$20 sps:$4 sm:$0xff]   ;;  %v1184_v0 = vld [vmem:[%s1455_s0 + $0xb0] ss:$20 sps:$4 sm:$0xff]   ;;  %v1185_v1 = vld [vmem:[%s1455_s0 + $0xd8] ss:$20 sps:$4 sm:$0xff]  }
  0x17   :  { %v1407_v4 = vld [vmem:[%s1456_s2] ss:$0 sm:$0xff] }
  0x18   :  { %977 = vmatpush3.bf16.msra.mxu0 %v1130_v22 }
  0x19   :  { %1029 = vmatpush3.bf16.msra.mxu1 %v1131_v23  ;;  %978 = vmatprep.subr.bf16.mxu0 %v1132_v24 }
  0x1a   :  { %1030 = vmatprep.subr.bf16.mxu1 %v1133_v25 }
  0x1c   :  { %979 = vmatpush3.bf16.msra.mxu0 %v1134_v26 }
  0x1d   :  { %1031 = vmatpush3.bf16.msra.mxu1 %v1135_v27  ;;  %980 = vmatprep.subr.bf16.mxu0 %v1136_v28 }
  0x1e   :  { %1032 = vmatprep.subr.bf16.mxu1 %v1137_v29 }
  0x20   :  { %981 = vmatpush3.bf16.msra.mxu0 %v1138_v30 }
  0x21   :  { %1033 = vmatpush3.bf16.msra.mxu1 %v1139_v31  ;;  %1080 = vmatprep.subr.bf16.mxu0 %v1146_v36 }
  0x22   :  { %1100 = vmatprep.subr.bf16.mxu1 %v1146_v36 }
  0x23   :  { %548 = vmatmul.mubr.bf16.vlgmr.msra.gmra.mrb[0].mxu0 %v1140_v32 }
  0x24   :  { %629 = vmatmul.mubr.bf16.vlgmr.msra.gmra.mrb[0].mxu1 %v1143_v34  ;;  %555 = vmatprep.mubr.bf16.mxu0 %v1147_v37 }
  0x25   :  { %1104 = vmatpush3.bf16.msra.mxu1 %v1146_v36  ;;  %636 = vmatprep.mubr.bf16.mxu1 %v1149_v38 }
  0x26   :  { %1081 = vmatpush3.bf16.msra.mxu0 %v1146_v36  ;;  %1101 = vmatprep.subr.bf16.mxu1 %v1153_v39 }
  0x27   :  { %1082 = vmatprep.subr.bf16.mxu0 %v1153_v39 }
  0x29   :  { %1105 = vmatpush3.bf16.msra.mxu1 %v1153_v39 }
  0x2a   :  { %1083 = vmatpush3.bf16.msra.mxu0 %v1153_v39  ;;  %1102 = vmatprep.subr.bf16.mxu1 %v1166_v44 }
  0x2b   :  { %556 = vmatmul.mubr.bf16.gmra.mrb[4].mxu0 %v1151_v40  ;;  %1084 = vmatprep.subr.bf16.mxu0 %v1166_v44 }
  0x2c   :  { %637 = vmatmul.mubr.bf16.gmra.mrb[4].mxu1 %v1152_v41  ;;  %563 = vmatprep.mubr.bf16.mxu0 %v1154_v42 }
  0x2d   :  { %644 = vmatprep.mubr.bf16.mxu1 %v1156_v43  ;;  %1106 = vmatpush3.bf16.msra.mxu1 %v1166_v44 }
  0x2e   :  { %1085 = vmatpush3.bf16.msra.mxu0 %v1166_v44  ;;  %1103 = vmatprep.subr.bf16.mxu1 %v1173_v48 }
  0x2f   :  { %1086 = vmatprep.subr.bf16.mxu0 %v1173_v48 }
  0x31   :  { %1107 = vmatpush3.bf16.msra.mxu1 %v1173_v48 }
  0x32   :  { %1087 = vmatpush3.bf16.msra.mxu0 %v1173_v48 }
  0x33   :  { %564 = vmatmul.mubr.bf16.gmra.mrb[8].mxu0 %v1158_v45 }
  0x34   :  { %645 = vmatmul.mubr.bf16.gmra.mrb[8].mxu1 %v1159_v46  ;;  %571 = vmatprep.mubr.bf16.mxu0 %v1160_v47 }
  0x35   :  { %652 = vmatprep.mubr.bf16.mxu1 %v1162_v49 }
  0x3b   :  { %572 = vmatmul.mubr.bf16.gmra.mrb[12].mxu0 %v1164_v50 }
  0x3c   :  { %653 = vmatmul.mubr.bf16.gmra.mrb[12].mxu1 %v1165_v51  ;;  %579 = vmatprep.mubr.bf16.mxu0 %v1167_v52 }
  0x3d   :  { %660 = vmatprep.mubr.bf16.mxu1 %v1169_v53 }
  0x43   :  { %580 = vmatmul.mubr.bf16.gmra.mrb[16].mxu0 %v1171_v54 }
  0x44   :  { %661 = vmatmul.mubr.bf16.gmra.mrb[16].mxu1 %v1172_v55  ;;  %587 = vmatprep.mubr.bf16.mxu0 %v1174_v56 }
  0x45   :  { %668 = vmatprep.mubr.bf16.mxu1 %v1176_v57 }
  0x4b   :  { %588 = vmatmul.mubr.bf16.gmra.mrb[20].mxu0 %v1178_v58 }
  0x4c   :  { %669 = vmatmul.mubr.bf16.gmra.mrb[20].mxu1 %v1179_v59  ;;  %1088 = vmatprep.mubr.msk.bf16.mxu0 %vm496_vm0, %v1180_v60 }
  0x4d   :  { %1092 = vmatprep.mubr.msk.bf16.mxu1 %vm496_vm0, %v1181_v61 }
  0x53   :  { %1089 = vmatmul.mubr.msk.bf16.vlgmr.msra.gmra.mrb[24].mxu0 %vm496_vm0, %v1182_v62 }
  0x54   :  { %1093 = vmatmul.mubr.msk.bf16.vlgmr.msra.gmra.mrb[24].mxu1 %vm496_vm0, %v1183_v63 }
  0x55   :  { %1096 = vmatprep.mubr.msk.bf16.mxu1 %vm496_vm0, %v1184_v0 }
  0x5c   :  { %1097 = vmatmul.mubr.msk.bf16.gmra.mrb[28].mxu1 %vm496_vm0, %v1185_v1 }
  0xf6   :  { %v982_v2 = vpop.f32.mrb[0].mxu0 }
  0xf7   :  { %v1034_v3 = vpop.f32.mrb[0].mxu1  ;;  %v983_v5 = vpop.f32.mrb[1].mxu0 }
  0xf8   :  { %v984_v6 = vadd.f32 %v983_v5, %v982_v2  ;;  %v1035_v7 = vpop.f32.mrb[1].mxu1  ;;  %v985_v8 = vpop.f32.mrb[2].mxu0 }
  0xf9   :  { %v1036_v9 = vadd.f32 %v1035_v7, %v1034_v3  ;;  %v1037_v10 = vpop.f32.mrb[2].mxu1  ;;  %v986_v11 = vpop.f32.mrb[3].mxu0 }
  0xfa   :  { %v550_v12 = vadd.f32 %v984_v6, %v1407_v4  ;;  %v987_v13 = vadd.f32 %v986_v11, %v985_v8  ;;  %v1038_v14 = vpop.f32.mrb[3].mxu1 }
  0xfb   :  { %v1039_v15 = vadd.f32 %v1038_v14, %v1037_v10 }
  0xfc   :  { %v553_v16 = vadd.f32 %v987_v13, %v1407_v4  ;;  %v1411_v17 = vadd.f32 %v1036_v9, %v550_v12 }
  0xfe   :  { %v988_v18 = vpop.f32.mrb[4].mxu0  ;;  %v1413_v19 = vadd.f32 %v1039_v15, %v553_v16 }
  0xff   :  { %v1040_v20 = vpop.f32.mrb[4].mxu1  ;;  %v989_v21 = vpop.f32.mrb[5].mxu0 }
 0x100   :  { %v990_v22 = vadd.f32 %v989_v21, %v988_v18  ;;  %v1041_v23 = vpop.f32.mrb[5].mxu1  ;;  %v991_v24 = vpop.f32.mrb[6].mxu0 }
 0x101   :  { %v1042_v25 = vadd.f32 %v1041_v23, %v1040_v20  ;;  %v1043_v26 = vpop.f32.mrb[6].mxu1  ;;  %v992_v27 = vpop.f32.mrb[7].mxu0 }
 0x102   :  { %v558_v28 = vadd.f32 %v990_v22, %v1407_v4  ;;  %v993_v29 = vadd.f32 %v992_v27, %v991_v24  ;;  %v1044_v30 = vpop.f32.mrb[7].mxu1 }
 0x103   :  { %v1045_v31 = vadd.f32 %v1044_v30, %v1043_v26 }
 0x104   :  { %v561_v32 = vadd.f32 %v993_v29, %v1407_v4  ;;  %v1417_v33 = vadd.f32 %v1042_v25, %v558_v28 }
 0x106   :  { %v994_v34 = vpop.f32.mrb[8].mxu0  ;;  %v1419_v35 = vadd.f32 %v1045_v31, %v561_v32 }
 0x107   :  { %v1046_v36 = vpop.f32.mrb[8].mxu1  ;;  %v995_v37 = vpop.f32.mrb[9].mxu0 }
 0x108   :  { %v996_v38 = vadd.f32 %v995_v37, %v994_v34  ;;  %v1047_v39 = vpop.f32.mrb[9].mxu1  ;;  %v997_v40 = vpop.f32.mrb[10].mxu0 }
 0x109   :  { %v1048_v41 = vadd.f32 %v1047_v39, %v1046_v36  ;;  %v1049_v42 = vpop.f32.mrb[10].mxu1  ;;  %v998_v43 = vpop.f32.mrb[11].mxu0 }
 0x10a   :  { %v566_v44 = vadd.f32 %v996_v38, %v1407_v4  ;;  %v999_v45 = vadd.f32 %v998_v43, %v997_v40  ;;  %v1050_v46 = vpop.f32.mrb[11].mxu1 }
 0x10b   :  { %v1051_v47 = vadd.f32 %v1050_v46, %v1049_v42 }
 0x10c   :  { %v569_v48 = vadd.f32 %v999_v45, %v1407_v4  ;;  %v647_v49 = vadd.f32 %v1048_v41, %v566_v44 }
 0x10e   :  { %v1000_v50 = vpop.f32.mrb[12].mxu0  ;;  %v1423_v51 = vadd.f32 %v1051_v47, %v569_v48 }
 0x10f   :  { %v1052_v52 = vpop.f32.mrb[12].mxu1  ;;  %v1001_v53 = vpop.f32.mrb[13].mxu0 }
 0x110   :  { %v1002_v54 = vadd.f32 %v1001_v53, %v1000_v50  ;;  %v1053_v55 = vpop.f32.mrb[13].mxu1  ;;  %v1003_v56 = vpop.f32.mrb[14].mxu0 }
 0x111   :  { %v1054_v57 = vadd.f32 %v1053_v55, %v1052_v52  ;;  %v1055_v58 = vpop.f32.mrb[14].mxu1  ;;  %v1004_v59 = vpop.f32.mrb[15].mxu0 }
 0x112   :  { %v574_v60 = vadd.f32 %v1002_v54, %v1407_v4  ;;  %v1005_v61 = vadd.f32 %v1004_v59, %v1003_v56  ;;  %v1056_v62 = vpop.f32.mrb[15].mxu1 }
 0x113   :  { %v1057_v63 = vadd.f32 %v1056_v62, %v1055_v58 }
 0x114   :  { %v577_v0 = vadd.f32 %v1005_v61, %v1407_v4  ;;  %v655_v1 = vadd.f32 %v1054_v57, %v574_v60 }
 0x116   :  { %v1006_v2 = vpop.f32.mrb[16].mxu0  ;;  %v658_v3 = vadd.f32 %v1057_v63, %v577_v0 }
 0x117   :  { %v1058_v5 = vpop.f32.mrb[16].mxu1  ;;  %v1007_v6 = vpop.f32.mrb[17].mxu0 }
 0x118   :  { %v1008_v7 = vadd.f32 %v1007_v6, %v1006_v2  ;;  %v1059_v8 = vpop.f32.mrb[17].mxu1  ;;  %v1009_v9 = vpop.f32.mrb[18].mxu0 }
 0x119   :  { %v1060_v10 = vadd.f32 %v1059_v8, %v1058_v5  ;;  %v1061_v11 = vpop.f32.mrb[18].mxu1  ;;  %v1010_v12 = vpop.f32.mrb[19].mxu0 }
 0x11a   :  { %v582_v13 = vadd.f32 %v1008_v7, %v1407_v4  ;;  %v1011_v14 = vadd.f32 %v1010_v12, %v1009_v9  ;;  %v1062_v15 = vpop.f32.mrb[19].mxu1 }
 0x11b   :  { %v1063_v16 = vadd.f32 %v1062_v15, %v1061_v11 }
 0x11c   :  { %v585_v18 = vadd.f32 %v1011_v14, %v1407_v4  ;;  %v663_v20 = vadd.f32 %v1060_v10, %v582_v13 }
 0x11e   :  { %v1012_v21 = vpop.f32.mrb[20].mxu0  ;;  %v666_v22 = vadd.f32 %v1063_v16, %v585_v18 }
 0x11f   :  { %v1064_v23 = vpop.f32.mrb[20].mxu1  ;;  %v1013_v24 = vpop.f32.mrb[21].mxu0 }
 0x120   :  { %v1014_v25 = vadd.f32 %v1013_v24, %v1012_v21  ;;  %v1065_v26 = vpop.f32.mrb[21].mxu1  ;;  %v1015_v27 = vpop.f32.mrb[22].mxu0 }
 0x121   :  { %v1066_v28 = vadd.f32 %v1065_v26, %v1064_v23  ;;  %v1067_v29 = vpop.f32.mrb[22].mxu1  ;;  %v1016_v30 = vpop.f32.mrb[23].mxu0 }
 0x122   :  { %v590_v31 = vadd.f32 %v1014_v25, %v1407_v4  ;;  %v1017_v32 = vadd.f32 %v1016_v30, %v1015_v27  ;;  %v1068_v34 = vpop.f32.mrb[23].mxu1 }
 0x123   :  { %v1069_v36 = vadd.f32 %v1068_v34, %v1067_v29 }
 0x124   :  { %v593_v37 = vadd.f32 %v1017_v32, %v1407_v4  ;;  %v671_v38 = vadd.f32 %v1066_v28, %v590_v31 }
 0x126   :  { %v1090_v39 = vpop.f32.mrb[24].mxu0  ;;  %v674_v40 = vadd.f32 %v1069_v36, %v593_v37 }
 0x127   :  { %v720_v41 = vadd.f32 %v1090_v39, %v1417_v33  ;;  %v1094_v42 = vpop.f32.mrb[24].mxu1  ;;  %v711_v43 = vpop.f32.mrb[25].mxu0 }
 0x128   :  { %v736_v44 = vadd.f32 %v1094_v42, %v655_v1  ;;  %v712_v45 = vadd.f32 %v711_v43, %v1411_v17  ;;  %v727_v46 = vpop.f32.mrb[25].mxu1  ;;  %v1091_v47 = vpop.f32.mrb[26].mxu0 }
 0x129   :  { %v728_v48 = vadd.f32 %v727_v46, %v647_v49  ;;  %v723_v50 = vadd.f32 %v1091_v47, %v1419_v35  ;;  %v1095_v52 = vpop.f32.mrb[26].mxu1  ;;  %v714_v53 = vpop.f32.mrb[27].mxu0  ;;  %v760_v56 = vmax.f32 %v720_v41, 0.0 }
 0x12a   :  { %v739_v54 = vadd.f32 %v1095_v52, %v658_v3  ;;  %v715_v4 = vadd.f32 %v714_v53, %v1413_v19  ;;  %v730_v55 = vpop.f32.mrb[27].mxu1  ;;  %v764_v58 = vmax.f32 %v736_v44, 0.0  ;;  %v758_v59 = vmax.f32 %v712_v45, 0.0 }
 0x12b   :  { %v761_v57 = vmax.f32 %v723_v50, 0.0  ;;  %v731_v33 = vadd.f32 %v730_v55, %v1423_v51  ;;  %v762_v17 = vmax.f32 %v728_v48, 0.0 }
 0x12c   :  { %v765_v60 = vmax.f32 %v739_v54, 0.0  ;;  %v759_v61 = vmax.f32 %v715_v4, 0.0 }
 0x12d   :  { %v939_v62 = vpack.c.bf16 %v761_v57, %v760_v56  ;;  %v763_v63 = vmax.f32 %v731_v33, 0.0 }
 0x12e   :  { %v949_v49 = vpack.c.bf16 %v765_v60, %v764_v58  ;;  %v934_v0 = vpack.c.bf16 %v759_v61, %v758_v59 }
 0x12f   :  { %961 = vst [vmem:[%s1457_s3 + $0x8] sm:$0xff] %v939_v62   ;;  %v944_v35 = vpack.c.bf16 %v763_v63, %v762_v17  ;;  %v1098_v19 = vpop.f32.mrb[28].mxu1 }
 0x130   :  { %963 = vst [vmem:[%s1457_s3 + $0x18] sm:$0xff] %v949_v49   ;;  %935 = vst [vmem:[%s1457_s3] sm:$0xff] %v934_v0   ;;  %v752_v51 = vadd.f32 %v1098_v19, %v671_v38  ;;  %v743_v1 = vpop.f32.mrb[29].mxu1 }
 0x131   :  { %962 = vst [vmem:[%s1457_s3 + $0x10] sm:$0xff] %v944_v35   ;;  %v744_v2 = vadd.f32 %v743_v1, %v663_v20  ;;  %v1099_v3 = vpop.f32.mrb[30].mxu1 }
 0x132   :  { %v755_v5 = vadd.f32 %v1099_v3, %v674_v40  ;;  %v746_v6 = vpop.f32.mrb[31].mxu1  ;;  %v768_v8 = vmax.f32 %v752_v51, 0.0 }
 0x133   :  { %v747_v7 = vadd.f32 %v746_v6, %v666_v22  ;;  %v766_v10 = vmax.f32 %v744_v2, 0.0 }
 0x134   :  { %v769_v9 = vmax.f32 %v755_v5, 0.0 }
 0x135   :  { %v767_v11 = vmax.f32 %v747_v7, 0.0 }
 0x136   :  { %v959_v12 = vpack.c.bf16 %v769_v9, %v768_v8 }
 0x137   :  { %v954_v13 = vpack.c.bf16 %v767_v11, %v766_v10 }
 0x138   :  { %965 = vst [vmem:[%s1457_s3 + $0x28] sm:$0xff] %v959_v12  }
 0x139   :  { %964 = vst [vmem:[%s1457_s3 + $0x20] sm:$0xff] %v954_v13  }

// kernel: encoder_cnn_forward.8
= control target key start
LH: loop header
LB: loop body
LE: loop exit
PB: predicated region body
PF: predicated region fallthrough
CT: control target
= control target key end

     0   :  { %s2031_s1 = inlined_call_operand.vmem [shape: bf16[1152,256], index: 1, kind: input, shape index: {}]   ;;  %s2032_s0 = inlined_call_operand.vmem [shape: bf16[6,1152], index: 0, kind: input, shape index: {}]   ;;  %s2033_s2 = inlined_call_operand.vmem [shape: f32[1,256], index: 2, kind: input, shape index: {}]   ;;  %s2034_s3 = inlined_call_operand.vmem [shape: bf16[6,256], index: 3, kind: output, shape index: {}]  }
   0x1   :  { %v1320_v0 = vld [vmem:[%s2031_s1 + $0x4] ss:$8 sps:$4 sm:$0xff]   ;;  %v1324_v2 = vld [vmem:[%s2031_s1] ss:$8 sps:$4 sm:$0xff]   ;;  %v1326_v4 = vld [vmem:[%s2031_s1 + $0x14] ss:$8 sps:$4 sm:$0xff]  }
   0x2   :  { %v1322_v1 = vld [vmem:[%s2031_s1 + $0x204] ss:$8 sps:$4 sm:$0xff]   ;;  %928 = vmatprep.subr.bf16.mxu1 %v1320_v0  ;;  %v1325_v3 = vld [vmem:[%s2031_s1 + $0x200] ss:$8 sps:$4 sm:$0xff]   ;;  %v1328_v5 = vld [vmem:[%s2031_s1 + $0x214] ss:$8 sps:$4 sm:$0xff]  }
   0x3   :  { %1010 = vmatprep.subr.bf16.mxu0 %v1322_v1  ;;  %929 = vmatpush1.bf16.msra.mxu1 %v1324_v2  ;;  %v1330_v6 = vld [vmem:[%s2031_s1 + $0x10] ss:$8 sps:$4 sm:$0xff]   ;;  %v1332_v8 = vld [vmem:[%s2031_s1 + $0x24] ss:$8 sps:$4 sm:$0xff]   ;;  %v1336_v10 = vld [vmem:[%s2031_s1 + $0x20] ss:$8 sps:$4 sm:$0xff]  }
   0x4   :  { %1011 = vmatpush1.bf16.msra.mxu0 %v1325_v3  ;;  %930 = vmatprep.subr.bf16.mxu1 %v1326_v4  ;;  %v1331_v7 = vld [vmem:[%s2031_s1 + $0x210] ss:$8 sps:$4 sm:$0xff]   ;;  %v1334_v9 = vld [vmem:[%s2031_s1 + $0x224] ss:$8 sps:$4 sm:$0xff]   ;;  %v1337_v11 = vld [vmem:[%s2031_s1 + $0x220] ss:$8 sps:$4 sm:$0xff]  }
   0x5   :  { %1012 = vmatprep.subr.bf16.mxu0 %v1328_v5  ;;  %v1338_v12 = vld [vmem:[%s2031_s1 + $0x34] ss:$8 sps:$4 sm:$0xff]   ;;  %v1342_v14 = vld [vmem:[%s2031_s1 + $0x30] ss:$8 sps:$4 sm:$0xff]   ;;  %v1344_v16 = vld [vmem:[%s2031_s1 + $0x44] ss:$8 sps:$4 sm:$0xff]  }
   0x6   :  { %v1340_v13 = vld [vmem:[%s2031_s1 + $0x234] ss:$8 sps:$4 sm:$0xff]   ;;  %v1343_v15 = vld [vmem:[%s2031_s1 + $0x230] ss:$8 sps:$4 sm:$0xff]   ;;  %v1346_v17 = vld [vmem:[%s2031_s1 + $0x244] ss:$8 sps:$4 sm:$0xff]  }
   0x7   :  { %931 = vmatpush1.bf16.msra.mxu1 %v1330_v6  ;;  %v1348_v18 = vld [vmem:[%s2031_s1 + $0x40] ss:$8 sps:$4 sm:$0xff]   ;;  %v1350_v20 = vld [vmem:[%s2031_s1 + $0x54] ss:$8 sps:$4 sm:$0xff]   ;;  %v1354_v22 = vld [vmem:[%s2031_s1 + $0x50] ss:$8 sps:$4 sm:$0xff]  }
   0x8   :  { %1013 = vmatpush1.bf16.msra.mxu0 %v1331_v7  ;;  %932 = vmatprep.subr.bf16.mxu1 %v1332_v8  ;;  %v1349_v19 = vld [vmem:[%s2031_s1 + $0x240] ss:$8 sps:$4 sm:$0xff]   ;;  %v1352_v21 = vld [vmem:[%s2031_s1 + $0x254] ss:$8 sps:$4 sm:$0xff]   ;;  %v1355_v23 = vld [vmem:[%s2031_s1 + $0x250] ss:$8 sps:$4 sm:$0xff]  }
   0x9   :  { %1014 = vmatprep.subr.bf16.mxu0 %v1334_v9  ;;  %v1356_v24 = vld [vmem:[%s2031_s1 + $0x64] ss:$8 sps:$4 sm:$0xff]   ;;  %v1360_v26 = vld [vmem:[%s2031_s1 + $0x60] ss:$8 sps:$4 sm:$0xff]   ;;  %v1362_v28 = vld [vmem:[%s2031_s1 + $0x74] ss:$8 sps:$4 sm:$0xff]  }
   0xa   :  { %v1358_v25 = vld [vmem:[%s2031_s1 + $0x264] ss:$8 sps:$4 sm:$0xff]   ;;  %v1361_v27 = vld [vmem:[%s2031_s1 + $0x260] ss:$8 sps:$4 sm:$0xff]   ;;  %v1364_v29 = vld [vmem:[%s2031_s1 + $0x274] ss:$8 sps:$4 sm:$0xff]  }
   0xb   :  { %933 = vmatpush1.bf16.msra.mxu1 %v1336_v10  ;;  %v1366_v30 = vld [vmem:[%s2031_s1 + $0x70] ss:$8 sps:$4 sm:$0xff]   ;;  %v1368_v32 = vld [vmem:[%s2031_s1 + $0x84] ss:$8 sps:$4 sm:$0xff]   ;;  %v1372_v34 = vld [vmem:[%s2031_s1 + $0x80] ss:$8 sps:$4 sm:$0xff]  }
   0xc   :  { %1015 = vmatpush1.bf16.msra.mxu0 %v1337_v11  ;;  %934 = vmatprep.subr.bf16.mxu1 %v1338_v12  ;;  %v1367_v31 = vld [vmem:[%s2031_s1 + $0x270] ss:$8 sps:$4 sm:$0xff]   ;;  %v1370_v33 = vld [vmem:[%s2031_s1 + $0x284] ss:$8 sps:$4 sm:$0xff]   ;;  %v1373_v35 = vld [vmem:[%s2031_s1 + $0x280] ss:$8 sps:$4 sm:$0xff]  }
   0xd   :  { %1016 = vmatprep.subr.bf16.mxu0 %v1340_v13  ;;  %v1374_v36 = vld [vmem:[%s2031_s1 + $0x94] ss:$8 sps:$4 sm:$0xff]   ;;  %v1378_v38 = vld [vmem:[%s2031_s1 + $0x90] ss:$8 sps:$4 sm:$0xff]   ;;  %v1380_v40 = vld [vmem:[%s2031_s1 + $0xa4] ss:$8 sps:$4 sm:$0xff]  }
   0xe   :  { %v1376_v37 = vld [vmem:[%s2031_s1 + $0x294] ss:$8 sps:$4 sm:$0xff]   ;;  %v1379_v39 = vld [vmem:[%s2031_s1 + $0x290] ss:$8 sps:$4 sm:$0xff]   ;;  %v1382_v41 = vld [vmem:[%s2031_s1 + $0x2a4] ss:$8 sps:$4 sm:$0xff]  }
   0xf   :  { %935 = vmatpush1.bf16.msra.mxu1 %v1342_v14  ;;  %v1384_v42 = vld [vmem:[%s2031_s1 + $0xa0] ss:$8 sps:$4 sm:$0xff]   ;;  %v1386_v44 = vld [vmem:[%s2031_s1 + $0xb4] ss:$8 sps:$4 sm:$0xff]   ;;  %v1390_v47 = vld [vmem:[%s2031_s1 + $0xb0] ss:$8 sps:$4 sm:$0xff]  }
  0x10   :  { %1017 = vmatpush1.bf16.msra.mxu0 %v1343_v15  ;;  %936 = vmatprep.subr.bf16.mxu1 %v1344_v16  ;;  %v1385_v43 = vld [vmem:[%s2031_s1 + $0x2a0] ss:$8 sps:$4 sm:$0xff]   ;;  %v1388_v45 = vld [vmem:[%s2031_s1 + $0x2b4] ss:$8 sps:$4 sm:$0xff]   ;;  %v1391_v49 = vld [vmem:[%s2031_s1 + $0x2b0] ss:$8 sps:$4 sm:$0xff]  }
  0x11   :  { %1018 = vmatprep.subr.bf16.mxu0 %v1346_v17  ;;  %v15_v46 = vld [vmem:[%s2032_s0] sm:$0x77]  ;;  %v17_v50 = vld [vmem:[%s2032_s0 + $0x10] sm:$0x77] }
  0x12   :  { %v1149_v48 = vcombine.high %v15_v46, %v15_v46  ;;  %v1392_v51 = vld [vmem:[%s2031_s1 + $0xc4] ss:$8 sps:$4 sm:$0xff]   ;;  %v1153_v53 = vcombine.high %v17_v50, %v17_v50  ;;  %v1396_v54 = vld [vmem:[%s2031_s1 + $0xc0] ss:$8 sps:$4 sm:$0xff]   ;;  %v1398_v56 = vld [vmem:[%s2031_s1 + $0xd4] ss:$8 sps:$4 sm:$0xff]   ;;  %v1148_v6 = vcombine.low %v15_v46, %v15_v46  ;;  %v1152_v7 = vcombine.low %v17_v50, %v17_v50 }
  0x13   :  { %937 = vmatpush1.bf16.msra.mxu1 %v1348_v18  ;;  %v1394_v52 = vld [vmem:[%s2031_s1 + $0x2c4] ss:$8 sps:$4 sm:$0xff]   ;;  %v1397_v55 = vld [vmem:[%s2031_s1 + $0x2c0] ss:$8 sps:$4 sm:$0xff]   ;;  %v1400_v57 = vld [vmem:[%s2031_s1 + $0x2d4] ss:$8 sps:$4 sm:$0xff]  }
  0x14   :  { %1019 = vmatpush1.bf16.msra.mxu0 %v1349_v19  ;;  %938 = vmatprep.subr.bf16.mxu1 %v1350_v20  ;;  %v1402_v58 = vld [vmem:[%s2031_s1 + $0xd0] ss:$8 sps:$4 sm:$0xff]   ;;  %v1404_v60 = vld [vmem:[%s2031_s1 + $0xe4] ss:$8 sps:$4 sm:$0xff]   ;;  %v1408_v62 = vld [vmem:[%s2031_s1 + $0xe0] ss:$8 sps:$4 sm:$0xff]  }
  0x15   :  { %1020 = vmatprep.subr.bf16.mxu0 %v1352_v21  ;;  %960 = vmatprep.mubr.bf16.mxu1 %v1149_v48  ;;  %v1403_v59 = vld [vmem:[%s2031_s1 + $0x2d0] ss:$8 sps:$4 sm:$0xff]   ;;  %v1406_v61 = vld [vmem:[%s2031_s1 + $0x2e4] ss:$8 sps:$4 sm:$0xff]   ;;  %v1409_v63 = vld [vmem:[%s2031_s1 + $0x2e0] ss:$8 sps:$4 sm:$0xff]  }
  0x16   :  { %1042 = vmatprep.mubr.bf16.mxu0 %v1153_v53  ;;  %v1410_v0 = vld [vmem:[%s2031_s1 + $0xf4] ss:$8 sps:$4 sm:$0xff]   ;;  %v1414_v2 = vld [vmem:[%s2031_s1 + $0xf0] ss:$8 sps:$4 sm:$0xff]   ;;  %v1420_v4 = vld [vmem:[%s2031_s1 + $0x104] ss:$8 sps:$4 sm:$0xff]  }
  0x17   :  { %939 = vmatpush1.bf16.msra.mxu1 %v1354_v22  ;;  %v1412_v1 = vld [vmem:[%s2031_s1 + $0x2f4] ss:$8 sps:$4 sm:$0xff]   ;;  %v1415_v3 = vld [vmem:[%s2031_s1 + $0x2f0] ss:$8 sps:$4 sm:$0xff]   ;;  %v1425_v5 = vld [vmem:[%s2031_s1 + $0x304] ss:$8 sps:$4 sm:$0xff]  }
  0x18   :  { %1021 = vmatpush1.bf16.msra.mxu0 %v1355_v23  ;;  %940 = vmatprep.subr.bf16.mxu1 %v1356_v24  ;;  %v1418_v8 = vld [vmem:[%s2031_s1 + $0x100] ss:$8 sps:$4 sm:$0xff]   ;;  %v1428_v10 = vld [vmem:[%s2031_s1 + $0x114] ss:$8 sps:$4 sm:$0xff]   ;;  %v1426_v12 = vld [vmem:[%s2031_s1 + $0x110] ss:$8 sps:$4 sm:$0xff]  }
  0x19   :  { %1022 = vmatprep.subr.bf16.mxu0 %v1358_v25  ;;  %v1423_v9 = vld [vmem:[%s2031_s1 + $0x300] ss:$8 sps:$4 sm:$0xff]   ;;  %v1431_v11 = vld [vmem:[%s2031_s1 + $0x314] ss:$8 sps:$4 sm:$0xff]   ;;  %v1429_v13 = vld [vmem:[%s2031_s1 + $0x310] ss:$8 sps:$4 sm:$0xff]  }
  0x1a   :  { %v1434_v14 = vld [vmem:[%s2031_s1 + $0x124] ss:$8 sps:$4 sm:$0xff]   ;;  %v1432_v16 = vld [vmem:[%s2031_s1 + $0x120] ss:$8 sps:$4 sm:$0xff]   ;;  %v1440_v18 = vld [vmem:[%s2031_s1 + $0x134] ss:$8 sps:$4 sm:$0xff]  }
  0x1b   :  { %941 = vmatpush1.bf16.msra.mxu1 %v1360_v26  ;;  %v1437_v15 = vld [vmem:[%s2031_s1 + $0x324] ss:$8 sps:$4 sm:$0xff]   ;;  %v1435_v17 = vld [vmem:[%s2031_s1 + $0x320] ss:$8 sps:$4 sm:$0xff]   ;;  %v1443_v19 = vld [vmem:[%s2031_s1 + $0x334] ss:$8 sps:$4 sm:$0xff]  }
  0x1c   :  { %1023 = vmatpush1.bf16.msra.mxu0 %v1361_v27  ;;  %942 = vmatprep.subr.bf16.mxu1 %v1362_v28  ;;  %v1438_v20 = vld [vmem:[%s2031_s1 + $0x130] ss:$8 sps:$4 sm:$0xff]   ;;  %v1446_v22 = vld [vmem:[%s2031_s1 + $0x144] ss:$8 sps:$4 sm:$0xff]   ;;  %v1444_v24 = vld [vmem:[%s2031_s1 + $0x140] ss:$8 sps:$4 sm:$0xff]  }
  0x1d   :  { %1024 = vmatprep.subr.bf16.mxu0 %v1364_v29  ;;  %v1441_v21 = vld [vmem:[%s2031_s1 + $0x330] ss:$8 sps:$4 sm:$0xff]   ;;  %v1449_v23 = vld [vmem:[%s2031_s1 + $0x344] ss:$8 sps:$4 sm:$0xff]   ;;  %v1447_v25 = vld [vmem:[%s2031_s1 + $0x340] ss:$8 sps:$4 sm:$0xff]  }
  0x1e   :  { %v1452_v26 = vld [vmem:[%s2031_s1 + $0x154] ss:$8 sps:$4 sm:$0xff]   ;;  %v1450_v28 = vld [vmem:[%s2031_s1 + $0x150] ss:$8 sps:$4 sm:$0xff]   ;;  %v1482_v50 = vld [vmem:[%s2031_s1 + $0x1a4] ss:$8 sps:$4 sm:$0xff]  }
  0x1f   :  { %943 = vmatpush1.bf16.msra.mxu1 %v1366_v30  ;;  %v1455_v27 = vld [vmem:[%s2031_s1 + $0x354] ss:$8 sps:$4 sm:$0xff]   ;;  %v1453_v29 = vld [vmem:[%s2031_s1 + $0x350] ss:$8 sps:$4 sm:$0xff]   ;;  %v1458_v30 = vld [vmem:[%s2031_s1 + $0x164] ss:$8 sps:$4 sm:$0xff]  }
  0x20   :  { %1025 = vmatpush1.bf16.msra.mxu0 %v1367_v31  ;;  %944 = vmatprep.subr.bf16.mxu1 %v1368_v32  ;;  %v1461_v31 = vld [vmem:[%s2031_s1 + $0x364] ss:$8 sps:$4 sm:$0xff]   ;;  %v1476_v46 = vld [vmem:[%s2031_s1 + $0x194] ss:$8 sps:$4 sm:$0xff]   ;;  %v1474_v48 = vld [vmem:[%s2031_s1 + $0x190] ss:$8 sps:$4 sm:$0xff]  }
  0x21   :  { %1026 = vmatprep.subr.bf16.mxu0 %v1370_v33  ;;  %v1845_v32 = vld [vmem:[%s2032_s0 + $0x8] sm:$0x77]  ;;  %v1850_v33 = vld [vmem:[%s2032_s0 + $0x18] sm:$0x77] }
  0x22   :  { %v1483_v53 = vld [vmem:[%s2031_s1 + $0x3a0] ss:$8 sps:$4 sm:$0xff]  }
  0x23   :  { %945 = vmatpush1.bf16.msra.mxu1 %v1372_v34  ;;  %v1456_v34 = vld [vmem:[%s2031_s1 + $0x160] ss:$8 sps:$4 sm:$0xff]  }
  0x24   :  { %1027 = vmatpush1.bf16.msra.mxu0 %v1373_v35  ;;  %946 = vmatprep.subr.bf16.mxu1 %v1374_v36  ;;  %v1459_v35 = vld [vmem:[%s2031_s1 + $0x360] ss:$8 sps:$4 sm:$0xff]   ;;  %v1151_v36 = vcombine.high %v1845_v32, %v1845_v32 }
  0x25   :  { %1028 = vmatprep.subr.bf16.mxu0 %v1376_v37  ;;  %v1155_v37 = vcombine.high %v1850_v33, %v1850_v33 }
  0x27   :  { %947 = vmatpush1.bf16.msra.mxu1 %v1378_v38  ;;  %v1464_v38 = vld [vmem:[%s2031_s1 + $0x174] ss:$8 sps:$4 sm:$0xff]  }
  0x28   :  { %1029 = vmatpush1.bf16.msra.mxu0 %v1379_v39  ;;  %948 = vmatprep.subr.bf16.mxu1 %v1380_v40  ;;  %v1467_v39 = vld [vmem:[%s2031_s1 + $0x374] ss:$8 sps:$4 sm:$0xff]   ;;  %v1462_v40 = vld [vmem:[%s2031_s1 + $0x170] ss:$8 sps:$4 sm:$0xff]  }
  0x29   :  { %1030 = vmatprep.subr.bf16.mxu0 %v1382_v41  ;;  %v1465_v41 = vld [vmem:[%s2031_s1 + $0x370] ss:$8 sps:$4 sm:$0xff]  }
  0x2b   :  { %949 = vmatpush1.bf16.msra.mxu1 %v1384_v42  ;;  %v1470_v42 = vld [vmem:[%s2031_s1 + $0x184] ss:$8 sps:$4 sm:$0xff]  }
  0x2c   :  { %1031 = vmatpush1.bf16.msra.mxu0 %v1385_v43  ;;  %950 = vmatprep.subr.bf16.mxu1 %v1386_v44  ;;  %v1473_v43 = vld [vmem:[%s2031_s1 + $0x384] ss:$8 sps:$4 sm:$0xff]   ;;  %v1468_v44 = vld [vmem:[%s2031_s1 + $0x180] ss:$8 sps:$4 sm:$0xff]  }
  0x2d   :  { %1032 = vmatprep.subr.bf16.mxu0 %v1388_v45  ;;  %v1471_v45 = vld [vmem:[%s2031_s1 + $0x380] ss:$8 sps:$4 sm:$0xff]  }
  0x2f   :  { %951 = vmatpush1.bf16.msra.mxu1 %v1390_v47  ;;  %v1479_v47 = vld [vmem:[%s2031_s1 + $0x394] ss:$8 sps:$4 sm:$0xff]  }
  0x30   :  { %1033 = vmatpush1.bf16.msra.mxu0 %v1391_v49  ;;  %952 = vmatprep.subr.bf16.mxu1 %v1392_v51  ;;  %v1477_v49 = vld [vmem:[%s2031_s1 + $0x390] ss:$8 sps:$4 sm:$0xff]   ;;  %v1485_v51 = vld [vmem:[%s2031_s1 + $0x3a4] ss:$8 sps:$4 sm:$0xff]  }
  0x31   :  { %1034 = vmatprep.subr.bf16.mxu0 %v1394_v52  ;;  %v1480_v52 = vld [vmem:[%s2031_s1 + $0x1a0] ss:$8 sps:$4 sm:$0xff]  }
  0x33   :  { %953 = vmatpush1.bf16.msra.mxu1 %v1396_v54  ;;  %v1488_v54 = vld [vmem:[%s2031_s1 + $0x1b4] ss:$8 sps:$4 sm:$0xff]  }
  0x34   :  { %1035 = vmatpush1.bf16.msra.mxu0 %v1397_v55  ;;  %954 = vmatprep.subr.bf16.mxu1 %v1398_v56  ;;  %v1491_v55 = vld [vmem:[%s2031_s1 + $0x3b4] ss:$8 sps:$4 sm:$0xff]   ;;  %v1486_v56 = vld [vmem:[%s2031_s1 + $0x1b0] ss:$8 sps:$4 sm:$0xff]  }
  0x35   :  { %1036 = vmatprep.subr.bf16.mxu0 %v1400_v57  ;;  %v1489_v57 = vld [vmem:[%s2031_s1 + $0x3b0] ss:$8 sps:$4 sm:$0xff]  }
  0x37   :  { %955 = vmatpush1.bf16.msra.mxu1 %v1402_v58  ;;  %v1494_v58 = vld [vmem:[%s2031_s1 + $0x1c4] ss:$8 sps:$4 sm:$0xff]  }
  0x38   :  { %1037 = vmatpush1.bf16.msra.mxu0 %v1403_v59  ;;  %956 = vmatprep.subr.bf16.mxu1 %v1404_v60  ;;  %v1497_v59 = vld [vmem:[%s2031_s1 + $0x3c4] ss:$8 sps:$4 sm:$0xff]   ;;  %v1492_v60 = vld [vmem:[%s2031_s1 + $0x1c0] ss:$8 sps:$4 sm:$0xff]  }
  0x39   :  { %1038 = vmatprep.subr.bf16.mxu0 %v1406_v61  ;;  %v1495_v61 = vld [vmem:[%s2031_s1 + $0x3c0] ss:$8 sps:$4 sm:$0xff]  }
  0x3b   :  { %957 = vmatpush1.bf16.msra.mxu1 %v1408_v62  ;;  %v1500_v62 = vld [vmem:[%s2031_s1 + $0x1d4] ss:$8 sps:$4 sm:$0xff]  }
  0x3c   :  { %1039 = vmatpush1.bf16.msra.mxu0 %v1409_v63  ;;  %958 = vmatprep.subr.bf16.mxu1 %v1410_v0  ;;  %v1503_v63 = vld [vmem:[%s2031_s1 + $0x3d4] ss:$8 sps:$4 sm:$0xff]   ;;  %v1498_v0 = vld [vmem:[%s2031_s1 + $0x1d0] ss:$8 sps:$4 sm:$0xff]  }
  0x3d   :  { %1040 = vmatprep.subr.bf16.mxu0 %v1412_v1  ;;  %v1501_v1 = vld [vmem:[%s2031_s1 + $0x3d0] ss:$8 sps:$4 sm:$0xff]  }
  0x3f   :  { %959 = vmatpush1.bf16.msra.mxu1 %v1414_v2  ;;  %v1506_v2 = vld [vmem:[%s2031_s1 + $0x1e4] ss:$8 sps:$4 sm:$0xff]  }
  0x40   :  { %1041 = vmatpush1.bf16.msra.mxu0 %v1415_v3  ;;  %969 = vmatprep.subr.bf16.mxu1 %v1420_v4  ;;  %v1509_v3 = vld [vmem:[%s2031_s1 + $0x3e4] ss:$8 sps:$4 sm:$0xff]   ;;  %v1504_v4 = vld [vmem:[%s2031_s1 + $0x1e0] ss:$8 sps:$4 sm:$0xff]  }
  0x41   :  { %1051 = vmatprep.subr.bf16.mxu0 %v1425_v5  ;;  %v1507_v5 = vld [vmem:[%s2031_s1 + $0x3e0] ss:$8 sps:$4 sm:$0xff]  }
  0x42   :  { %961 = vmatmul.mubr.bf16.vlgmr.msra.gmra.mrb[0].mxu1 %v1148_v6  ;;  %v1512_v6 = vld [vmem:[%s2031_s1 + $0x1f4] ss:$8 sps:$4 sm:$0xff]  }
  0x43   :  { %1043 = vmatmul.mubr.bf16.vlgmr.msra.gmra.mrb[0].mxu0 %v1152_v7  ;;  %970 = vmatpush1.bf16.msra.mxu1 %v1418_v8  ;;  %v1515_v7 = vld [vmem:[%s2031_s1 + $0x3f4] ss:$8 sps:$4 sm:$0xff]   ;;  %v1510_v8 = vld [vmem:[%s2031_s1 + $0x1f0] ss:$8 sps:$4 sm:$0xff]  }
  0x44   :  { %1052 = vmatpush1.bf16.msra.mxu0 %v1423_v9  ;;  %971 = vmatprep.subr.bf16.mxu1 %v1428_v10  ;;  %v1513_v9 = vld [vmem:[%s2031_s1 + $0x3f0] ss:$8 sps:$4 sm:$0xff]   ;;  %v1522_v10 = vld [vmem:[%s2031_s1 + $0x404] ss:$8 sps:$4 sm:$0xff]  }
  0x45   :  { %1053 = vmatprep.subr.bf16.mxu0 %v1431_v11  ;;  %1001 = vmatprep.mubr.bf16.mxu1 %v1151_v36  ;;  %v1150_v11 = vcombine.low %v1845_v32, %v1845_v32 }
  0x46   :  { %1083 = vmatprep.mubr.bf16.mxu0 %v1155_v37  ;;  %v164_v37 = vld [vmem:[%s2033_s2] sm:$0x3] }
  0x47   :  { %972 = vmatpush1.bf16.msra.mxu1 %v1426_v12  ;;  %v1154_v12 = vcombine.low %v1850_v33, %v1850_v33 }
  0x48   :  { %1054 = vmatpush1.bf16.msra.mxu0 %v1429_v13  ;;  %973 = vmatprep.subr.bf16.mxu1 %v1434_v14  ;;  %v1520_v13 = vld [vmem:[%s2031_s1 + $0x400] ss:$8 sps:$4 sm:$0xff]   ;;  %v1525_v14 = vld [vmem:[%s2031_s1 + $0x414] ss:$8 sps:$4 sm:$0xff]  }
  0x49   :  { %1055 = vmatprep.subr.bf16.mxu0 %v1437_v15  ;;  %v1523_v15 = vld [vmem:[%s2031_s1 + $0x410] ss:$8 sps:$4 sm:$0xff]  }
  0x4b   :  { %974 = vmatpush1.bf16.msra.mxu1 %v1432_v16  ;;  %v1545_v16 = vmov 0  }
  0x4c   :  { %1056 = vmatpush1.bf16.msra.mxu0 %v1435_v17  ;;  %975 = vmatprep.subr.bf16.mxu1 %v1440_v18  ;;  %v1528_v17 = vld [vmem:[%s2031_s1 + $0x424] ss:$8 sps:$4 sm:$0xff]   ;;  %v1526_v18 = vld [vmem:[%s2031_s1 + $0x420] ss:$8 sps:$4 sm:$0xff]  }
  0x4d   :  { %1057 = vmatprep.subr.bf16.mxu0 %v1443_v19  ;;  %v1531_v19 = vld [vmem:[%s2031_s1 + $0x434] ss:$8 sps:$4 sm:$0xff]  }
  0x4f   :  { %976 = vmatpush1.bf16.msra.mxu1 %v1438_v20  ;;  %v1529_v20 = vld [vmem:[%s2031_s1 + $0x430] ss:$8 sps:$4 sm:$0xff]  }
  0x50   :  { %1058 = vmatpush1.bf16.msra.mxu0 %v1441_v21  ;;  %977 = vmatprep.subr.bf16.mxu1 %v1446_v22  ;;  %v1534_v21 = vld [vmem:[%s2031_s1 + $0x444] ss:$8 sps:$4 sm:$0xff]   ;;  %v1532_v22 = vld [vmem:[%s2031_s1 + $0x440] ss:$8 sps:$4 sm:$0xff]  }
  0x51   :  { %1059 = vmatprep.subr.bf16.mxu0 %v1449_v23  ;;  %v1537_v23 = vld [vmem:[%s2031_s1 + $0x454] ss:$8 sps:$4 sm:$0xff]  }
  0x53   :  { %978 = vmatpush1.bf16.msra.mxu1 %v1444_v24  ;;  %v1535_v24 = vld [vmem:[%s2031_s1 + $0x450] ss:$8 sps:$4 sm:$0xff]  }
  0x54   :  { %1060 = vmatpush1.bf16.msra.mxu0 %v1447_v25  ;;  %979 = vmatprep.subr.bf16.mxu1 %v1452_v26  ;;  %v1540_v25 = vld [vmem:[%s2031_s1 + $0x464] ss:$8 sps:$4 sm:$0xff]   ;;  %v1538_v26 = vld [vmem:[%s2031_s1 + $0x460] ss:$8 sps:$4 sm:$0xff]  }
  0x55   :  { %1061 = vmatprep.subr.bf16.mxu0 %v1455_v27  ;;  %v1543_v27 = vld [vmem:[%s2031_s1 + $0x474] ss:$8 sps:$4 sm:$0xff]  }
  0x57   :  { %980 = vmatpush1.bf16.msra.mxu1 %v1450_v28  ;;  %v1541_v28 = vld [vmem:[%s2031_s1 + $0x470] ss:$8 sps:$4 sm:$0xff]  }
  0x58   :  { %1062 = vmatpush1.bf16.msra.mxu0 %v1453_v29  ;;  %981 = vmatprep.subr.bf16.mxu1 %v1458_v30  ;;  %v1544_v29 = vld [vmem:[%s2032_s0 + $0x20] ss:$0 sps:$4 sm:$0x77]  }
  0x59   :  { %1063 = vmatprep.subr.bf16.mxu0 %v1461_v31 }
  0x5b   :  { %982 = vmatpush1.bf16.msra.mxu1 %v1456_v34  ;;  %v166_v34 = vlaneseq }
  0x5c   :  { %1064 = vmatpush1.bf16.msra.mxu0 %v1459_v35  ;;  %983 = vmatprep.subr.bf16.mxu1 %v1464_v38 }
  0x5d   :  { %1065 = vmatprep.subr.bf16.mxu0 %v1467_v39  ;;  %v167_v35 = vshrl.u32 %v166_v34, 7 }
  0x5f   :  { %984 = vmatpush1.bf16.msra.mxu1 %v1462_v40  ;;  %v168_v36 = vsub.s32 0, %v167_v35  ;;  %v172_v38 = vsub.s32 1, %v167_v35 }
  0x60   :  { %1066 = vmatpush1.bf16.msra.mxu0 %v1465_v41  ;;  %985 = vmatprep.subr.bf16.mxu1 %v1470_v42 }
  0x61   :  { %1067 = vmatprep.subr.bf16.mxu0 %v1473_v43  ;;  %v169_v39 = vrot.slane %v164_v37, %v168_v36  ;;  %v173_v40 = vrot.slane %v164_v37, %v172_v38 }
  0x63   :  { %986 = vmatpush1.bf16.msra.mxu1 %v1468_v44 }
  0x64   :  { %1068 = vmatpush1.bf16.msra.mxu0 %v1471_v45  ;;  %987 = vmatprep.subr.bf16.mxu1 %v1476_v46 }
  0x65   :  { %1069 = vmatprep.subr.bf16.mxu0 %v1479_v47 }
  0x67   :  { %988 = vmatpush1.bf16.msra.mxu1 %v1474_v48 }
  0x68   :  { %1070 = vmatpush1.bf16.msra.mxu0 %v1477_v49  ;;  %989 = vmatprep.subr.bf16.mxu1 %v1482_v50 }
  0x69   :  { %1071 = vmatprep.subr.bf16.mxu0 %v1485_v51 }
  0x6b   :  { %990 = vmatpush1.bf16.msra.mxu1 %v1480_v52 }
  0x6c   :  { %1072 = vmatpush1.bf16.msra.mxu0 %v1483_v53  ;;  %991 = vmatprep.subr.bf16.mxu1 %v1488_v54 }
  0x6d   :  { %1073 = vmatprep.subr.bf16.mxu0 %v1491_v55 }
  0x6f   :  { %992 = vmatpush1.bf16.msra.mxu1 %v1486_v56 }
  0x70   :  { %1074 = vmatpush1.bf16.msra.mxu0 %v1489_v57  ;;  %993 = vmatprep.subr.bf16.mxu1 %v1494_v58 }
  0x71   :  { %1075 = vmatprep.subr.bf16.mxu0 %v1497_v59 }
  0x73   :  { %994 = vmatpush1.bf16.msra.mxu1 %v1492_v60 }
  0x74   :  { %1076 = vmatpush1.bf16.msra.mxu0 %v1495_v61  ;;  %995 = vmatprep.subr.bf16.mxu1 %v1500_v62 }
  0x75   :  { %1077 = vmatprep.subr.bf16.mxu0 %v1503_v63 }
  0x77   :  { %996 = vmatpush1.bf16.msra.mxu1 %v1498_v0 }
  0x78   :  { %1078 = vmatpush1.bf16.msra.mxu0 %v1501_v1  ;;  %997 = vmatprep.subr.bf16.mxu1 %v1506_v2 }
  0x79   :  { %1079 = vmatprep.subr.bf16.mxu0 %v1509_v3 }
  0x7b   :  { %998 = vmatpush1.bf16.msra.mxu1 %v1504_v4 }
  0x7c   :  { %1080 = vmatpush1.bf16.msra.mxu0 %v1507_v5  ;;  %999 = vmatprep.subr.bf16.mxu1 %v1512_v6 }
  0x7d   :  { %1081 = vmatprep.subr.bf16.mxu0 %v1515_v7 }
  0x7f   :  { %1000 = vmatpush1.bf16.msra.mxu1 %v1510_v8 }
  0x80   :  { %1082 = vmatpush1.bf16.msra.mxu0 %v1513_v9 }
  0x81   :  { %1092 = vmatprep.subr.bf16.mxu0 %v1522_v10 }
  0x82   :  { %1002 = vmatmul.mubr.bf16.vlgmr.msra.gmra.mrb[0].mxu1 %v1150_v11 }
  0x83   :  { %1084 = vmatmul.mubr.bf16.vlgmr.msra.gmra.mrb[0].mxu0 %v1154_v12 }
  0x84   :  { %1093 = vmatpush1.bf16.msra.mxu0 %v1520_v13  ;;  %1124 = vmatprep.mubr.bf16.mxu0 %v1545_v16 }
  0x85   :  { %1094 = vmatprep.subr.bf16.mxu0 %v1525_v14 }
  0x88   :  { %1095 = vmatpush1.bf16.msra.mxu0 %v1523_v15 }
  0x89   :  { %1096 = vmatprep.subr.bf16.mxu0 %v1528_v17 }
  0x8c   :  { %1097 = vmatpush1.bf16.msra.mxu0 %v1526_v18 }
  0x8d   :  { %1098 = vmatprep.subr.bf16.mxu0 %v1531_v19 }
  0x90   :  { %1099 = vmatpush1.bf16.msra.mxu0 %v1529_v20 }
  0x91   :  { %1100 = vmatprep.subr.bf16.mxu0 %v1534_v21 }
  0x94   :  { %1101 = vmatpush1.bf16.msra.mxu0 %v1532_v22 }
  0x95   :  { %1102 = vmatprep.subr.bf16.mxu0 %v1537_v23 }
  0x98   :  { %1103 = vmatpush1.bf16.msra.mxu0 %v1535_v24 }
  0x99   :  { %1104 = vmatprep.subr.bf16.mxu0 %v1540_v25 }
  0x9c   :  { %1105 = vmatpush1.bf16.msra.mxu0 %v1538_v26 }
  0x9d   :  { %1106 = vmatprep.subr.bf16.mxu0 %v1543_v27 }
  0xa0   :  { %1107 = vmatpush1.bf16.msra.mxu0 %v1541_v28 }
  0xa3   :  { %1125 = vmatmul.mubr.bf16.vlgmr.msra.gmra.mrb[0].mxu0 %v1544_v29 }
 0x155   :  { %v1003_v30 = vpop.f32.mrb[0].mxu1 }
 0x156   :  { %v1005_v31 = vpop.f32.mrb[1].mxu1  ;;  %v1303_v41 = vadd.f32 %v1003_v30, %v169_v39 }
 0x157   :  { %v1007_v32 = vpop.f32.mrb[2].mxu1  ;;  %v1305_v42 = vadd.f32 %v1005_v31, %v173_v40 }
 0x158   :  { %v1008_v33 = vpop.f32.mrb[3].mxu1 }
 0x176   :  { %v1126_v43 = vpop.f32.mrb[0].mxu0 }
 0x177   :  { %v1304_v44 = vadd.f32 %v1303_v41, %v1126_v43  ;;  %v1128_v45 = vpop.f32.mrb[1].mxu0 }
 0x178   :  { %v1306_v46 = vadd.f32 %v1305_v42, %v1128_v45  ;;  %v1130_v47 = vpop.f32.mrb[2].mxu0 }
 0x179   :  { %v1133_v48 = vmax.f32 %v1304_v44, 0.0  ;;  %v1131_v49 = vpop.f32.mrb[3].mxu0 }
 0x17a   :  { %v1134_v50 = vmax.f32 %v1306_v46, 0.0 }
 0x17c   :  { %v1302_v51 = vpack.c.bf16 %v1134_v50, %v1133_v48 }
 0x17e   :  { %1143 = vst [vmem:[%s2034_s3] sm:$0x77] %v1302_v51 }

// kernel: encoder_cnn_forward.9
= control target key start
LH: loop header
LB: loop body
LE: loop exit
PB: predicated region body
PF: predicated region fallthrough
CT: control target
= control target key end

     0   :  { %v448_v20 = vmov 0.0   ;;  %vm449_vm0 = vmmov 0   ;;  %vm235_vm1 = vcmask 261120   ;;  %vm347_vm2 = vcmask 128000   ;;  %s569_s1 = inlined_call_operand.vmem [shape: bf16[256,32], index: 1, kind: input, shape index: {}]   ;;  %s570_s0 = inlined_call_operand.vmem [shape: bf16[6,256], index: 0, kind: input, shape index: {}]   ;;  %s571_s3 = inlined_call_operand.vmem [shape: bf16[32,32], index: 3, kind: input, shape index: {}]   ;;  %s572_s5 = inlined_call_operand.vmem [shape: bf16[32,16], index: 5, kind: input, shape index: {}]   ;;  %s573_s2 = inlined_call_operand.vmem [shape: f32[1,32], index: 2, kind: input, shape index: {}]   ;;  %s574_s4 = inlined_call_operand.vmem [shape: f32[1,32], index: 4, kind: input, shape index: {}]   ;;  %s575_s6 = inlined_call_operand.vmem [shape: f32[1,16], index: 6, kind: input, shape index: {}]   ;;  %s576_s7 = inlined_call_operand.vmem [shape: f32[6,16], index: 7, kind: output, shape index: {}]  }
   0x1   :  { %v426_v0 = vld [vmem:[%s569_s1 + $0x40] sm:$0xff]   ;;  %v428_v2 = vld [vmem:[%s569_s1 + $0x48] sm:$0xff]   ;;  %v430_v4 = vld [vmem:[%s569_s1 + $0x50] sm:$0xff]   ;;  %408 = vmatprep.subr.bf16.mxu1 %v448_v20  ;;  %412 = vmatprep.mubr.msk.bf16.mxu1 %vm449_vm0, %v448_v20 }
   0x2   :  { %v427_v1 = vld [vmem:[%s569_s1] sm:$0xff]   ;;  %380 = vmatprep.subr.bf16.mxu0 %v426_v0  ;;  %v429_v3 = vld [vmem:[%s569_s1 + $0x8] sm:$0xff]   ;;  %v431_v5 = vld [vmem:[%s569_s1 + $0x10] sm:$0xff]  }
   0x3   :  { %381 = vmatpush3.bf16.msra.mxu0 %v427_v1  ;;  %v432_v6 = vld [vmem:[%s569_s1 + $0x58] sm:$0xff]   ;;  %v434_v8 = vld [vmem:[%s569_s1 + $0x60] sm:$0xff]   ;;  %v436_v10 = vld [vmem:[%s569_s1 + $0x68] sm:$0xff]  }
   0x4   :  { %382 = vmatprep.subr.bf16.mxu0 %v428_v2  ;;  %v433_v7 = vld [vmem:[%s569_s1 + $0x18] sm:$0xff]   ;;  %v435_v9 = vld [vmem:[%s569_s1 + $0x20] sm:$0xff]   ;;  %v437_v13 = vld [vmem:[%s569_s1 + $0x28] sm:$0xff]  }
   0x5   :  { %v27_v11 = vld [vmem:[%s570_s0] sm:$0x77]  ;;  %v438_v14 = vld [vmem:[%s569_s1 + $0x70] sm:$0xff]   ;;  %v440_v16 = vld [vmem:[%s569_s1 + $0x78] sm:$0xff]  }
   0x6   :  { %v355_v12 = vcombine.high %v27_v11, %v27_v11  ;;  %v439_v15 = vld [vmem:[%s569_s1 + $0x30] sm:$0xff]   ;;  %v441_v17 = vld [vmem:[%s569_s1 + $0x38] sm:$0xff]   ;;  %v354_v18 = vcombine.low %v27_v11, %v27_v11  ;;  %v444_v19 = vld [vmem:[%s571_s3] sm:$0xff]  }
   0x7   :  { %383 = vmatpush3.bf16.msra.mxu0 %v429_v3  ;;  %409 = vmatpush3.bf16.msra.mxu1 %v444_v19  ;;  %v445_v21 = vld [vmem:[%s571_s3 + $0x8] sm:$0xff]   ;;  %v353_v23 = vld [vmem:[%s573_s2] ss:$0 sm:$0xff] }
   0x8   :  { %384 = vmatprep.subr.bf16.mxu0 %v430_v4  ;;  %202 = vmatprep.mubr.bf16.mxu0 %v355_v12  ;;  %v446_v30 = vld [vmem:[%s572_s5] sm:$0xff]   ;;  %v447_v32 = vld [vmem:[%s572_s5 + $0x8] sm:$0xff]  }
   0x9   :  { %410 = vmatprep.subr.bf16.mxu1 %v448_v20  ;;  %v372_v33 = vld [vmem:[%s574_s4] ss:$0 sm:$0xff] }
   0xa   :  { %v376_v41 = vld [vmem:[%s575_s6] ss:$0 sm:$0xff] }
   0xb   :  { %385 = vmatpush3.bf16.msra.mxu0 %v431_v5  ;;  %411 = vmatpush3.bf16.msra.mxu1 %v445_v21 }
   0xc   :  { %386 = vmatprep.subr.bf16.mxu0 %v432_v6  ;;  %416 = vmatprep.subr.bf16.mxu1 %v448_v20 }
   0xf   :  { %387 = vmatpush3.bf16.msra.mxu0 %v433_v7 }
  0x10   :  { %388 = vmatprep.subr.bf16.mxu0 %v434_v8 }
  0x13   :  { %389 = vmatpush3.bf16.msra.mxu0 %v435_v9 }
  0x14   :  { %390 = vmatprep.subr.bf16.mxu0 %v436_v10 }
  0x17   :  { %391 = vmatpush3.bf16.msra.mxu0 %v437_v13 }
  0x18   :  { %392 = vmatprep.subr.bf16.mxu0 %v438_v14 }
  0x1b   :  { %393 = vmatpush3.bf16.msra.mxu0 %v439_v15 }
  0x1c   :  { %394 = vmatprep.subr.bf16.mxu0 %v440_v16 }
  0x1f   :  { %395 = vmatpush3.bf16.msra.mxu0 %v441_v17 }
  0x22   :  { %203 = vmatmul.mubr.bf16.vlgmr.msra.gmra.mrb[0].mxu0 %v354_v18 }
  0xf5   :  { %v396_v22 = vpop.f32.mrb[0].mxu0 }
  0xf6   :  { %v397_v24 = vpop.f32.mrb[1].mxu0 }
  0xf7   :  { %v398_v25 = vadd.f32 %v397_v24, %v396_v22  ;;  %v399_v26 = vpop.f32.mrb[2].mxu0 }
  0xf8   :  { %v400_v27 = vpop.f32.mrb[3].mxu0 }
  0xf9   :  { %v205_v28 = vadd.f32 %v398_v25, %v353_v23 }
  0xfb   :  { %v210_v29 = vmax.f32 %v205_v28, 0.0 }
  0xfd   :  { %v211_v31 = vpack.c.bf16 %v210_v29, %v210_v29 }
  0xff   :  { %413 = vmatmul.mubr.msk.bf16.vlgmr.msra.gmra.mrb[0].mxu1 %vm235_vm1, %v211_v31 }
 0x100   :  { %417 = vmatpush3.bf16.msra.mxu1 %v446_v30  ;;  %420 = vmatprep.mubr.msk.bf16.mxu1 %vm449_vm0, %v448_v20 }
 0x101   :  { %418 = vmatprep.subr.bf16.mxu1 %v448_v20 }
 0x104   :  { %419 = vmatpush3.bf16.msra.mxu1 %v447_v32 }
 0x1d2   :  { %v273_v34 = vpop.f32.mrb[0].mxu1 }
 0x1d3   :  { %v274_v35 = vadd.f32 %v372_v33, %v273_v34  ;;  %v414_v36 = vpop.f32.mrb[1].mxu1 }
 0x1d4   :  { %v276_v37 = vpop.f32.mrb[2].mxu1 }
 0x1d5   :  { %v279_v38 = vmax.f32 %v274_v35, 0.0  ;;  %v415_v39 = vpop.f32.mrb[3].mxu1 }
 0x1d7   :  { %v280_v40 = vpack.c.bf16 %v279_v38, %v279_v38 }
 0x1d9   :  { %421 = vmatmul.mubr.msk.bf16.vlgmr.msra.gmra.mrb[4].mxu1 %vm235_vm1, %v280_v40 }
 0x2ac   :  { %v341_v42 = vpop.f32.mrb[4].mxu1 }
 0x2ad   :  { %v342_v43 = vadd.f32 %v376_v41, %v341_v42  ;;  %v422_v44 = vpop.f32.mrb[5].mxu1 }
 0x2ae   :  { %v344_v45 = vpop.f32.mrb[6].mxu1 }
 0x2af   :  { %348 = vst.msk [vmem:[%s576_s7] sm:$0x3f] %vm347_vm2, %v342_v43  ;;  %v423_v46 = vpop.f32.mrb[7].mxu1 }

</bundles_post_ra>
